<compile_context>
chip_gen: v7x
topology: tpu7x:2x2x1
jax: 0.10.0
libtpu: 0.0.40
codegen_flags: <defaults>
</compile_context>

<pallas_src>
import functools
import math

import jax
import jax.numpy as jnp
from jax.experimental import pallas as pl
from jax.experimental.pallas import tpu as pltpu

NUM_BIJECTORS = 5
HDIM = 400                     # logical hidden size; no HBM-side padding
LOG_2PI = math.log(2.0 * math.pi)


def _round_up(x, m):
    return (x + m - 1) // m * m


def _density_kernel(state_ref, action_ref, target_ref,
                    mask_ref,
                    w1x_ref, w1c_s_ref, w1c_a_ref, b1_ref,
                    w2_ref, b2_ref,
                    w3_ref, b3_ref,
                    lp_ref, *, num_bijectors):
    """Whole-flow per-dimension log-prob for one batch tile.

    state_ref:  [B, D]            action_ref: [B, A]       target_ref: [B, D]
    mask_ref:   [L, 1, D]   f32   alternating binary masks
    w1x_ref:    [L, D, H]   bf16  first layer, masked-x part
    w1c_s_ref:  [L, D, H]   bf16  first layer, context (state rows)
    w1c_a_ref:  [L, A, H]   bf16  first layer, context (action rows)
    b1_ref:     [L, 1, H]   f32
    w2_ref:     [L, H, H]   bf16  dominant tensor (unpadded, H=400)
    b2_ref:     [L, 1, H]   f32
    w3_ref:     [L, H, 2D]  bf16  fused scale|shift head
    b3_ref:     [L, 1, 2D]  f32
    lp_ref:     [B, D]      f32   per-dimension log-prob (mean taken in wrapper)
    """
    f32 = jnp.float32
    bf16 = jnp.bfloat16

    state = state_ref[...].astype(f32)                      # [B, D]
    z = target_ref[...].astype(f32) - state                 # target_state - state
    logdet = jnp.zeros_like(z)                              # [B, D]
    D = z.shape[-1]

    # Loop-invariant bf16 copies of the context features (reused by all bijectors).
    state_b = state.astype(bf16)                            # [B, D]
    action_b = action_ref[...].astype(bf16)                 # [B, A]

    # Bijector count is tiny and static -> unrolled Python loop.
    for l in range(num_bijectors):
        m = mask_ref[l]                                     # [1, D]
        om = 1.0 - m

        xm = (z * m).astype(bf16)                           # masked (identity) features
        h1 = (jnp.dot(xm, w1x_ref[l], preferred_element_type=f32)
              + jnp.dot(state_b, w1c_s_ref[l], preferred_element_type=f32)
              + jnp.dot(action_b, w1c_a_ref[l], preferred_element_type=f32)
              + b1_ref[l])
        h1 = jnp.maximum(h1, 0.0)                           # [B, H]

        h2 = jnp.dot(h1.astype(bf16), w2_ref[l],
                     preferred_element_type=f32) + b2_ref[l]
        h2 = jnp.maximum(h2, 0.0)                           # [B, H]

        st = jnp.dot(h2.astype(bf16), w3_ref[l],
                     preferred_element_type=f32) + b3_ref[l]   # [B, 2D]
        s = jnp.tanh(st[:, :D])                             # scale head (squashed)
        t = st[:, D:]                                       # shift head

        # data -> latent direction of an affine coupling:
        #   z' = m*z + (1-m) * (z - t) * exp(-s)
        z = m * z + om * (z - t) * jnp.exp(-s)
        logdet = logdet + om * (-s)

    # Per-dimension log prob under a standard normal base + log-det contributions.
    lp_ref[...] = -0.5 * z * z - 0.5 * jnp.float32(LOG_2PI) + logdet


def make_params(key, state_dim, action_dim, hdim=HDIM, num_bijectors=NUM_BIJECTORS):
    """Deterministic synthetic parameters for the 5 coupling MLPs (unpadded, bf16)."""
    d, a, h, L = state_dim, action_dim, hdim, num_bijectors
    c = d + a
    ks = jax.random.split(key, 5)

    def init(k, shape, fan_in):
        return jax.random.normal(k, shape, jnp.float32) / jnp.sqrt(float(fan_in))

    w1x = init(ks[0], (L, d, h), d + c)
    w1c = init(ks[1], (L, c, h), d + c)
    w2 = init(ks[2], (L, h, h), h)
    # Small final heads so exp(-s) stays well conditioned.
    w3s = 0.01 * init(ks[3], (L, h, d), h)
    w3t = 0.01 * init(ks[4], (L, h, d), h)

    b1 = jnp.zeros((L, 1, h), jnp.float32)
    b2 = jnp.zeros((L, 1, h), jnp.float32)
    b3 = jnp.zeros((L, 1, 2 * d), jnp.float32)

    # Context projection split into state / action rows (concat fused into 2 dots).
    w1c_s = w1c[:, :d, :]
    w1c_a = w1c[:, d:, :]

    # Fused scale|shift heads: [L, H, 2D].
    w3 = jnp.concatenate([w3s, w3t], axis=-1)

    # Alternating binary masks.
    base = (jnp.arange(d) % 2).astype(jnp.float32)
    masks = jnp.stack([(base + l) % 2 for l in range(L)], axis=0).reshape(L, 1, d)

    bf = jnp.bfloat16
    return dict(masks=masks,
                w1x=w1x.astype(bf), w1c_s=w1c_s.astype(bf), w1c_a=w1c_a.astype(bf),
                b1=b1, w2=w2.astype(bf), b2=b2, w3=w3.astype(bf), b3=b3)


@jax.jit
def density_model_forward(state, action, target_state, params):
    """Equivalent of DensityModel.forward(state=..., action=..., target_state=...)."""
    B, D = state.shape
    A = action.shape[1]
    H = HDIM
    L = NUM_BIJECTORS

    # Batch tile: multiple of 8 sublanes, up to 256 rows per grid step
    # (large tile amortizes per-step overhead; fits comfortably in scoped VMEM
    # on v5e/v6e/v7x with the ~2 MB resident weight set).
    TILE_B = min(256, _round_up(B, 8))
    B_pad = _round_up(B, TILE_B)
    if B_pad != B:
        rp = ((0, B_pad - B), (0, 0))
        state_p = jnp.pad(state, rp)
        action_p = jnp.pad(action, rp)
        target_p = jnp.pad(target_state, rp)
    else:
        state_p, action_p, target_p = state, action, target_state

    def rows(shape):          # tiled over the batch grid axis
        return pl.BlockSpec(shape, lambda i: (i, 0))

    def resident3(shape):     # weights resident across the grid (no re-fetch)
        return pl.BlockSpec(shape, lambda i: (0, 0, 0))

    kernel = functools.partial(_density_kernel, num_bijectors=L)

    lp = pl.pallas_call(
        kernel,
        out_shape=jax.ShapeDtypeStruct((B_pad, D), jnp.float32),
        grid_spec=pltpu.PrefetchScalarGridSpec(
            num_scalar_prefetch=0,
            grid=(B_pad // TILE_B,),
            in_specs=[
                rows((TILE_B, D)),            # state
                rows((TILE_B, A)),            # action
                rows((TILE_B, D)),            # target_state
                resident3((L, 1, D)),         # masks
                resident3((L, D, H)),         # w1x
                resident3((L, D, H)),         # w1c (state rows)
                resident3((L, A, H)),         # w1c (action rows)
                resident3((L, 1, H)),         # b1
                resident3((L, H, H)),         # w2 (dominant tensor, unpadded)
                resident3((L, 1, H)),         # b2
                resident3((L, H, 2 * D)),     # w3 fused scale|shift head
                resident3((L, 1, 2 * D)),     # b3
            ],
            out_specs=rows((TILE_B, D)),
        ),
        compiler_params=pltpu.CompilerParams(
            dimension_semantics=("parallel",)),
    )(state_p, action_p, target_p,
      params["masks"],
      params["w1x"], params["w1c_s"], params["w1c_a"], params["b1"],
      params["w2"], params["b2"],
      params["w3"], params["b3"])

    # Per-dim log-prob -> mean over dims (matches the PyTorch `.mean(dim=1)`).
    return lp[:B].mean(axis=1)                               # [B]


def density_model_reference(state, action, target_state, params):
    """Pure-JAX reference with the same dtype path as the kernel."""
    f32, bf16 = jnp.float32, jnp.bfloat16
    state = state.astype(f32)
    z = target_state.astype(f32) - state
    logdet = jnp.zeros_like(z)
    D = state.shape[1]
    sb = state.astype(bf16)
    ab = action.astype(bf16)
    for l in range(NUM_BIJECTORS):
        m = params["masks"][l]
        om = 1.0 - m
        xm = (z * m).astype(bf16)
        h1 = (jnp.dot(xm, params["w1x"][l], preferred_element_type=f32)
              + jnp.dot(sb, params["w1c_s"][l], preferred_element_type=f32)
              + jnp.dot(ab, params["w1c_a"][l], preferred_element_type=f32)
              + params["b1"][l])
        h1 = jnp.maximum(h1, 0.0)
        h2 = jnp.maximum(
            jnp.dot(h1.astype(bf16), params["w2"][l],
                    preferred_element_type=f32) + params["b2"][l], 0.0)
        st = jnp.dot(h2.astype(bf16), params["w3"][l],
                     preferred_element_type=f32) + params["b3"][l]
        s = jnp.tanh(st[:, :D])
        t = st[:, D:]
        z = m * z + om * (z - t) * jnp.exp(-s)
        logdet = logdet + om * (-s)
    lp = -0.5 * z * z - 0.5 * jnp.float32(LOG_2PI) + logdet
    return lp.mean(axis=1)


if __name__ == "__main__":
    batch, state_dim, action_dim = 8, 16, 8

    key = jax.random.PRNGKey(0)
    k_state, k_action, k_target, k_params = jax.random.split(key, 4)

    state = jax.random.normal(k_state, (batch, state_dim), jnp.float32)
    action = jax.random.normal(k_action, (batch, action_dim), jnp.float32)
    target_state = jax.random.normal(k_target, (batch, state_dim), jnp.float32)

    params = make_params(k_params, state_dim, action_dim)

    out = density_model_forward(state, action, target_state, params)
    jax.block_until_ready(out)
    assert out.shape == (batch,), out.shape
    assert bool(jnp.all(jnp.isfinite(out))), "non-finite log-probs"

    ref = density_model_reference(state, action, target_state, params)
    assert bool(jnp.allclose(out, ref, atol=2e-3, rtol=2e-3)), (
        "kernel/reference mismatch", out, ref)

    print("KERNEL_OK")
</pallas_src>

<mosaic_0001>
module attributes {stable_mosaic.version = 11 : i64} {
  func.func @_density_kernel(%arg0: i32, %arg1: memref<8x16xf32, #tpu.memory_space<vmem>>, %arg2: memref<8x8xf32, #tpu.memory_space<vmem>>, %arg3: memref<8x16xf32, #tpu.memory_space<vmem>>, %arg4: memref<5x1x16xf32, #tpu.memory_space<vmem>>, %arg5: memref<5x16x400xbf16, #tpu.memory_space<vmem>>, %arg6: memref<5x16x400xbf16, #tpu.memory_space<vmem>>, %arg7: memref<5x8x400xbf16, #tpu.memory_space<vmem>>, %arg8: memref<5x1x400xf32, #tpu.memory_space<vmem>>, %arg9: memref<5x400x400xbf16, #tpu.memory_space<vmem>>, %arg10: memref<5x1x400xf32, #tpu.memory_space<vmem>>, %arg11: memref<5x400x32xbf16, #tpu.memory_space<vmem>>, %arg12: memref<5x1x32xf32, #tpu.memory_space<vmem>>, %arg13: memref<8x16xf32, #tpu.memory_space<vmem>>) attributes {dimension_semantics = [#tpu.dimension_semantics<parallel>], iteration_bounds = array<i64: 1>, scalar_prefetch = 0 : i64, scratch_operands = 0 : i64, tpu.core_type = #tpu.core_type<tc>, window_params = [{transform_indices = @transform_0, window_bounds = array<i64: 8, 16>}, {transform_indices = @transform_1, window_bounds = array<i64: 8, 8>}, {transform_indices = @transform_2, window_bounds = array<i64: 8, 16>}, {pipeline_mode = #tpu.pipeline_mode<synchronous>, transform_indices = @transform_3, window_bounds = array<i64: 5, 1, 16>}, {pipeline_mode = #tpu.pipeline_mode<synchronous>, transform_indices = @transform_4, window_bounds = array<i64: 5, 16, 400>}, {pipeline_mode = #tpu.pipeline_mode<synchronous>, transform_indices = @transform_5, window_bounds = array<i64: 5, 16, 400>}, {pipeline_mode = #tpu.pipeline_mode<synchronous>, transform_indices = @transform_6, window_bounds = array<i64: 5, 8, 400>}, {pipeline_mode = #tpu.pipeline_mode<synchronous>, transform_indices = @transform_7, window_bounds = array<i64: 5, 1, 400>}, {pipeline_mode = #tpu.pipeline_mode<synchronous>, transform_indices = @transform_8, window_bounds = array<i64: 5, 400, 400>}, {pipeline_mode = #tpu.pipeline_mode<synchronous>, transform_indices = @transform_9, window_bounds = array<i64: 5, 1, 400>}, {pipeline_mode = #tpu.pipeline_mode<synchronous>, transform_indices = @transform_10, window_bounds = array<i64: 5, 400, 32>}, {pipeline_mode = #tpu.pipeline_mode<synchronous>, transform_indices = @transform_11, window_bounds = array<i64: 5, 1, 32>}, {transform_indices = @transform_12, window_bounds = array<i64: 8, 16>}]} {
    %c0 = arith.constant 0 : index
    %c0_0 = arith.constant 0 : index
    %0 = vector.load %arg1[%c0, %c0_0] : memref<8x16xf32, #tpu.memory_space<vmem>>, vector<8x16xf32>
    %c0_1 = arith.constant 0 : index
    %c0_2 = arith.constant 0 : index
    %1 = vector.load %arg3[%c0_1, %c0_2] : memref<8x16xf32, #tpu.memory_space<vmem>>, vector<8x16xf32>
    %2 = arith.subf %1, %0 : vector<8x16xf32>
    %cst = arith.constant 0.000000e+00 : f32
    %3 = vector.broadcast %cst : f32 to vector<8x16xf32>
    %4 = arith.truncf %0 : vector<8x16xf32> to vector<8x16xbf16>
    %c0_3 = arith.constant 0 : index
    %c0_4 = arith.constant 0 : index
    %5 = vector.load %arg2[%c0_3, %c0_4] : memref<8x8xf32, #tpu.memory_space<vmem>>, vector<8x8xf32>
    %6 = arith.truncf %5 : vector<8x8xf32> to vector<8x8xbf16>
    %c0_5 = arith.constant 0 : index
    %c0_6 = arith.constant 0 : index
    %c0_7 = arith.constant 0 : index
    %7 = vector.load %arg4[%c0_5, %c0_6, %c0_7] : memref<5x1x16xf32, #tpu.memory_space<vmem>>, vector<1x1x16xf32>
    %8 = vector.shape_cast %7 : vector<1x1x16xf32> to vector<1x16xf32>
    %cst_8 = arith.constant 1.000000e+00 : f32
    %9 = vector.broadcast %cst_8 : f32 to vector<1x16xf32>
    %10 = arith.subf %9, %8 : vector<1x16xf32>
    %11 = vector.broadcast %8 : vector<1x16xf32> to vector<8x16xf32>
    %12 = arith.mulf %2, %11 : vector<8x16xf32>
    %13 = arith.truncf %12 : vector<8x16xf32> to vector<8x16xbf16>
    %c0_9 = arith.constant 0 : index
    %c0_10 = arith.constant 0 : index
    %c0_11 = arith.constant 0 : index
    %14 = vector.load %arg5[%c0_9, %c0_10, %c0_11] : memref<5x16x400xbf16, #tpu.memory_space<vmem>>, vector<1x16x400xbf16>
    %15 = vector.shape_cast %14 : vector<1x16x400xbf16> to vector<16x400xbf16>
    %cst_12 = arith.constant dense<0.000000e+00> : vector<8x400xf32>
    %16 = tpu.matmul %13, %15, %cst_12 {dimension_numbers = #tpu.dot_dimension_numbers<[1], [0], [0], [1], [0, 0, 1, 1], [], []>} : vector<8x16xbf16>, vector<16x400xbf16>, vector<8x400xf32> -> vector<8x400xf32>
    %c0_13 = arith.constant 0 : index
    %c0_14 = arith.constant 0 : index
    %c0_15 = arith.constant 0 : index
    %17 = vector.load %arg6[%c0_13, %c0_14, %c0_15] : memref<5x16x400xbf16, #tpu.memory_space<vmem>>, vector<1x16x400xbf16>
    %18 = vector.shape_cast %17 : vector<1x16x400xbf16> to vector<16x400xbf16>
    %cst_16 = arith.constant dense<0.000000e+00> : vector<8x400xf32>
    %19 = tpu.matmul %4, %18, %cst_16 {dimension_numbers = #tpu.dot_dimension_numbers<[1], [0], [0], [1], [0, 0, 1, 1], [], []>} : vector<8x16xbf16>, vector<16x400xbf16>, vector<8x400xf32> -> vector<8x400xf32>
    %20 = arith.addf %16, %19 : vector<8x400xf32>
    %c0_17 = arith.constant 0 : index
    %c0_18 = arith.constant 0 : index
    %c0_19 = arith.constant 0 : index
    %21 = vector.load %arg7[%c0_17, %c0_18, %c0_19] : memref<5x8x400xbf16, #tpu.memory_space<vmem>>, vector<1x8x400xbf16>
    %22 = vector.shape_cast %21 : vector<1x8x400xbf16> to vector<8x400xbf16>
    %cst_20 = arith.constant dense<0.000000e+00> : vector<8x400xf32>
    %23 = tpu.matmul %6, %22, %cst_20 {dimension_numbers = #tpu.dot_dimension_numbers<[1], [0], [0], [1], [0, 0, 1, 1], [], []>} : vector<8x8xbf16>, vector<8x400xbf16>, vector<8x400xf32> -> vector<8x400xf32>
    %24 = arith.addf %20, %23 : vector<8x400xf32>
    %c0_21 = arith.constant 0 : index
    %c0_22 = arith.constant 0 : index
    %c0_23 = arith.constant 0 : index
    %25 = vector.load %arg8[%c0_21, %c0_22, %c0_23] : memref<5x1x400xf32, #tpu.memory_space<vmem>>, vector<1x1x400xf32>
    %26 = vector.shape_cast %25 : vector<1x1x400xf32> to vector<1x400xf32>
    %27 = vector.broadcast %26 : vector<1x400xf32> to vector<8x400xf32>
    %28 = arith.addf %24, %27 : vector<8x400xf32>
    %cst_24 = arith.constant 0.000000e+00 : f32
    %29 = vector.broadcast %cst_24 : f32 to vector<8x400xf32>
    %30 = arith.maximumf %28, %29 : vector<8x400xf32>
    %31 = arith.truncf %30 : vector<8x400xf32> to vector<8x400xbf16>
    %c0_25 = arith.constant 0 : index
    %c0_26 = arith.constant 0 : index
    %c0_27 = arith.constant 0 : index
    %32 = vector.load %arg9[%c0_25, %c0_26, %c0_27] : memref<5x400x400xbf16, #tpu.memory_space<vmem>>, vector<1x400x400xbf16>
    %33 = vector.shape_cast %32 : vector<1x400x400xbf16> to vector<400x400xbf16>
    %cst_28 = arith.constant dense<0.000000e+00> : vector<8x400xf32>
    %34 = tpu.matmul %31, %33, %cst_28 {dimension_numbers = #tpu.dot_dimension_numbers<[1], [0], [0], [1], [0, 0, 1, 1], [], []>} : vector<8x400xbf16>, vector<400x400xbf16>, vector<8x400xf32> -> vector<8x400xf32>
    %c0_29 = arith.constant 0 : index
    %c0_30 = arith.constant 0 : index
    %c0_31 = arith.constant 0 : index
    %35 = vector.load %arg10[%c0_29, %c0_30, %c0_31] : memref<5x1x400xf32, #tpu.memory_space<vmem>>, vector<1x1x400xf32>
    %36 = vector.shape_cast %35 : vector<1x1x400xf32> to vector<1x400xf32>
    %37 = vector.broadcast %36 : vector<1x400xf32> to vector<8x400xf32>
    %38 = arith.addf %34, %37 : vector<8x400xf32>
    %cst_32 = arith.constant 0.000000e+00 : f32
    %39 = vector.broadcast %cst_32 : f32 to vector<8x400xf32>
    %40 = arith.maximumf %38, %39 : vector<8x400xf32>
    %41 = arith.truncf %40 : vector<8x400xf32> to vector<8x400xbf16>
    %c0_33 = arith.constant 0 : index
    %c0_34 = arith.constant 0 : index
    %c0_35 = arith.constant 0 : index
    %42 = vector.load %arg11[%c0_33, %c0_34, %c0_35] : memref<5x400x32xbf16, #tpu.memory_space<vmem>>, vector<1x400x32xbf16>
    %43 = vector.shape_cast %42 : vector<1x400x32xbf16> to vector<400x32xbf16>
    %cst_36 = arith.constant dense<0.000000e+00> : vector<8x32xf32>
    %44 = tpu.matmul %41, %43, %cst_36 {dimension_numbers = #tpu.dot_dimension_numbers<[1], [0], [0], [1], [0, 0, 1, 1], [], []>} : vector<8x400xbf16>, vector<400x32xbf16>, vector<8x32xf32> -> vector<8x32xf32>
    %c0_37 = arith.constant 0 : index
    %c0_38 = arith.constant 0 : index
    %c0_39 = arith.constant 0 : index
    %45 = vector.load %arg12[%c0_37, %c0_38, %c0_39] : memref<5x1x32xf32, #tpu.memory_space<vmem>>, vector<1x1x32xf32>
    %46 = vector.shape_cast %45 : vector<1x1x32xf32> to vector<1x32xf32>
    %47 = vector.broadcast %46 : vector<1x32xf32> to vector<8x32xf32>
    %48 = arith.addf %44, %47 : vector<8x32xf32>
    %49 = vector.extract_strided_slice %48 {offsets = [0, 0], sizes = [8, 16], strides = [1, 1]} : vector<8x32xf32> to vector<8x16xf32>
    %50 = math.tanh %49 : vector<8x16xf32>
    %51 = vector.extract_strided_slice %48 {offsets = [0, 16], sizes = [8, 16], strides = [1, 1]} : vector<8x32xf32> to vector<8x16xf32>
    %52 = vector.broadcast %8 : vector<1x16xf32> to vector<8x16xf32>
    %53 = arith.mulf %52, %2 : vector<8x16xf32>
    %54 = arith.subf %2, %51 : vector<8x16xf32>
    %55 = vector.broadcast %10 : vector<1x16xf32> to vector<8x16xf32>
    %56 = arith.mulf %55, %54 : vector<8x16xf32>
    %cst_40 = arith.constant 0.000000e+00 : f32
    %57 = vector.broadcast %cst_40 : f32 to vector<8x16xf32>
    %58 = arith.subf %57, %50 : vector<8x16xf32>
    %59 = math.exp %58 : vector<8x16xf32>
    %60 = arith.mulf %56, %59 : vector<8x16xf32>
    %61 = arith.addf %53, %60 : vector<8x16xf32>
    %cst_41 = arith.constant 0.000000e+00 : f32
    %62 = vector.broadcast %cst_41 : f32 to vector<8x16xf32>
    %63 = arith.subf %62, %50 : vector<8x16xf32>
    %64 = vector.broadcast %10 : vector<1x16xf32> to vector<8x16xf32>
    %65 = arith.mulf %64, %63 : vector<8x16xf32>
    %66 = arith.addf %3, %65 : vector<8x16xf32>
    %c1 = arith.constant 1 : index
    %c0_42 = arith.constant 0 : index
    %c0_43 = arith.constant 0 : index
    %67 = vector.load %arg4[%c1, %c0_42, %c0_43] : memref<5x1x16xf32, #tpu.memory_space<vmem>>, vector<1x1x16xf32>
    %68 = vector.shape_cast %67 : vector<1x1x16xf32> to vector<1x16xf32>
    %cst_44 = arith.constant 1.000000e+00 : f32
    %69 = vector.broadcast %cst_44 : f32 to vector<1x16xf32>
    %70 = arith.subf %69, %68 : vector<1x16xf32>
    %71 = vector.broadcast %68 : vector<1x16xf32> to vector<8x16xf32>
    %72 = arith.mulf %61, %71 : vector<8x16xf32>
    %73 = arith.truncf %72 : vector<8x16xf32> to vector<8x16xbf16>
    %c1_45 = arith.constant 1 : index
    %c0_46 = arith.constant 0 : index
    %c0_47 = arith.constant 0 : index
    %74 = vector.load %arg5[%c1_45, %c0_46, %c0_47] : memref<5x16x400xbf16, #tpu.memory_space<vmem>>, vector<1x16x400xbf16>
    %75 = vector.shape_cast %74 : vector<1x16x400xbf16> to vector<16x400xbf16>
    %cst_48 = arith.constant dense<0.000000e+00> : vector<8x400xf32>
    %76 = tpu.matmul %73, %75, %cst_48 {dimension_numbers = #tpu.dot_dimension_numbers<[1], [0], [0], [1], [0, 0, 1, 1], [], []>} : vector<8x16xbf16>, vector<16x400xbf16>, vector<8x400xf32> -> vector<8x400xf32>
    %c1_49 = arith.constant 1 : index
    %c0_50 = arith.constant 0 : index
    %c0_51 = arith.constant 0 : index
    %77 = vector.load %arg6[%c1_49, %c0_50, %c0_51] : memref<5x16x400xbf16, #tpu.memory_space<vmem>>, vector<1x16x400xbf16>
    %78 = vector.shape_cast %77 : vector<1x16x400xbf16> to vector<16x400xbf16>
    %cst_52 = arith.constant dense<0.000000e+00> : vector<8x400xf32>
    %79 = tpu.matmul %4, %78, %cst_52 {dimension_numbers = #tpu.dot_dimension_numbers<[1], [0], [0], [1], [0, 0, 1, 1], [], []>} : vector<8x16xbf16>, vector<16x400xbf16>, vector<8x400xf32> -> vector<8x400xf32>
    %80 = arith.addf %76, %79 : vector<8x400xf32>
    %c1_53 = arith.constant 1 : index
    %c0_54 = arith.constant 0 : index
    %c0_55 = arith.constant 0 : index
    %81 = vector.load %arg7[%c1_53, %c0_54, %c0_55] : memref<5x8x400xbf16, #tpu.memory_space<vmem>>, vector<1x8x400xbf16>
    %82 = vector.shape_cast %81 : vector<1x8x400xbf16> to vector<8x400xbf16>
    %cst_56 = arith.constant dense<0.000000e+00> : vector<8x400xf32>
    %83 = tpu.matmul %6, %82, %cst_56 {dimension_numbers = #tpu.dot_dimension_numbers<[1], [0], [0], [1], [0, 0, 1, 1], [], []>} : vector<8x8xbf16>, vector<8x400xbf16>, vector<8x400xf32> -> vector<8x400xf32>
    %84 = arith.addf %80, %83 : vector<8x400xf32>
    %c1_57 = arith.constant 1 : index
    %c0_58 = arith.constant 0 : index
    %c0_59 = arith.constant 0 : index
    %85 = vector.load %arg8[%c1_57, %c0_58, %c0_59] : memref<5x1x400xf32, #tpu.memory_space<vmem>>, vector<1x1x400xf32>
    %86 = vector.shape_cast %85 : vector<1x1x400xf32> to vector<1x400xf32>
    %87 = vector.broadcast %86 : vector<1x400xf32> to vector<8x400xf32>
    %88 = arith.addf %84, %87 : vector<8x400xf32>
    %cst_60 = arith.constant 0.000000e+00 : f32
    %89 = vector.broadcast %cst_60 : f32 to vector<8x400xf32>
    %90 = arith.maximumf %88, %89 : vector<8x400xf32>
    %91 = arith.truncf %90 : vector<8x400xf32> to vector<8x400xbf16>
    %c1_61 = arith.constant 1 : index
    %c0_62 = arith.constant 0 : index
    %c0_63 = arith.constant 0 : index
    %92 = vector.load %arg9[%c1_61, %c0_62, %c0_63] : memref<5x400x400xbf16, #tpu.memory_space<vmem>>, vector<1x400x400xbf16>
    %93 = vector.shape_cast %92 : vector<1x400x400xbf16> to vector<400x400xbf16>
    %cst_64 = arith.constant dense<0.000000e+00> : vector<8x400xf32>
    %94 = tpu.matmul %91, %93, %cst_64 {dimension_numbers = #tpu.dot_dimension_numbers<[1], [0], [0], [1], [0, 0, 1, 1], [], []>} : vector<8x400xbf16>, vector<400x400xbf16>, vector<8x400xf32> -> vector<8x400xf32>
    %c1_65 = arith.constant 1 : index
    %c0_66 = arith.constant 0 : index
    %c0_67 = arith.constant 0 : index
    %95 = vector.load %arg10[%c1_65, %c0_66, %c0_67] : memref<5x1x400xf32, #tpu.memory_space<vmem>>, vector<1x1x400xf32>
    %96 = vector.shape_cast %95 : vector<1x1x400xf32> to vector<1x400xf32>
    %97 = vector.broadcast %96 : vector<1x400xf32> to vector<8x400xf32>
    %98 = arith.addf %94, %97 : vector<8x400xf32>
    %cst_68 = arith.constant 0.000000e+00 : f32
    %99 = vector.broadcast %cst_68 : f32 to vector<8x400xf32>
    %100 = arith.maximumf %98, %99 : vector<8x400xf32>
    %101 = arith.truncf %100 : vector<8x400xf32> to vector<8x400xbf16>
    %c1_69 = arith.constant 1 : index
    %c0_70 = arith.constant 0 : index
    %c0_71 = arith.constant 0 : index
    %102 = vector.load %arg11[%c1_69, %c0_70, %c0_71] : memref<5x400x32xbf16, #tpu.memory_space<vmem>>, vector<1x400x32xbf16>
    %103 = vector.shape_cast %102 : vector<1x400x32xbf16> to vector<400x32xbf16>
    %cst_72 = arith.constant dense<0.000000e+00> : vector<8x32xf32>
    %104 = tpu.matmul %101, %103, %cst_72 {dimension_numbers = #tpu.dot_dimension_numbers<[1], [0], [0], [1], [0, 0, 1, 1], [], []>} : vector<8x400xbf16>, vector<400x32xbf16>, vector<8x32xf32> -> vector<8x32xf32>
    %c1_73 = arith.constant 1 : index
    %c0_74 = arith.constant 0 : index
    %c0_75 = arith.constant 0 : index
    %105 = vector.load %arg12[%c1_73, %c0_74, %c0_75] : memref<5x1x32xf32, #tpu.memory_space<vmem>>, vector<1x1x32xf32>
    %106 = vector.shape_cast %105 : vector<1x1x32xf32> to vector<1x32xf32>
    %107 = vector.broadcast %106 : vector<1x32xf32> to vector<8x32xf32>
    %108 = arith.addf %104, %107 : vector<8x32xf32>
    %109 = vector.extract_strided_slice %108 {offsets = [0, 0], sizes = [8, 16], strides = [1, 1]} : vector<8x32xf32> to vector<8x16xf32>
    %110 = math.tanh %109 : vector<8x16xf32>
    %111 = vector.extract_strided_slice %108 {offsets = [0, 16], sizes = [8, 16], strides = [1, 1]} : vector<8x32xf32> to vector<8x16xf32>
    %112 = vector.broadcast %68 : vector<1x16xf32> to vector<8x16xf32>
    %113 = arith.mulf %112, %61 : vector<8x16xf32>
    %114 = arith.subf %61, %111 : vector<8x16xf32>
    %115 = vector.broadcast %70 : vector<1x16xf32> to vector<8x16xf32>
    %116 = arith.mulf %115, %114 : vector<8x16xf32>
    %cst_76 = arith.constant 0.000000e+00 : f32
    %117 = vector.broadcast %cst_76 : f32 to vector<8x16xf32>
    %118 = arith.subf %117, %110 : vector<8x16xf32>
    %119 = math.exp %118 : vector<8x16xf32>
    %120 = arith.mulf %116, %119 : vector<8x16xf32>
    %121 = arith.addf %113, %120 : vector<8x16xf32>
    %cst_77 = arith.constant 0.000000e+00 : f32
    %122 = vector.broadcast %cst_77 : f32 to vector<8x16xf32>
    %123 = arith.subf %122, %110 : vector<8x16xf32>
    %124 = vector.broadcast %70 : vector<1x16xf32> to vector<8x16xf32>
    %125 = arith.mulf %124, %123 : vector<8x16xf32>
    %126 = arith.addf %66, %125 : vector<8x16xf32>
    %c2 = arith.constant 2 : index
    %c0_78 = arith.constant 0 : index
    %c0_79 = arith.constant 0 : index
    %127 = vector.load %arg4[%c2, %c0_78, %c0_79] : memref<5x1x16xf32, #tpu.memory_space<vmem>>, vector<1x1x16xf32>
    %128 = vector.shape_cast %127 : vector<1x1x16xf32> to vector<1x16xf32>
    %cst_80 = arith.constant 1.000000e+00 : f32
    %129 = vector.broadcast %cst_80 : f32 to vector<1x16xf32>
    %130 = arith.subf %129, %128 : vector<1x16xf32>
    %131 = vector.broadcast %128 : vector<1x16xf32> to vector<8x16xf32>
    %132 = arith.mulf %121, %131 : vector<8x16xf32>
    %133 = arith.truncf %132 : vector<8x16xf32> to vector<8x16xbf16>
    %c2_81 = arith.constant 2 : index
    %c0_82 = arith.constant 0 : index
    %c0_83 = arith.constant 0 : index
    %134 = vector.load %arg5[%c2_81, %c0_82, %c0_83] : memref<5x16x400xbf16, #tpu.memory_space<vmem>>, vector<1x16x400xbf16>
    %135 = vector.shape_cast %134 : vector<1x16x400xbf16> to vector<16x400xbf16>
    %cst_84 = arith.constant dense<0.000000e+00> : vector<8x400xf32>
    %136 = tpu.matmul %133, %135, %cst_84 {dimension_numbers = #tpu.dot_dimension_numbers<[1], [0], [0], [1], [0, 0, 1, 1], [], []>} : vector<8x16xbf16>, vector<16x400xbf16>, vector<8x400xf32> -> vector<8x400xf32>
    %c2_85 = arith.constant 2 : index
    %c0_86 = arith.constant 0 : index
    %c0_87 = arith.constant 0 : index
    %137 = vector.load %arg6[%c2_85, %c0_86, %c0_87] : memref<5x16x400xbf16, #tpu.memory_space<vmem>>, vector<1x16x400xbf16>
    %138 = vector.shape_cast %137 : vector<1x16x400xbf16> to vector<16x400xbf16>
    %cst_88 = arith.constant dense<0.000000e+00> : vector<8x400xf32>
    %139 = tpu.matmul %4, %138, %cst_88 {dimension_numbers = #tpu.dot_dimension_numbers<[1], [0], [0], [1], [0, 0, 1, 1], [], []>} : vector<8x16xbf16>, vector<16x400xbf16>, vector<8x400xf32> -> vector<8x400xf32>
    %140 = arith.addf %136, %139 : vector<8x400xf32>
    %c2_89 = arith.constant 2 : index
    %c0_90 = arith.constant 0 : index
    %c0_91 = arith.constant 0 : index
    %141 = vector.load %arg7[%c2_89, %c0_90, %c0_91] : memref<5x8x400xbf16, #tpu.memory_space<vmem>>, vector<1x8x400xbf16>
    %142 = vector.shape_cast %141 : vector<1x8x400xbf16> to vector<8x400xbf16>
    %cst_92 = arith.constant dense<0.000000e+00> : vector<8x400xf32>
    %143 = tpu.matmul %6, %142, %cst_92 {dimension_numbers = #tpu.dot_dimension_numbers<[1], [0], [0], [1], [0, 0, 1, 1], [], []>} : vector<8x8xbf16>, vector<8x400xbf16>, vector<8x400xf32> -> vector<8x400xf32>
    %144 = arith.addf %140, %143 : vector<8x400xf32>
    %c2_93 = arith.constant 2 : index
    %c0_94 = arith.constant 0 : index
    %c0_95 = arith.constant 0 : index
    %145 = vector.load %arg8[%c2_93, %c0_94, %c0_95] : memref<5x1x400xf32, #tpu.memory_space<vmem>>, vector<1x1x400xf32>
    %146 = vector.shape_cast %145 : vector<1x1x400xf32> to vector<1x400xf32>
    %147 = vector.broadcast %146 : vector<1x400xf32> to vector<8x400xf32>
    %148 = arith.addf %144, %147 : vector<8x400xf32>
    %cst_96 = arith.constant 0.000000e+00 : f32
    %149 = vector.broadcast %cst_96 : f32 to vector<8x400xf32>
    %150 = arith.maximumf %148, %149 : vector<8x400xf32>
    %151 = arith.truncf %150 : vector<8x400xf32> to vector<8x400xbf16>
    %c2_97 = arith.constant 2 : index
    %c0_98 = arith.constant 0 : index
    %c0_99 = arith.constant 0 : index
    %152 = vector.load %arg9[%c2_97, %c0_98, %c0_99] : memref<5x400x400xbf16, #tpu.memory_space<vmem>>, vector<1x400x400xbf16>
    %153 = vector.shape_cast %152 : vector<1x400x400xbf16> to vector<400x400xbf16>
    %cst_100 = arith.constant dense<0.000000e+00> : vector<8x400xf32>
    %154 = tpu.matmul %151, %153, %cst_100 {dimension_numbers = #tpu.dot_dimension_numbers<[1], [0], [0], [1], [0, 0, 1, 1], [], []>} : vector<8x400xbf16>, vector<400x400xbf16>, vector<8x400xf32> -> vector<8x400xf32>
    %c2_101 = arith.constant 2 : index
    %c0_102 = arith.constant 0 : index
    %c0_103 = arith.constant 0 : index
    %155 = vector.load %arg10[%c2_101, %c0_102, %c0_103] : memref<5x1x400xf32, #tpu.memory_space<vmem>>, vector<1x1x400xf32>
    %156 = vector.shape_cast %155 : vector<1x1x400xf32> to vector<1x400xf32>
    %157 = vector.broadcast %156 : vector<1x400xf32> to vector<8x400xf32>
    %158 = arith.addf %154, %157 : vector<8x400xf32>
    %cst_104 = arith.constant 0.000000e+00 : f32
    %159 = vector.broadcast %cst_104 : f32 to vector<8x400xf32>
    %160 = arith.maximumf %158, %159 : vector<8x400xf32>
    %161 = arith.truncf %160 : vector<8x400xf32> to vector<8x400xbf16>
    %c2_105 = arith.constant 2 : index
    %c0_106 = arith.constant 0 : index
    %c0_107 = arith.constant 0 : index
    %162 = vector.load %arg11[%c2_105, %c0_106, %c0_107] : memref<5x400x32xbf16, #tpu.memory_space<vmem>>, vector<1x400x32xbf16>
    %163 = vector.shape_cast %162 : vector<1x400x32xbf16> to vector<400x32xbf16>
    %cst_108 = arith.constant dense<0.000000e+00> : vector<8x32xf32>
    %164 = tpu.matmul %161, %163, %cst_108 {dimension_numbers = #tpu.dot_dimension_numbers<[1], [0], [0], [1], [0, 0, 1, 1], [], []>} : vector<8x400xbf16>, vector<400x32xbf16>, vector<8x32xf32> -> vector<8x32xf32>
    %c2_109 = arith.constant 2 : index
    %c0_110 = arith.constant 0 : index
    %c0_111 = arith.constant 0 : index
    %165 = vector.load %arg12[%c2_109, %c0_110, %c0_111] : memref<5x1x32xf32, #tpu.memory_space<vmem>>, vector<1x1x32xf32>
    %166 = vector.shape_cast %165 : vector<1x1x32xf32> to vector<1x32xf32>
    %167 = vector.broadcast %166 : vector<1x32xf32> to vector<8x32xf32>
    %168 = arith.addf %164, %167 : vector<8x32xf32>
    %169 = vector.extract_strided_slice %168 {offsets = [0, 0], sizes = [8, 16], strides = [1, 1]} : vector<8x32xf32> to vector<8x16xf32>
    %170 = math.tanh %169 : vector<8x16xf32>
    %171 = vector.extract_strided_slice %168 {offsets = [0, 16], sizes = [8, 16], strides = [1, 1]} : vector<8x32xf32> to vector<8x16xf32>
    %172 = vector.broadcast %128 : vector<1x16xf32> to vector<8x16xf32>
    %173 = arith.mulf %172, %121 : vector<8x16xf32>
    %174 = arith.subf %121, %171 : vector<8x16xf32>
    %175 = vector.broadcast %130 : vector<1x16xf32> to vector<8x16xf32>
    %176 = arith.mulf %175, %174 : vector<8x16xf32>
    %cst_112 = arith.constant 0.000000e+00 : f32
    %177 = vector.broadcast %cst_112 : f32 to vector<8x16xf32>
    %178 = arith.subf %177, %170 : vector<8x16xf32>
    %179 = math.exp %178 : vector<8x16xf32>
    %180 = arith.mulf %176, %179 : vector<8x16xf32>
    %181 = arith.addf %173, %180 : vector<8x16xf32>
    %cst_113 = arith.constant 0.000000e+00 : f32
    %182 = vector.broadcast %cst_113 : f32 to vector<8x16xf32>
    %183 = arith.subf %182, %170 : vector<8x16xf32>
    %184 = vector.broadcast %130 : vector<1x16xf32> to vector<8x16xf32>
    %185 = arith.mulf %184, %183 : vector<8x16xf32>
    %186 = arith.addf %126, %185 : vector<8x16xf32>
    %c3 = arith.constant 3 : index
    %c0_114 = arith.constant 0 : index
    %c0_115 = arith.constant 0 : index
    %187 = vector.load %arg4[%c3, %c0_114, %c0_115] : memref<5x1x16xf32, #tpu.memory_space<vmem>>, vector<1x1x16xf32>
    %188 = vector.shape_cast %187 : vector<1x1x16xf32> to vector<1x16xf32>
    %cst_116 = arith.constant 1.000000e+00 : f32
    %189 = vector.broadcast %cst_116 : f32 to vector<1x16xf32>
    %190 = arith.subf %189, %188 : vector<1x16xf32>
    %191 = vector.broadcast %188 : vector<1x16xf32> to vector<8x16xf32>
    %192 = arith.mulf %181, %191 : vector<8x16xf32>
    %193 = arith.truncf %192 : vector<8x16xf32> to vector<8x16xbf16>
    %c3_117 = arith.constant 3 : index
    %c0_118 = arith.constant 0 : index
    %c0_119 = arith.constant 0 : index
    %194 = vector.load %arg5[%c3_117, %c0_118, %c0_119] : memref<5x16x400xbf16, #tpu.memory_space<vmem>>, vector<1x16x400xbf16>
    %195 = vector.shape_cast %194 : vector<1x16x400xbf16> to vector<16x400xbf16>
    %cst_120 = arith.constant dense<0.000000e+00> : vector<8x400xf32>
    %196 = tpu.matmul %193, %195, %cst_120 {dimension_numbers = #tpu.dot_dimension_numbers<[1], [0], [0], [1], [0, 0, 1, 1], [], []>} : vector<8x16xbf16>, vector<16x400xbf16>, vector<8x400xf32> -> vector<8x400xf32>
    %c3_121 = arith.constant 3 : index
    %c0_122 = arith.constant 0 : index
    %c0_123 = arith.constant 0 : index
    %197 = vector.load %arg6[%c3_121, %c0_122, %c0_123] : memref<5x16x400xbf16, #tpu.memory_space<vmem>>, vector<1x16x400xbf16>
    %198 = vector.shape_cast %197 : vector<1x16x400xbf16> to vector<16x400xbf16>
    %cst_124 = arith.constant dense<0.000000e+00> : vector<8x400xf32>
    %199 = tpu.matmul %4, %198, %cst_124 {dimension_numbers = #tpu.dot_dimension_numbers<[1], [0], [0], [1], [0, 0, 1, 1], [], []>} : vector<8x16xbf16>, vector<16x400xbf16>, vector<8x400xf32> -> vector<8x400xf32>
    %200 = arith.addf %196, %199 : vector<8x400xf32>
    %c3_125 = arith.constant 3 : index
    %c0_126 = arith.constant 0 : index
    %c0_127 = arith.constant 0 : index
    %201 = vector.load %arg7[%c3_125, %c0_126, %c0_127] : memref<5x8x400xbf16, #tpu.memory_space<vmem>>, vector<1x8x400xbf16>
    %202 = vector.shape_cast %201 : vector<1x8x400xbf16> to vector<8x400xbf16>
    %cst_128 = arith.constant dense<0.000000e+00> : vector<8x400xf32>
    %203 = tpu.matmul %6, %202, %cst_128 {dimension_numbers = #tpu.dot_dimension_numbers<[1], [0], [0], [1], [0, 0, 1, 1], [], []>} : vector<8x8xbf16>, vector<8x400xbf16>, vector<8x400xf32> -> vector<8x400xf32>
    %204 = arith.addf %200, %203 : vector<8x400xf32>
    %c3_129 = arith.constant 3 : index
    %c0_130 = arith.constant 0 : index
    %c0_131 = arith.constant 0 : index
    %205 = vector.load %arg8[%c3_129, %c0_130, %c0_131] : memref<5x1x400xf32, #tpu.memory_space<vmem>>, vector<1x1x400xf32>
    %206 = vector.shape_cast %205 : vector<1x1x400xf32> to vector<1x400xf32>
    %207 = vector.broadcast %206 : vector<1x400xf32> to vector<8x400xf32>
    %208 = arith.addf %204, %207 : vector<8x400xf32>
    %cst_132 = arith.constant 0.000000e+00 : f32
    %209 = vector.broadcast %cst_132 : f32 to vector<8x400xf32>
    %210 = arith.maximumf %208, %209 : vector<8x400xf32>
    %211 = arith.truncf %210 : vector<8x400xf32> to vector<8x400xbf16>
    %c3_133 = arith.constant 3 : index
    %c0_134 = arith.constant 0 : index
    %c0_135 = arith.constant 0 : index
    %212 = vector.load %arg9[%c3_133, %c0_134, %c0_135] : memref<5x400x400xbf16, #tpu.memory_space<vmem>>, vector<1x400x400xbf16>
    %213 = vector.shape_cast %212 : vector<1x400x400xbf16> to vector<400x400xbf16>
    %cst_136 = arith.constant dense<0.000000e+00> : vector<8x400xf32>
    %214 = tpu.matmul %211, %213, %cst_136 {dimension_numbers = #tpu.dot_dimension_numbers<[1], [0], [0], [1], [0, 0, 1, 1], [], []>} : vector<8x400xbf16>, vector<400x400xbf16>, vector<8x400xf32> -> vector<8x400xf32>
    %c3_137 = arith.constant 3 : index
    %c0_138 = arith.constant 0 : index
    %c0_139 = arith.constant 0 : index
    %215 = vector.load %arg10[%c3_137, %c0_138, %c0_139] : memref<5x1x400xf32, #tpu.memory_space<vmem>>, vector<1x1x400xf32>
    %216 = vector.shape_cast %215 : vector<1x1x400xf32> to vector<1x400xf32>
    %217 = vector.broadcast %216 : vector<1x400xf32> to vector<8x400xf32>
    %218 = arith.addf %214, %217 : vector<8x400xf32>
    %cst_140 = arith.constant 0.000000e+00 : f32
    %219 = vector.broadcast %cst_140 : f32 to vector<8x400xf32>
    %220 = arith.maximumf %218, %219 : vector<8x400xf32>
    %221 = arith.truncf %220 : vector<8x400xf32> to vector<8x400xbf16>
    %c3_141 = arith.constant 3 : index
    %c0_142 = arith.constant 0 : index
    %c0_143 = arith.constant 0 : index
    %222 = vector.load %arg11[%c3_141, %c0_142, %c0_143] : memref<5x400x32xbf16, #tpu.memory_space<vmem>>, vector<1x400x32xbf16>
    %223 = vector.shape_cast %222 : vector<1x400x32xbf16> to vector<400x32xbf16>
    %cst_144 = arith.constant dense<0.000000e+00> : vector<8x32xf32>
    %224 = tpu.matmul %221, %223, %cst_144 {dimension_numbers = #tpu.dot_dimension_numbers<[1], [0], [0], [1], [0, 0, 1, 1], [], []>} : vector<8x400xbf16>, vector<400x32xbf16>, vector<8x32xf32> -> vector<8x32xf32>
    %c3_145 = arith.constant 3 : index
    %c0_146 = arith.constant 0 : index
    %c0_147 = arith.constant 0 : index
    %225 = vector.load %arg12[%c3_145, %c0_146, %c0_147] : memref<5x1x32xf32, #tpu.memory_space<vmem>>, vector<1x1x32xf32>
    %226 = vector.shape_cast %225 : vector<1x1x32xf32> to vector<1x32xf32>
    %227 = vector.broadcast %226 : vector<1x32xf32> to vector<8x32xf32>
    %228 = arith.addf %224, %227 : vector<8x32xf32>
    %229 = vector.extract_strided_slice %228 {offsets = [0, 0], sizes = [8, 16], strides = [1, 1]} : vector<8x32xf32> to vector<8x16xf32>
    %230 = math.tanh %229 : vector<8x16xf32>
    %231 = vector.extract_strided_slice %228 {offsets = [0, 16], sizes = [8, 16], strides = [1, 1]} : vector<8x32xf32> to vector<8x16xf32>
    %232 = vector.broadcast %188 : vector<1x16xf32> to vector<8x16xf32>
    %233 = arith.mulf %232, %181 : vector<8x16xf32>
    %234 = arith.subf %181, %231 : vector<8x16xf32>
    %235 = vector.broadcast %190 : vector<1x16xf32> to vector<8x16xf32>
    %236 = arith.mulf %235, %234 : vector<8x16xf32>
    %cst_148 = arith.constant 0.000000e+00 : f32
    %237 = vector.broadcast %cst_148 : f32 to vector<8x16xf32>
    %238 = arith.subf %237, %230 : vector<8x16xf32>
    %239 = math.exp %238 : vector<8x16xf32>
    %240 = arith.mulf %236, %239 : vector<8x16xf32>
    %241 = arith.addf %233, %240 : vector<8x16xf32>
    %cst_149 = arith.constant 0.000000e+00 : f32
    %242 = vector.broadcast %cst_149 : f32 to vector<8x16xf32>
    %243 = arith.subf %242, %230 : vector<8x16xf32>
    %244 = vector.broadcast %190 : vector<1x16xf32> to vector<8x16xf32>
    %245 = arith.mulf %244, %243 : vector<8x16xf32>
    %246 = arith.addf %186, %245 : vector<8x16xf32>
    %c4 = arith.constant 4 : index
    %c0_150 = arith.constant 0 : index
    %c0_151 = arith.constant 0 : index
    %247 = vector.load %arg4[%c4, %c0_150, %c0_151] : memref<5x1x16xf32, #tpu.memory_space<vmem>>, vector<1x1x16xf32>
    %248 = vector.shape_cast %247 : vector<1x1x16xf32> to vector<1x16xf32>
    %cst_152 = arith.constant 1.000000e+00 : f32
    %249 = vector.broadcast %cst_152 : f32 to vector<1x16xf32>
    %250 = arith.subf %249, %248 : vector<1x16xf32>
    %251 = vector.broadcast %248 : vector<1x16xf32> to vector<8x16xf32>
    %252 = arith.mulf %241, %251 : vector<8x16xf32>
    %253 = arith.truncf %252 : vector<8x16xf32> to vector<8x16xbf16>
    %c4_153 = arith.constant 4 : index
    %c0_154 = arith.constant 0 : index
    %c0_155 = arith.constant 0 : index
    %254 = vector.load %arg5[%c4_153, %c0_154, %c0_155] : memref<5x16x400xbf16, #tpu.memory_space<vmem>>, vector<1x16x400xbf16>
    %255 = vector.shape_cast %254 : vector<1x16x400xbf16> to vector<16x400xbf16>
    %cst_156 = arith.constant dense<0.000000e+00> : vector<8x400xf32>
    %256 = tpu.matmul %253, %255, %cst_156 {dimension_numbers = #tpu.dot_dimension_numbers<[1], [0], [0], [1], [0, 0, 1, 1], [], []>} : vector<8x16xbf16>, vector<16x400xbf16>, vector<8x400xf32> -> vector<8x400xf32>
    %c4_157 = arith.constant 4 : index
    %c0_158 = arith.constant 0 : index
    %c0_159 = arith.constant 0 : index
    %257 = vector.load %arg6[%c4_157, %c0_158, %c0_159] : memref<5x16x400xbf16, #tpu.memory_space<vmem>>, vector<1x16x400xbf16>
    %258 = vector.shape_cast %257 : vector<1x16x400xbf16> to vector<16x400xbf16>
    %cst_160 = arith.constant dense<0.000000e+00> : vector<8x400xf32>
    %259 = tpu.matmul %4, %258, %cst_160 {dimension_numbers = #tpu.dot_dimension_numbers<[1], [0], [0], [1], [0, 0, 1, 1], [], []>} : vector<8x16xbf16>, vector<16x400xbf16>, vector<8x400xf32> -> vector<8x400xf32>
    %260 = arith.addf %256, %259 : vector<8x400xf32>
    %c4_161 = arith.constant 4 : index
    %c0_162 = arith.constant 0 : index
    %c0_163 = arith.constant 0 : index
    %261 = vector.load %arg7[%c4_161, %c0_162, %c0_163] : memref<5x8x400xbf16, #tpu.memory_space<vmem>>, vector<1x8x400xbf16>
    %262 = vector.shape_cast %261 : vector<1x8x400xbf16> to vector<8x400xbf16>
    %cst_164 = arith.constant dense<0.000000e+00> : vector<8x400xf32>
    %263 = tpu.matmul %6, %262, %cst_164 {dimension_numbers = #tpu.dot_dimension_numbers<[1], [0], [0], [1], [0, 0, 1, 1], [], []>} : vector<8x8xbf16>, vector<8x400xbf16>, vector<8x400xf32> -> vector<8x400xf32>
    %264 = arith.addf %260, %263 : vector<8x400xf32>
    %c4_165 = arith.constant 4 : index
    %c0_166 = arith.constant 0 : index
    %c0_167 = arith.constant 0 : index
    %265 = vector.load %arg8[%c4_165, %c0_166, %c0_167] : memref<5x1x400xf32, #tpu.memory_space<vmem>>, vector<1x1x400xf32>
    %266 = vector.shape_cast %265 : vector<1x1x400xf32> to vector<1x400xf32>
    %267 = vector.broadcast %266 : vector<1x400xf32> to vector<8x400xf32>
    %268 = arith.addf %264, %267 : vector<8x400xf32>
    %cst_168 = arith.constant 0.000000e+00 : f32
    %269 = vector.broadcast %cst_168 : f32 to vector<8x400xf32>
    %270 = arith.maximumf %268, %269 : vector<8x400xf32>
    %271 = arith.truncf %270 : vector<8x400xf32> to vector<8x400xbf16>
    %c4_169 = arith.constant 4 : index
    %c0_170 = arith.constant 0 : index
    %c0_171 = arith.constant 0 : index
    %272 = vector.load %arg9[%c4_169, %c0_170, %c0_171] : memref<5x400x400xbf16, #tpu.memory_space<vmem>>, vector<1x400x400xbf16>
    %273 = vector.shape_cast %272 : vector<1x400x400xbf16> to vector<400x400xbf16>
    %cst_172 = arith.constant dense<0.000000e+00> : vector<8x400xf32>
    %274 = tpu.matmul %271, %273, %cst_172 {dimension_numbers = #tpu.dot_dimension_numbers<[1], [0], [0], [1], [0, 0, 1, 1], [], []>} : vector<8x400xbf16>, vector<400x400xbf16>, vector<8x400xf32> -> vector<8x400xf32>
    %c4_173 = arith.constant 4 : index
    %c0_174 = arith.constant 0 : index
    %c0_175 = arith.constant 0 : index
    %275 = vector.load %arg10[%c4_173, %c0_174, %c0_175] : memref<5x1x400xf32, #tpu.memory_space<vmem>>, vector<1x1x400xf32>
    %276 = vector.shape_cast %275 : vector<1x1x400xf32> to vector<1x400xf32>
    %277 = vector.broadcast %276 : vector<1x400xf32> to vector<8x400xf32>
    %278 = arith.addf %274, %277 : vector<8x400xf32>
    %cst_176 = arith.constant 0.000000e+00 : f32
    %279 = vector.broadcast %cst_176 : f32 to vector<8x400xf32>
    %280 = arith.maximumf %278, %279 : vector<8x400xf32>
    %281 = arith.truncf %280 : vector<8x400xf32> to vector<8x400xbf16>
    %c4_177 = arith.constant 4 : index
    %c0_178 = arith.constant 0 : index
    %c0_179 = arith.constant 0 : index
    %282 = vector.load %arg11[%c4_177, %c0_178, %c0_179] : memref<5x400x32xbf16, #tpu.memory_space<vmem>>, vector<1x400x32xbf16>
    %283 = vector.shape_cast %282 : vector<1x400x32xbf16> to vector<400x32xbf16>
    %cst_180 = arith.constant dense<0.000000e+00> : vector<8x32xf32>
    %284 = tpu.matmul %281, %283, %cst_180 {dimension_numbers = #tpu.dot_dimension_numbers<[1], [0], [0], [1], [0, 0, 1, 1], [], []>} : vector<8x400xbf16>, vector<400x32xbf16>, vector<8x32xf32> -> vector<8x32xf32>
    %c4_181 = arith.constant 4 : index
    %c0_182 = arith.constant 0 : index
    %c0_183 = arith.constant 0 : index
    %285 = vector.load %arg12[%c4_181, %c0_182, %c0_183] : memref<5x1x32xf32, #tpu.memory_space<vmem>>, vector<1x1x32xf32>
    %286 = vector.shape_cast %285 : vector<1x1x32xf32> to vector<1x32xf32>
    %287 = vector.broadcast %286 : vector<1x32xf32> to vector<8x32xf32>
    %288 = arith.addf %284, %287 : vector<8x32xf32>
    %289 = vector.extract_strided_slice %288 {offsets = [0, 0], sizes = [8, 16], strides = [1, 1]} : vector<8x32xf32> to vector<8x16xf32>
    %290 = math.tanh %289 : vector<8x16xf32>
    %291 = vector.extract_strided_slice %288 {offsets = [0, 16], sizes = [8, 16], strides = [1, 1]} : vector<8x32xf32> to vector<8x16xf32>
    %292 = vector.broadcast %248 : vector<1x16xf32> to vector<8x16xf32>
    %293 = arith.mulf %292, %241 : vector<8x16xf32>
    %294 = arith.subf %241, %291 : vector<8x16xf32>
    %295 = vector.broadcast %250 : vector<1x16xf32> to vector<8x16xf32>
    %296 = arith.mulf %295, %294 : vector<8x16xf32>
    %cst_184 = arith.constant 0.000000e+00 : f32
    %297 = vector.broadcast %cst_184 : f32 to vector<8x16xf32>
    %298 = arith.subf %297, %290 : vector<8x16xf32>
    %299 = math.exp %298 : vector<8x16xf32>
    %300 = arith.mulf %296, %299 : vector<8x16xf32>
    %301 = arith.addf %293, %300 : vector<8x16xf32>
    %cst_185 = arith.constant 0.000000e+00 : f32
    %302 = vector.broadcast %cst_185 : f32 to vector<8x16xf32>
    %303 = arith.subf %302, %290 : vector<8x16xf32>
    %304 = vector.broadcast %250 : vector<1x16xf32> to vector<8x16xf32>
    %305 = arith.mulf %304, %303 : vector<8x16xf32>
    %306 = arith.addf %246, %305 : vector<8x16xf32>
    %cst_186 = arith.constant -5.000000e-01 : f32
    %307 = vector.broadcast %cst_186 : f32 to vector<8x16xf32>
    %308 = arith.mulf %307, %301 : vector<8x16xf32>
    %309 = arith.mulf %308, %301 : vector<8x16xf32>
    %cst_187 = arith.constant 5.000000e-01 : f32
    %cst_188 = arith.constant 1.83787704 : f32
    %310 = arith.mulf %cst_187, %cst_188 : f32
    %311 = vector.broadcast %310 : f32 to vector<8x16xf32>
    %312 = arith.subf %309, %311 : vector<8x16xf32>
    %313 = arith.addf %312, %306 : vector<8x16xf32>
    %c0_189 = arith.constant 0 : index
    %c0_190 = arith.constant 0 : index
    %314 = vector.load %arg13[%c0_189, %c0_190] : memref<8x16xf32, #tpu.memory_space<vmem>>, vector<8x16xf32>
    tpu.vector_store %arg13[%c0_189, %c0_190], %313 {strides = array<i32>} : memref<8x16xf32, #tpu.memory_space<vmem>>, vector<8x16xf32>,
    return
  }
  func.func @transform_0(%arg0: i32) -> (i32, i32) {
    %c0_i32 = arith.constant 0 : i32
    %c0_i32_0 = arith.constant 0 : i32
    return %arg0, %c0_i32 : i32, i32
  }
  func.func @transform_1(%arg0: i32) -> (i32, i32) {
    %c0_i32 = arith.constant 0 : i32
    %c0_i32_0 = arith.constant 0 : i32
    return %arg0, %c0_i32 : i32, i32
  }
  func.func @transform_2(%arg0: i32) -> (i32, i32) {
    %c0_i32 = arith.constant 0 : i32
    %c0_i32_0 = arith.constant 0 : i32
    return %arg0, %c0_i32 : i32, i32
  }
  func.func @transform_3(%arg0: i32) -> (i32, i32, i32) {
    %c0_i32 = arith.constant 0 : i32
    %c0_i32_0 = arith.constant 0 : i32
    %c0_i32_1 = arith.constant 0 : i32
    %c0_i32_2 = arith.constant 0 : i32
    return %c0_i32, %c0_i32_0, %c0_i32_1 : i32, i32, i32
  }
  func.func @transform_4(%arg0: i32) -> (i32, i32, i32) {
    %c0_i32 = arith.constant 0 : i32
    %c0_i32_0 = arith.constant 0 : i32
    %c0_i32_1 = arith.constant 0 : i32
    %c0_i32_2 = arith.constant 0 : i32
    return %c0_i32, %c0_i32_0, %c0_i32_1 : i32, i32, i32
  }
  func.func @transform_5(%arg0: i32) -> (i32, i32, i32) {
    %c0_i32 = arith.constant 0 : i32
    %c0_i32_0 = arith.constant 0 : i32
    %c0_i32_1 = arith.constant 0 : i32
    %c0_i32_2 = arith.constant 0 : i32
    return %c0_i32, %c0_i32_0, %c0_i32_1 : i32, i32, i32
  }
  func.func @transform_6(%arg0: i32) -> (i32, i32, i32) {
    %c0_i32 = arith.constant 0 : i32
    %c0_i32_0 = arith.constant 0 : i32
    %c0_i32_1 = arith.constant 0 : i32
    %c0_i32_2 = arith.constant 0 : i32
    return %c0_i32, %c0_i32_0, %c0_i32_1 : i32, i32, i32
  }
  func.func @transform_7(%arg0: i32) -> (i32, i32, i32) {
    %c0_i32 = arith.constant 0 : i32
    %c0_i32_0 = arith.constant 0 : i32
    %c0_i32_1 = arith.constant 0 : i32
    %c0_i32_2 = arith.constant 0 : i32
    return %c0_i32, %c0_i32_0, %c0_i32_1 : i32, i32, i32
  }
  func.func @transform_8(%arg0: i32) -> (i32, i32, i32) {
    %c0_i32 = arith.constant 0 : i32
    %c0_i32_0 = arith.constant 0 : i32
    %c0_i32_1 = arith.constant 0 : i32
    %c0_i32_2 = arith.constant 0 : i32
    return %c0_i32, %c0_i32_0, %c0_i32_1 : i32, i32, i32
  }
  func.func @transform_9(%arg0: i32) -> (i32, i32, i32) {
    %c0_i32 = arith.constant 0 : i32
    %c0_i32_0 = arith.constant 0 : i32
    %c0_i32_1 = arith.constant 0 : i32
    %c0_i32_2 = arith.constant 0 : i32
    return %c0_i32, %c0_i32_0, %c0_i32_1 : i32, i32, i32
  }
  func.func @transform_10(%arg0: i32) -> (i32, i32, i32) {
    %c0_i32 = arith.constant 0 : i32
    %c0_i32_0 = arith.constant 0 : i32
    %c0_i32_1 = arith.constant 0 : i32
    %c0_i32_2 = arith.constant 0 : i32
    return %c0_i32, %c0_i32_0, %c0_i32_1 : i32, i32, i32
  }
  func.func @transform_11(%arg0: i32) -> (i32, i32, i32) {
    %c0_i32 = arith.constant 0 : i32
    %c0_i32_0 = arith.constant 0 : i32
    %c0_i32_1 = arith.constant 0 : i32
    %c0_i32_2 = arith.constant 0 : i32
    return %c0_i32, %c0_i32_0, %c0_i32_1 : i32, i32, i32
  }
  func.func @transform_12(%arg0: i32) -> (i32, i32) {
    %c0_i32 = arith.constant 0 : i32
    %c0_i32_0 = arith.constant 0 : i32
    return %arg0, %c0_i32 : i32, i32
  }
}

</mosaic_0001>

<bundles_post_ra>
// kernel: density_model_forward.1
= control target key start
LH: loop header
LB: loop body
LE: loop exit
PB: predicated region body
PF: predicated region fallthrough
CT: control target
= control target key end

     0   :  { %17 = vsyncpa [#allocation3], 0  ;;  %s10995_s0 = inlined_call_operand.hbm [shape: f32[8,16], index: 0, kind: input, shape index: {}]   ;;  %s10996_s1 = inlined_call_operand.hbm [shape: f32[8,8], index: 1, kind: input, shape index: {}]   ;;  %s10997_s2 = inlined_call_operand.hbm [shape: f32[8,16], index: 2, kind: input, shape index: {}]   ;;  %s10998_s3 = inlined_call_operand.hbm [shape: f32[5,1,16], index: 3, kind: input, shape index: {}]   ;;  %s10999_s4 = inlined_call_operand.hbm [shape: bf16[5,16,400], index: 4, kind: input, shape index: {}]   ;;  %s11000_s5 = inlined_call_operand.hbm [shape: bf16[5,16,400], index: 5, kind: input, shape index: {}]   ;;  %s11001_s6 = inlined_call_operand.hbm [shape: bf16[5,8,400], index: 6, kind: input, shape index: {}]   ;;  %s11002_s7 = inlined_call_operand.hbm [shape: f32[5,1,400], index: 7, kind: input, shape index: {}]   ;;  %s11003_s8 = inlined_call_operand.hbm [shape: bf16[5,400,400], index: 8, kind: input, shape index: {}]   ;;  %s11004_s9 = inlined_call_operand.hbm [shape: f32[5,1,400], index: 9, kind: input, shape index: {}]   ;;  %s11005_s10 = inlined_call_operand.vmem [shape: bf16[5,400,32], index: 10, kind: input, shape index: {}]   ;;  %s11006_s11 = inlined_call_operand.hbm [shape: f32[5,1,32], index: 11, kind: input, shape index: {}]   ;;  %s11007_s12 = inlined_call_operand.vmem [shape: f32[8,16], index: 12, kind: output, shape index: {}]  }
   0x1   :  { %18 = vsyncpa [#allocation5], 0 }
   0x2   :  { %19 = vsyncpa [#allocation8], 0 }
   0x3   :  { %20 = vsyncpa [#allocation11], 0 }
   0x4   :  { %21 = vsyncpa [#allocation14], 0 }
   0x5   :  { %22 = vsyncpa [#allocation17], 0  ;;  %s9996_s21 = smov [#allocation4]   ;;  %s9997_s23 = smov [#allocation7]  }
   0x6   :  { %s39_s22 = sshll.u32 %s9996_s21, 4  ;;  %s58_s24 = sshll.u32 %s9997_s23, 4  ;;  %s40_s22 = int_to_ptr.vmem [resolvable:$true] %s39_s22  ;;  %s10079_s24 = int_to_ptr.vmem [resolvable:$true] %s58_s24 }
   0x7   :  { %s9742_s27 = scalar_lea.hbm %s10996_s1, 128 }
   0x8   :  { %p9743_p0 = scmp.ne.s32.totalorder %s10996_s1, %s9742_s27  ;;  %p9746_p1 = scmp.lt.u32.totalorder %s9742_s27, %s10996_s1 }
   0xa   :  { %p9748_p2 = pnand %p9746_p1, %p9743_p0 }
   0xc   :  { %9751 = shalt.err (!%p9748_p2)
}
   0xd   :  { %s9752_s14 = scalar_lea.vmem %s40_s22, 128  ;;  %p9757_p4 = scmp.lt.s32.totalorder %s40_s22, %s40_s22 }
   0xe   :  { %p9753_p3 = scmp.ne.s32.totalorder %s40_s22, %s9752_s14  ;;  %p9758_p5 = scmp.lt.s32.totalorder %s9752_s14, %s9752_s14 }
  0x10   :  { %p9759_p6 = por %p9758_p5, %p9757_p4 }
  0x12   :  { %p9760_p7 = pnand %p9759_p6, %p9753_p3 }
  0x14   :  { %9763 = shalt.err (!%p9760_p7)
}
  0x15   :  { %42 = dma.hbm_to_vmem [thread:$0]  %s10996_s1, 128, %s40_s22, [#allocation5]  }
  0x16   :  { %s9764_s19 = scalar_lea.hbm %s10998_s3, 80 }
  0x17   :  { %p9765_p8 = scmp.ne.s32.totalorder %s10998_s3, %s9764_s19  ;;  %p9768_p9 = scmp.lt.u32.totalorder %s9764_s19, %s10998_s3 }
  0x19   :  { %p9770_p10 = pnand %p9768_p9, %p9765_p8 }
  0x1b   :  { %9773 = shalt.err (!%p9770_p10)
}
  0x1c   :  { %s9774_s26 = scalar_lea.vmem %s10079_s24, 80  ;;  %s9778_s1 = scalar_lea.vmem %s10079_s24, 96 }
  0x1d   :  { %p9775_p11 = scmp.ne.s32.totalorder %s10079_s24, %s9774_s26  ;;  %p9779_p12 = scmp.lt.s32.totalorder %s10079_s24, %s10079_s24 }
  0x1e   :  { %p9780_p13 = scmp.lt.s32.totalorder %s9778_s1, %s9774_s26 }
  0x20   :  { %p9781_p0 = por %p9780_p13, %p9779_p12 }
  0x22   :  { %p9782_p1 = pnand %p9781_p0, %p9775_p11 }
  0x24   :  { %9785 = shalt.err (!%p9782_p1)
}
  0x25   :  { %s9998_s22 = smov 16   ;;  %s9999_s27 = smov 1  }
  0x26   :  { %64 = dma.hbm_to_vmem [thread:$0]  %s10998_s3, 80, %s10079_s24, [#allocation8], %s9998_s22, %s9998_s22, %s9999_s27  }
  0x27   :  { %s10000_s30 = smov [#allocation10]   ;;  %s10001_s14 = smov [#allocation13]  }
  0x28   :  { %s82_s13 = sshll.u32 %s10000_s30, 4  ;;  %s106_s15 = sshll.u32 %s10001_s14, 4  ;;  %s83_s13 = int_to_ptr.vmem [resolvable:$true] %s82_s13  ;;  %s107_s15 = int_to_ptr.vmem [resolvable:$true] %s106_s15 }
  0x29   :  { %s9786_s18 = scalar_lea.hbm %s11000_s5, 2560 }
  0x2a   :  { %p9787_p2 = scmp.ne.s32.totalorder %s11000_s5, %s9786_s18  ;;  %p9790_p3 = scmp.lt.u32.totalorder %s9786_s18, %s11000_s5 }
  0x2c   :  { %p9792_p4 = pnand %p9790_p3, %p9787_p2 }
  0x2e   :  { %9795 = shalt.err (!%p9792_p4)
}
  0x2f   :  { %s9796_s3 = scalar_lea.vmem %s83_s13, 2560  ;;  %p9801_p6 = scmp.lt.s32.totalorder %s83_s13, %s83_s13 }
  0x30   :  { %p9797_p5 = scmp.ne.s32.totalorder %s83_s13, %s9796_s3  ;;  %p9802_p7 = scmp.lt.s32.totalorder %s9796_s3, %s9796_s3 }
  0x32   :  { %p9803_p8 = por %p9802_p7, %p9801_p6 }
  0x34   :  { %p9804_p9 = pnand %p9803_p8, %p9797_p5 }
  0x36   :  { %9807 = shalt.err (!%p9804_p9)
}
  0x37   :  { %s10002_s24 = smov 256   ;;  %s9808_s29 = scalar_lea.hbm %s11002_s7, 320 }
  0x38   :  { %88 = dma.hbm_to_vmem [thread:$0]  %s11000_s5, 2560, %s83_s13, [#allocation11], %s10002_s24, %s10002_s24, %s9998_s22  }
  0x39   :  { %p9809_p10 = scmp.ne.s32.totalorder %s11002_s7, %s9808_s29  ;;  %p9812_p11 = scmp.lt.u32.totalorder %s9808_s29, %s11002_s7 }
  0x3b   :  { %p9814_p12 = pnand %p9812_p11, %p9809_p10 }
  0x3d   :  { %9817 = shalt.err (!%p9814_p12)
}
  0x3e   :  { %s9818_s18 = scalar_lea.vmem %s107_s15, 320  ;;  %p9823_p0 = scmp.lt.s32.totalorder %s107_s15, %s107_s15 }
  0x3f   :  { %p9819_p13 = scmp.ne.s32.totalorder %s107_s15, %s9818_s18  ;;  %p9824_p1 = scmp.lt.s32.totalorder %s9818_s18, %s9818_s18 }
  0x41   :  { %p9825_p2 = por %p9824_p1, %p9823_p0 }
  0x43   :  { %p9826_p3 = pnand %p9825_p2, %p9819_p13 }
  0x45   :  { %9829 = shalt.err (!%p9826_p3)
}
  0x46   :  { %s10003_s5 = smov 64   ;;  %s10004_s13 = smov 4  }
  0x47   :  { %112 = dma.hbm_to_vmem [thread:$0]  %s11002_s7, 320, %s107_s15, [#allocation14], %s10003_s5, %s10003_s5, %s10004_s13  }
  0x48   :  { %s10005_s21 = smov [#allocation16]   ;;  %s10006_s3 = smov [#allocation2]  }
  0x49   :  { %s130_s23 = sshll.u32 %s10005_s21, 4  ;;  %s29_s25 = sshll.u32 %s10006_s3, 4  ;;  %s131_s23 = int_to_ptr.vmem [resolvable:$true] %s130_s23  ;;  %s30_s25 = int_to_ptr.vmem [resolvable:$true] %s29_s25 }
  0x4a   :  { %s9830_s28 = scalar_lea.hbm %s11004_s9, 320 }
  0x4b   :  { %p9831_p4 = scmp.ne.s32.totalorder %s11004_s9, %s9830_s28  ;;  %p9834_p5 = scmp.lt.u32.totalorder %s9830_s28, %s11004_s9 }
  0x4d   :  { %p9836_p6 = pnand %p9834_p5, %p9831_p4 }
  0x4f   :  { %9839 = shalt.err (!%p9836_p6)
}
  0x50   :  { %s9840_s7 = scalar_lea.vmem %s131_s23, 320  ;;  %p9845_p8 = scmp.lt.s32.totalorder %s131_s23, %s131_s23 }
  0x51   :  { %p9841_p7 = scmp.ne.s32.totalorder %s131_s23, %s9840_s7  ;;  %p9846_p9 = scmp.lt.s32.totalorder %s9840_s7, %s9840_s7 }
  0x53   :  { %p9847_p10 = por %p9846_p9, %p9845_p8 }
  0x55   :  { %p9848_p11 = pnand %p9847_p10, %p9841_p7 }
  0x57   :  { %9851 = shalt.err (!%p9848_p11)
}
  0x58   :  { %136 = dma.hbm_to_vmem [thread:$0]  %s11004_s9, 320, %s131_s23, [#allocation17], %s10003_s5, %s10003_s5, %s10004_s13  }
  0x59   :  { %s9852_s20 = scalar_lea.hbm %s10995_s0, 128 }
  0x5a   :  { %p9853_p12 = scmp.ne.s32.totalorder %s10995_s0, %s9852_s20  ;;  %p9856_p13 = scmp.lt.u32.totalorder %s9852_s20, %s10995_s0 }
  0x5c   :  { %p9858_p0 = pnand %p9856_p13, %p9853_p12 }
  0x5e   :  { %9861 = shalt.err (!%p9858_p0)
}
  0x5f   :  { %s9862_s28 = scalar_lea.vmem %s30_s25, 128  ;;  %p9867_p2 = scmp.lt.s32.totalorder %s30_s25, %s30_s25 }
  0x60   :  { %p9863_p1 = scmp.ne.s32.totalorder %s30_s25, %s9862_s28  ;;  %p9868_p3 = scmp.lt.s32.totalorder %s9862_s28, %s9862_s28 }
  0x62   :  { %p9869_p4 = por %p9868_p3, %p9867_p2 }
  0x64   :  { %p9870_p5 = pnand %p9869_p4, %p9863_p1 }
  0x66   :  { %9873 = shalt.err (!%p9870_p5)
}
  0x67   :  { %32 = dma.hbm_to_vmem [thread:$0]  %s10995_s0, 128, %s30_s25, [#allocation3]  }
  0x68   :  { %s10007_s13 = smov [#allocation6]   ;;  %s10008_s29 = smov [#allocation9]  }
  0x69   :  { %s49_s23 = sshll.u32 %s10007_s13, 4  ;;  %s70_s30 = sshll.u32 %s10008_s29, 4  ;;  %s50_s23 = int_to_ptr.vmem [resolvable:$true] %s49_s23  ;;  %s71_s30 = int_to_ptr.vmem [resolvable:$true] %s70_s30 }
  0x6a   :  { %s9874_s7 = scalar_lea.hbm %s10997_s2, 128 }
  0x6b   :  { %p9875_p6 = scmp.ne.s32.totalorder %s10997_s2, %s9874_s7  ;;  %p9878_p7 = scmp.lt.u32.totalorder %s9874_s7, %s10997_s2 }
  0x6d   :  { %p9880_p8 = pnand %p9878_p7, %p9875_p6 }
  0x6f   :  { %9883 = shalt.err (!%p9880_p8)
}
  0x70   :  { %s9884_s0 = scalar_lea.vmem %s50_s23, 128  ;;  %p9889_p10 = scmp.lt.s32.totalorder %s50_s23, %s50_s23 }
  0x71   :  { %p9885_p9 = scmp.ne.s32.totalorder %s50_s23, %s9884_s0  ;;  %p9890_p11 = scmp.lt.s32.totalorder %s9884_s0, %s9884_s0 }
  0x73   :  { %p9891_p12 = por %p9890_p11, %p9889_p10 }
  0x75   :  { %p9892_p13 = pnand %p9891_p12, %p9885_p9 }
  0x77   :  { %9895 = shalt.err (!%p9892_p13)
}
  0x78   :  { %52 = dma.hbm_to_vmem [thread:$0]  %s10997_s2, 128, %s50_s23, [#allocation5]  }
  0x79   :  { %s9896_s26 = scalar_lea.hbm %s10999_s4, 2560 }
  0x7a   :  { %p9897_p0 = scmp.ne.s32.totalorder %s10999_s4, %s9896_s26  ;;  %p9900_p1 = scmp.lt.u32.totalorder %s9896_s26, %s10999_s4 }
  0x7c   :  { %p9902_p2 = pnand %p9900_p1, %p9897_p0 }
  0x7e   :  { %9905 = shalt.err (!%p9902_p2)
}
  0x7f   :  { %s9906_s13 = scalar_lea.vmem %s71_s30, 2560  ;;  %p9911_p4 = scmp.lt.s32.totalorder %s71_s30, %s71_s30 }
  0x80   :  { %p9907_p3 = scmp.ne.s32.totalorder %s71_s30, %s9906_s13  ;;  %p9912_p5 = scmp.lt.s32.totalorder %s9906_s13, %s9906_s13 }
  0x82   :  { %p9913_p6 = por %p9912_p5, %p9911_p4 }
  0x84   :  { %p9914_p7 = pnand %p9913_p6, %p9907_p3 }
  0x86   :  { %9917 = shalt.err (!%p9914_p7)
}
  0x87   :  { %76 = dma.hbm_to_vmem [thread:$0]  %s10999_s4, 2560, %s71_s30, [#allocation8], %s10002_s24, %s10002_s24, %s9998_s22  }
  0x88   :  { %s10009_s29 = smov [#allocation12]   ;;  %s10010_s16 = smov [#allocation15]  }
  0x89   :  { %s94_s14 = sshll.u32 %s10009_s29, 4  ;;  %s118_s7 = sshll.u32 %s10010_s16, 4  ;;  %s95_s14 = int_to_ptr.vmem [resolvable:$true] %s94_s14  ;;  %s119_s7 = int_to_ptr.vmem [resolvable:$true] %s118_s7 }
  0x8a   :  { %s9918_s18 = scalar_lea.hbm %s11001_s6, 1280 }
  0x8b   :  { %p9919_p8 = scmp.ne.s32.totalorder %s11001_s6, %s9918_s18  ;;  %p9922_p9 = scmp.lt.u32.totalorder %s9918_s18, %s11001_s6 }
  0x8d   :  { %p9924_p10 = pnand %p9922_p9, %p9919_p8 }
  0x8f   :  { %9927 = shalt.err (!%p9924_p10)
}
  0x90   :  { %s9928_s4 = scalar_lea.vmem %s95_s14, 1280  ;;  %p9933_p12 = scmp.lt.s32.totalorder %s95_s14, %s95_s14 }
  0x91   :  { %p9929_p11 = scmp.ne.s32.totalorder %s95_s14, %s9928_s4  ;;  %p9934_p13 = scmp.lt.s32.totalorder %s9928_s4, %s9928_s4 }
  0x93   :  { %p9935_p0 = por %p9934_p13, %p9933_p12 }
  0x95   :  { %p9936_p1 = pnand %p9935_p0, %p9929_p11 }
  0x97   :  { %9939 = shalt.err (!%p9936_p1)
}
  0x98   :  { %100 = dma.hbm_to_vmem [thread:$0]  %s11001_s6, 1280, %s95_s14, [#allocation11], %s10002_s24, %s10002_s24, %s9998_s22  }
  0x99   :  { %s9940_s1 = scalar_lea.hbm %s11003_s8, 64000 }
  0x9a   :  { %p9941_p2 = scmp.ne.s32.totalorder %s11003_s8, %s9940_s1  ;;  %p9944_p3 = scmp.lt.u32.totalorder %s9940_s1, %s11003_s8 }
  0x9c   :  { %p9946_p4 = pnand %p9944_p3, %p9941_p2 }
  0x9e   :  { %9949 = shalt.err (!%p9946_p4)
}
  0x9f   :  { %s9950_s2 = scalar_lea.vmem %s119_s7, 64000  ;;  %p9955_p6 = scmp.lt.s32.totalorder %s119_s7, %s119_s7 }
  0xa0   :  { %p9951_p5 = scmp.ne.s32.totalorder %s119_s7, %s9950_s2  ;;  %p9956_p7 = scmp.lt.s32.totalorder %s9950_s2, %s9950_s2 }
  0xa2   :  { %p9957_p8 = por %p9956_p7, %p9955_p6 }
  0xa4   :  { %p9958_p9 = pnand %p9957_p8, %p9951_p5 }
  0xa6   :  { %9961 = shalt.err (!%p9958_p9)
}
  0xa7   :  { %124 = dma.hbm_to_vmem [thread:$0]  %s11003_s8, 64000, %s119_s7, [#allocation14], %s10002_s24, %s10002_s24, %s9998_s22  }
  0xa8   :  { %s10011_s29 = smov [#allocation18]   ;;  %s9962_s17 = scalar_lea.hbm %s11006_s11, 80 }
  0xa9   :  { %s144_s14 = sshll.u32 %s10011_s29, 4  ;;  %p9963_p10 = scmp.ne.s32.totalorder %s11006_s11, %s9962_s17  ;;  %s145_s14 = int_to_ptr.vmem [resolvable:$true] %s144_s14 }
  0xaa   :  { %p9966_p11 = scmp.lt.u32.totalorder %s9962_s17, %s11006_s11 }
  0xac   :  { %p9968_p12 = pnand %p9966_p11, %p9963_p10 }
  0xae   :  { %9971 = shalt.err (!%p9968_p12)
}
  0xaf   :  { %s9972_s20 = scalar_lea.vmem %s145_s14, 80  ;;  %s9976_s8 = scalar_lea.vmem %s145_s14, 96 }
  0xb0   :  { %p9973_p13 = scmp.ne.s32.totalorder %s145_s14, %s9972_s20  ;;  %p9977_p0 = scmp.lt.s32.totalorder %s145_s14, %s145_s14 }
  0xb1   :  { %p9978_p1 = scmp.lt.s32.totalorder %s9976_s8, %s9972_s20 }
  0xb3   :  { %p9979_p2 = por %p9978_p1, %p9977_p0 }
  0xb5   :  { %p9980_p3 = pnand %p9979_p2, %p9973_p13 }
  0xb7   :  { %9983 = shalt.err (!%p9980_p3)
}
  0xb8   :  { %150 = dma.hbm_to_vmem [thread:$0]  %s11006_s11, 80, %s145_s14, [#allocation17], %s9998_s22, %s9998_s22, %s9999_s27  }
  0xb9   :  { %9984 = dma.done.wait [#allocation3], 128  }
  0xba   :  { %9985 = vsyncadd [#allocation3], 4294967168 }
  0xbb   :  { %9986 = dma.done.wait [#allocation5], 256  }
  0xbc   :  { %9987 = vsyncadd [#allocation5], 4294967040 }
  0xbd   :  { %9988 = dma.done.wait [#allocation8], 2640  }
  0xbe   :  { %9989 = vsyncadd [#allocation8], 4294964656 }
  0xbf   :  { %9990 = dma.done.wait [#allocation11], 3840  }
  0xc0   :  { %9991 = vsyncadd [#allocation11], 4294963456 }
  0xc1   :  { %9992 = dma.done.wait [#allocation14], 64320  }
  0xc2   :  { %9993 = vsyncadd [#allocation14], 4294902976 }
  0xc3   :  { %9994 = dma.done.wait [#allocation17], 400  }
  0xc4   :  { %9995 = vsyncadd [#allocation17], 4294966896  ;;  %v194_v0 = vlaneseq  ;;  %v10012_v1 = vmov 0   ;;  %v8765_v3 = vld [vmem:[#allocation10 + $0x4] ss:$16 sps:$4 sm:$0xff]   ;;  %vm436_vm0 = vcmask 1043456  }
  0xc5   :  { %265 = vmatprep.mubr.bf16.mxu1 %v10012_v1  ;;  %370 = vmatprep.mubr.bf16.mxu0 %v10012_v1  ;;  %v8767_v5 = vld [vmem:[#allocation9 + $0x4] ss:$16 sps:$4 sm:$0xff]   ;;  %v8769_v6 = vld [vmem:[#allocation10] ss:$16 sps:$4 sm:$0xff]   ;;  %v9741_v11 = vld [vmem:[#allocation7] ss:$0 sm:$0xff] }
  0xc6   :  { %v10239_v2 = vshrl.u32 %v194_v0, 7  ;;  %233 = vmatprep.subr.bf16.mxu1 %v8765_v3  ;;  %v8770_v7 = vld [vmem:[#allocation9] ss:$16 sps:$4 sm:$0xff]   ;;  %338 = vmatprep.subr.bf16.mxu0 %v8767_v5  ;;  %vm229_vm1 = vcmask 130048   ;;  %v8773_v16 = vld [vmem:[#allocation10 + $0x8] ss:$16 sps:$4 sm:$0xff]  }
  0xc7   :  { %v185_v8 = vld [vmem:[#allocation2] sm:$0xff]  ;;  %v186_v10 = vld [vmem:[#allocation6] sm:$0xff]  ;;  %234 = vmatpush1.bf16.msra.mxu1 %v8769_v6  ;;  %339 = vmatpush1.bf16.msra.mxu0 %v8770_v7  ;;  %v8775_v17 = vld [vmem:[#allocation10 + $0xc] ss:$16 sps:$4 sm:$0xff]   ;;  %vm432_vm2 = vcmask 64512   ;;  %s10013_s18 = smov 112  }
  0xc8   :  { %v10242_v4 = vsub.s32 0, %v10239_v2  ;;  %v10244_v9 = vpack.c.bf16 %v185_v8, %v185_v8  ;;  %v420_v12 = vld [vmem:[#allocation12] sm:$0xff]  ;;  %v10246_v13 = vsub.f32 %v186_v10, %v185_v8  ;;  %v8778_v19 = vld [vmem:[#allocation9 + $0xc] ss:$16 sps:$4 sm:$0xff]   ;;  %274 = vmatprep.subr.bf16.mxu1 %v8775_v17  ;;  %v8783_v22 = vld [vmem:[#allocation15 + $0x4] ss:$16 sps:$4 sm:$0xff]  }
  0xc9   :  { %v7644_v14 = vcombine.high %v420_v12, %v420_v12  ;;  %v7643_v15 = vcombine.low %v420_v12, %v420_v12  ;;  %v421_v23 = vld [vmem:[#allocation12 + $0x8] sm:$0xff]  ;;  %v8781_v28 = vld [vmem:[#allocation15] ss:$16 sps:$4 sm:$0xff]   ;;  %v8786_v33 = vld [vmem:[#allocation15 + $0xc] ss:$16 sps:$4 sm:$0xff]  }
  0xca   :  { %v10249_v18 = vmul.f32 %v9741_v11, %v10246_v13  ;;  %7635 = vmatmul.mubr.msk.bf16.vlgmr.msra.gmra.mrb[0].mxu1 %vm229_vm1, %v10244_v9  ;;  %v189_v24 = vld [vmem:[#allocation4] sm:$0xff]  ;;  %v7646_v26 = vcombine.high %v421_v23, %v421_v23  ;;  %v7645_v30 = vcombine.low %v421_v23, %v421_v23  ;;  %v8787_v31 = vld [vmem:[#allocation15 + $0x20] ss:$16 sps:$4 sm:$0xff]  }
  0xcb   :  { %7647 = vmatprep.subr.msk.bf16.mxu0 %vm436_vm0, %v7644_v14  ;;  %v438_v21 = vsel %vm436_vm0, %v7643_v15, 0  ;;  %275 = vmatpush1.bf16.msra.mxu1 %v8773_v16  ;;  %v8776_v25 = vld [vmem:[#allocation9 + $0x8] ss:$16 sps:$4 sm:$0xff]   ;;  %v10260_v27 = vpack.c.bf16 %v189_v24, %v189_v24  ;;  %v8793_v35 = vld [vmem:[#allocation15 + $0x40] ss:$16 sps:$4 sm:$0xff]  }
  0xcc   :  { %v200_v20 = vpack.c.bf16 %v10249_v18, %v10249_v18  ;;  %306 = vmatprep.mubr.bf16.mxu1 %v10012_v1  ;;  %379 = vmatprep.subr.bf16.mxu1 %v8778_v19  ;;  %v8789_v29 = vld [vmem:[#allocation15 + $0x24] ss:$16 sps:$4 sm:$0xff]   ;;  %v444_v32 = vsel %vm436_vm0, %v7645_v30, 0  ;;  %v8799_v37 = vld [vmem:[#allocation15 + $0x60] ss:$16 sps:$4 sm:$0xff]  }
  0xcd   :  { %v8795_v34 = vld [vmem:[#allocation15 + $0x44] ss:$16 sps:$4 sm:$0xff]   ;;  %v8784_v38 = vld [vmem:[#allocation15 + $0x8] ss:$16 sps:$4 sm:$0xff]   ;;  %v8792_v40 = vld [vmem:[#allocation15 + $0x2c] ss:$16 sps:$4 sm:$0xff]  }
  0xce   :  { %7641 = vmatmul.mubr.msk.bf16.vlgmr.msra.gmra.mrb[0].mxu0 %vm229_vm1, %v200_v20  ;;  %v8801_v36 = vld [vmem:[#allocation15 + $0x64] ss:$16 sps:$4 sm:$0xff]   ;;  %v8805_v41 = vld [vmem:[#allocation15 + $0x80] ss:$16 sps:$4 sm:$0xff]   ;;  %v8790_v42 = vld [vmem:[#allocation15 + $0x28] ss:$16 sps:$4 sm:$0xff]  }
  0xcf   :  { %450 = vmatpush1.bf16.msra.mxu0 %v438_v21  ;;  %481 = vmatprep.mubr.bf16.mxu0 %v10012_v1  ;;  %v8807_v39 = vld [vmem:[#allocation15 + $0x84] ss:$16 sps:$4 sm:$0xff]   ;;  %v8798_v44 = vld [vmem:[#allocation15 + $0x4c] ss:$16 sps:$4 sm:$0xff]   ;;  %v8811_v45 = vld [vmem:[#allocation15 + $0xa0] ss:$16 sps:$4 sm:$0xff]  }
  0xd0   :  { %1194 = vmatprep.subr.bf16.mxu0 %v8783_v22  ;;  %v8813_v43 = vld [vmem:[#allocation15 + $0xa4] ss:$16 sps:$4 sm:$0xff]   ;;  %v8796_v46 = vld [vmem:[#allocation15 + $0x48] ss:$16 sps:$4 sm:$0xff]   ;;  %v8804_v48 = vld [vmem:[#allocation15 + $0x6c] ss:$16 sps:$4 sm:$0xff]  }
  0xd1   :  { %v8819_v47 = vld [vmem:[#allocation15 + $0xc4] ss:$16 sps:$4 sm:$0xff]   ;;  %v8802_v49 = vld [vmem:[#allocation15 + $0x68] ss:$16 sps:$4 sm:$0xff]   ;;  %v8817_v50 = vld [vmem:[#allocation15 + $0xc0] ss:$16 sps:$4 sm:$0xff]  }
  0xd2   :  { %7636 = vmatmul.mubr.msk.bf16.vlgmr.msra.gmra.mrb[4].mxu1 %vm229_vm1, %v10244_v9  ;;  %v8810_v51 = vld [vmem:[#allocation15 + $0x8c] ss:$16 sps:$4 sm:$0xff]   ;;  %v8825_v52 = vld [vmem:[#allocation15 + $0xe4] ss:$16 sps:$4 sm:$0xff]   ;;  %v8823_v53 = vld [vmem:[#allocation15 + $0xe0] ss:$16 sps:$4 sm:$0xff]  }
  0xd3   :  { %380 = vmatpush1.bf16.msra.mxu1 %v8776_v25  ;;  %411 = vmatprep.mubr.bf16.mxu1 %v10012_v1  ;;  %v8808_v54 = vld [vmem:[#allocation15 + $0x88] ss:$16 sps:$4 sm:$0xff]   ;;  %v8831_v55 = vld [vmem:[#allocation15 + $0x104] ss:$16 sps:$4 sm:$0xff]   ;;  %v8816_v56 = vld [vmem:[#allocation15 + $0xac] ss:$16 sps:$4 sm:$0xff]  }
  0xd4   :  { %7649 = vmatprep.subr.msk.bf16.mxu1 %vm436_vm0, %v7646_v26  ;;  %v8829_v57 = vld [vmem:[#allocation15 + $0x100] ss:$16 sps:$4 sm:$0xff]   ;;  %v8814_v58 = vld [vmem:[#allocation15 + $0xa8] ss:$16 sps:$4 sm:$0xff]   ;;  %v8837_v59 = vld [vmem:[#allocation15 + $0x124] ss:$16 sps:$4 sm:$0xff]  }
  0xd5   :  { %v8822_v60 = vld [vmem:[#allocation15 + $0xcc] ss:$16 sps:$4 sm:$0xff]   ;;  %v8835_v61 = vld [vmem:[#allocation15 + $0x120] ss:$16 sps:$4 sm:$0xff]   ;;  %v8820_v62 = vld [vmem:[#allocation15 + $0xc8] ss:$16 sps:$4 sm:$0xff]  }
  0xd6   :  { %7648 = vmatmul.mubr.msk.bf16.vlgmr.msra.gmra.mrb[4].mxu0 %vm432_vm2, %v10260_v27  ;;  %v8843_v63 = vld [vmem:[#allocation15 + $0x144] ss:$16 sps:$4 sm:$0xff]   ;;  %v8828_v0 = vld [vmem:[#allocation15 + $0xec] ss:$16 sps:$4 sm:$0xff]   ;;  %v8841_v3 = vld [vmem:[#allocation15 + $0x140] ss:$16 sps:$4 sm:$0xff]  }
  0xd7   :  { %1195 = vmatpush1.bf16.msra.mxu0 %v8781_v28  ;;  %v8826_v5 = vld [vmem:[#allocation15 + $0xe8] ss:$16 sps:$4 sm:$0xff]   ;;  %v8849_v6 = vld [vmem:[#allocation15 + $0x164] ss:$16 sps:$4 sm:$0xff]   ;;  %v8834_v7 = vld [vmem:[#allocation15 + $0x10c] ss:$16 sps:$4 sm:$0xff]  }
  0xd8   :  { %1196 = vmatprep.subr.bf16.mxu0 %v8789_v29  ;;  %v8847_v8 = vld [vmem:[#allocation15 + $0x160] ss:$16 sps:$4 sm:$0xff]   ;;  %v8832_v10 = vld [vmem:[#allocation15 + $0x108] ss:$16 sps:$4 sm:$0xff]   ;;  %v8840_v11 = vld [vmem:[#allocation15 + $0x12c] ss:$16 sps:$4 sm:$0xff]  }
  0xd9   :  { %v8838_v12 = vld [vmem:[#allocation15 + $0x128] ss:$16 sps:$4 sm:$0xff]   ;;  %v8846_v14 = vld [vmem:[#allocation15 + $0x14c] ss:$16 sps:$4 sm:$0xff]   ;;  %v8855_v19 = vld [vmem:[#allocation15 + $0x184] ss:$16 sps:$4 sm:$0xff]  }
  0xda   :  { %7642 = vmatmul.mubr.msk.bf16.vlgmr.msra.gmra.mrb[8].mxu1 %vm229_vm1, %v200_v20  ;;  %v8844_v15 = vld [vmem:[#allocation15 + $0x148] ss:$16 sps:$4 sm:$0xff]   ;;  %v8852_v16 = vld [vmem:[#allocation15 + $0x16c] ss:$16 sps:$4 sm:$0xff]   ;;  %v8853_v21 = vld [vmem:[#allocation15 + $0x180] ss:$16 sps:$4 sm:$0xff]  }
  0xdb   :  { %1197 = vmatpush1.bf16.msra.mxu0 %v8787_v31  ;;  %491 = vmatpush1.bf16.msra.mxu1 %v444_v32  ;;  %v8850_v17 = vld [vmem:[#allocation15 + $0x168] ss:$16 sps:$4 sm:$0xff]   ;;  %v8858_v20 = vld [vmem:[#allocation15 + $0x18c] ss:$16 sps:$4 sm:$0xff]   ;;  %v8859_v23 = vld [vmem:[#allocation15 + $0x1a0] ss:$16 sps:$4 sm:$0xff]  }
  0xdc   :  { %522 = vmatprep.mubr.bf16.mxu1 %v10012_v1  ;;  %1276 = vmatprep.subr.bf16.mxu1 %v8786_v33  ;;  %v8856_v22 = vld [vmem:[#allocation15 + $0x188] ss:$16 sps:$4 sm:$0xff]   ;;  %v8861_v24 = vld [vmem:[#allocation15 + $0x1a4] ss:$16 sps:$4 sm:$0xff]   ;;  %v8864_v26 = vld [vmem:[#allocation15 + $0x1ac] ss:$16 sps:$4 sm:$0xff]  }
  0xdd   :  { %1198 = vmatprep.subr.bf16.mxu0 %v8795_v34  ;;  %v8862_v25 = vld [vmem:[#allocation15 + $0x1a8] ss:$16 sps:$4 sm:$0xff]   ;;  %v8867_v28 = vld [vmem:[#allocation15 + $0x1c4] ss:$16 sps:$4 sm:$0xff]   ;;  %v8865_v29 = vld [vmem:[#allocation15 + $0x1c0] ss:$16 sps:$4 sm:$0xff]  }
  0xde   :  { %v8868_v30 = vld [vmem:[#allocation15 + $0x1c8] ss:$16 sps:$4 sm:$0xff]   ;;  %v8870_v31 = vld [vmem:[#allocation15 + $0x1cc] ss:$16 sps:$4 sm:$0xff]   ;;  %v8873_v32 = vld [vmem:[#allocation15 + $0x1e4] ss:$16 sps:$4 sm:$0xff]  }
  0xdf   :  { %1199 = vmatpush1.bf16.msra.mxu0 %v8793_v35  ;;  %v8876_v33 = vld [vmem:[#allocation15 + $0x1ec] ss:$16 sps:$4 sm:$0xff]   ;;  %v8871_v34 = vld [vmem:[#allocation15 + $0x1e0] ss:$16 sps:$4 sm:$0xff]   ;;  %v8874_v35 = vld [vmem:[#allocation15 + $0x1e8] ss:$16 sps:$4 sm:$0xff]  }
  0xe0   :  { %1200 = vmatprep.subr.bf16.mxu0 %v8801_v36  ;;  %v8879_v36 = vld [vmem:[#allocation15 + $0x204] ss:$16 sps:$4 sm:$0xff]  }
  0xe2   :  { %7650 = vmatmul.mubr.msk.bf16.vlgmr.msra.gmra.mrb[12].mxu1 %vm432_vm2, %v10260_v27 }
  0xe3   :  { %1201 = vmatpush1.bf16.msra.mxu0 %v8799_v37  ;;  %1277 = vmatpush1.bf16.msra.mxu1 %v8784_v38  ;;  %v8882_v37 = vld [vmem:[#allocation15 + $0x20c] ss:$16 sps:$4 sm:$0xff]  }
  0xe4   :  { %1202 = vmatprep.subr.bf16.mxu0 %v8807_v39  ;;  %1278 = vmatprep.subr.bf16.mxu1 %v8792_v40 }
  0xe7   :  { %1203 = vmatpush1.bf16.msra.mxu0 %v8805_v41  ;;  %1279 = vmatpush1.bf16.msra.mxu1 %v8790_v42 }
  0xe8   :  { %1204 = vmatprep.subr.bf16.mxu0 %v8813_v43  ;;  %1280 = vmatprep.subr.bf16.mxu1 %v8798_v44 }
  0xeb   :  { %1205 = vmatpush1.bf16.msra.mxu0 %v8811_v45  ;;  %1281 = vmatpush1.bf16.msra.mxu1 %v8796_v46 }
  0xec   :  { %1206 = vmatprep.subr.bf16.mxu0 %v8819_v47  ;;  %1282 = vmatprep.subr.bf16.mxu1 %v8804_v48  ;;  %v10273_v47 = vld [vmem:[#allocation13] sm:$0xf] }
  0xef   :  { %1207 = vmatpush1.bf16.msra.mxu0 %v8817_v50  ;;  %1283 = vmatpush1.bf16.msra.mxu1 %v8802_v49  ;;  %v10276_v49 = vsub.s32 1, %v10239_v2 }
  0xf0   :  { %1208 = vmatprep.subr.bf16.mxu0 %v8825_v52  ;;  %1284 = vmatprep.subr.bf16.mxu1 %v8810_v51  ;;  %v540_v52 = vrot.slane %v10273_v47, %v10242_v4 }
  0xf3   :  { %1209 = vmatpush1.bf16.msra.mxu0 %v8823_v53  ;;  %1285 = vmatpush1.bf16.msra.mxu1 %v8808_v54 }
  0xf4   :  { %1210 = vmatprep.subr.bf16.mxu0 %v8831_v55  ;;  %1286 = vmatprep.subr.bf16.mxu1 %v8816_v56  ;;  %v544_v55 = vrot.slane %v10273_v47, %v10276_v49 }
  0xf7   :  { %1211 = vmatpush1.bf16.msra.mxu0 %v8829_v57  ;;  %1287 = vmatpush1.bf16.msra.mxu1 %v8814_v58 }
  0xf8   :  { %1212 = vmatprep.subr.bf16.mxu0 %v8837_v59  ;;  %1288 = vmatprep.subr.bf16.mxu1 %v8822_v60 }
  0xfb   :  { %1213 = vmatpush1.bf16.msra.mxu0 %v8835_v61  ;;  %1289 = vmatpush1.bf16.msra.mxu1 %v8820_v62 }
  0xfc   :  { %1214 = vmatprep.subr.bf16.mxu0 %v8843_v63  ;;  %1290 = vmatprep.subr.bf16.mxu1 %v8828_v0 }
  0xff   :  { %1215 = vmatpush1.bf16.msra.mxu0 %v8841_v3  ;;  %1291 = vmatpush1.bf16.msra.mxu1 %v8826_v5 }
 0x100   :  { %1216 = vmatprep.subr.bf16.mxu0 %v8849_v6  ;;  %1292 = vmatprep.subr.bf16.mxu1 %v8834_v7  ;;  %v8877_v6 = vld [vmem:[#allocation15 + $0x200] ss:$16 sps:$4 sm:$0xff]   ;;  %v8880_v7 = vld [vmem:[#allocation15 + $0x208] ss:$16 sps:$4 sm:$0xff]  }
 0x103   :  { %1217 = vmatpush1.bf16.msra.mxu0 %v8847_v8  ;;  %1293 = vmatpush1.bf16.msra.mxu1 %v8832_v10 }
 0x104   :  { %1294 = vmatprep.subr.bf16.mxu1 %v8840_v11  ;;  %1218 = vmatprep.subr.bf16.mxu0 %v8855_v19  ;;  %v8885_v11 = vld [vmem:[#allocation15 + $0x224] ss:$16 sps:$4 sm:$0xff]  }
 0x107   :  { %1295 = vmatpush1.bf16.msra.mxu1 %v8838_v12  ;;  %1219 = vmatpush1.bf16.msra.mxu0 %v8853_v21  ;;  %v8888_v12 = vld [vmem:[#allocation15 + $0x22c] ss:$16 sps:$4 sm:$0xff]   ;;  %v8883_v21 = vld [vmem:[#allocation15 + $0x220] ss:$16 sps:$4 sm:$0xff]  }
 0x108   :  { %1296 = vmatprep.subr.bf16.mxu1 %v8846_v14  ;;  %1220 = vmatprep.subr.bf16.mxu0 %v8861_v24  ;;  %v8894_v24 = vld [vmem:[#allocation15 + $0x24c] ss:$16 sps:$4 sm:$0xff]  }
 0x10b   :  { %1297 = vmatpush1.bf16.msra.mxu1 %v8844_v15  ;;  %1221 = vmatpush1.bf16.msra.mxu0 %v8859_v23  ;;  %v8891_v23 = vld [vmem:[#allocation15 + $0x244] ss:$16 sps:$4 sm:$0xff]  }
 0x10c   :  { %1298 = vmatprep.subr.bf16.mxu1 %v8852_v16  ;;  %1222 = vmatprep.subr.bf16.mxu0 %v8867_v28  ;;  %v8889_v28 = vld [vmem:[#allocation15 + $0x240] ss:$16 sps:$4 sm:$0xff]  }
 0x10f   :  { %1299 = vmatpush1.bf16.msra.mxu1 %v8850_v17  ;;  %1223 = vmatpush1.bf16.msra.mxu0 %v8865_v29  ;;  %v8892_v29 = vld [vmem:[#allocation15 + $0x248] ss:$16 sps:$4 sm:$0xff]  }
 0x110   :  { %1300 = vmatprep.subr.bf16.mxu1 %v8858_v20  ;;  %1224 = vmatprep.subr.bf16.mxu0 %v8873_v32  ;;  %v10283_v20 = vsub.s32 3, %v10239_v2 }
 0x113   :  { %1301 = vmatpush1.bf16.msra.mxu1 %v8856_v22  ;;  %1225 = vmatpush1.bf16.msra.mxu0 %v8871_v34  ;;  %v8886_v22 = vld [vmem:[#allocation15 + $0x228] ss:$16 sps:$4 sm:$0xff]   ;;  %v8900_v34 = vld [vmem:[#allocation15 + $0x26c] ss:$16 sps:$4 sm:$0xff]  }
 0x114   :  { %1302 = vmatprep.subr.bf16.mxu1 %v8864_v26  ;;  %1235 = vmatprep.subr.bf16.mxu0 %v8879_v36  ;;  %v552_v26 = vrot.slane %v10273_v47, %v10283_v20 }
 0x117   :  { %1303 = vmatpush1.bf16.msra.mxu1 %v8862_v25 }
 0x118   :  { %1304 = vmatprep.subr.bf16.mxu1 %v8870_v31 }
 0x11b   :  { %1305 = vmatpush1.bf16.msra.mxu1 %v8868_v30 }
 0x11c   :  { %1306 = vmatprep.subr.bf16.mxu1 %v8876_v33  ;;  %v8897_v33 = vld [vmem:[#allocation15 + $0x264] ss:$16 sps:$4 sm:$0xff]  }
 0x11f   :  { %1307 = vmatpush1.bf16.msra.mxu1 %v8874_v35 }
 0x120   :  { %1317 = vmatprep.subr.bf16.mxu1 %v8882_v37 }
 0x19d   :  { %v267_v38 = vpop.f32.mrb[0].mxu1 }
 0x19e   :  { %v269_v39 = vpop.f32.mrb[1].mxu1 }
 0x19f   :  { %v271_v40 = vpop.f32.mrb[2].mxu1 }
 0x1a0   :  { %v272_v42 = vpop.f32.mrb[3].mxu1 }
 0x1a1   :  { %v372_v41 = vpop.f32.mrb[0].mxu0  ;;  %v8906_v42 = vld [vmem:[#allocation15 + $0x28c] ss:$16 sps:$4 sm:$0xff]  }
 0x1a2   :  { %v373_v43 = vadd.f32 %v372_v41, %v267_v38  ;;  %v374_v44 = vpop.f32.mrb[1].mxu0  ;;  %v8895_v38 = vld [vmem:[#allocation15 + $0x260] ss:$16 sps:$4 sm:$0xff]   ;;  %v8903_v41 = vld [vmem:[#allocation15 + $0x284] ss:$16 sps:$4 sm:$0xff]  }
 0x1a3   :  { %v375_v45 = vadd.f32 %v374_v44, %v269_v39  ;;  %v376_v46 = vpop.f32.mrb[2].mxu0  ;;  %v8898_v39 = vld [vmem:[#allocation15 + $0x268] ss:$16 sps:$4 sm:$0xff]   ;;  %v8901_v44 = vld [vmem:[#allocation15 + $0x280] ss:$16 sps:$4 sm:$0xff]  }
 0x1a4   :  { %v377_v48 = vpop.f32.mrb[3].mxu0  ;;  %v8909_v46 = vld [vmem:[#allocation15 + $0x2a4] ss:$16 sps:$4 sm:$0xff]  }
 0x1a5   :  { %v308_v50 = vpop.f32.mrb[4].mxu1  ;;  %v8912_v48 = vld [vmem:[#allocation15 + $0x2ac] ss:$16 sps:$4 sm:$0xff]  }
 0x1a6   :  { %v310_v51 = vpop.f32.mrb[5].mxu1 }
 0x1a7   :  { %v312_v53 = vpop.f32.mrb[6].mxu1 }
 0x1a8   :  { %v313_v56 = vpop.f32.mrb[7].mxu1  ;;  %v8918_v53 = vld [vmem:[#allocation15 + $0x2cc] ss:$16 sps:$4 sm:$0xff]  }
 0x1a9   :  { %v483_v54 = vpop.f32.mrb[4].mxu0  ;;  %v8916_v56 = vld [vmem:[#allocation15 + $0x2c8] ss:$16 sps:$4 sm:$0xff]  }
 0x1aa   :  { %v531_v57 = vadd.f32 %v483_v54, %v373_v43  ;;  %v485_v58 = vpop.f32.mrb[5].mxu0  ;;  %v10290_v54 = vsub.s32 2, %v10239_v2 }
 0x1ab   :  { %v532_v59 = vadd.f32 %v485_v58, %v375_v45  ;;  %v487_v60 = vpop.f32.mrb[6].mxu0  ;;  %v8904_v45 = vld [vmem:[#allocation15 + $0x288] ss:$16 sps:$4 sm:$0xff]   ;;  %v8924_v58 = vld [vmem:[#allocation15 + $0x2ec] ss:$16 sps:$4 sm:$0xff]  }
 0x1ac   :  { %v557_v61 = vadd.f32 %v540_v52, %v531_v57  ;;  %v488_v62 = vpop.f32.mrb[7].mxu0  ;;  %v8915_v52 = vld [vmem:[#allocation15 + $0x2c4] ss:$16 sps:$4 sm:$0xff]   ;;  %v8919_v60 = vld [vmem:[#allocation15 + $0x2e0] ss:$16 sps:$4 sm:$0xff]  }
 0x1ad   :  { %v558_v63 = vadd.f32 %v544_v55, %v532_v59  ;;  %v413_v3 = vpop.f32.mrb[8].mxu1  ;;  %v8913_v55 = vld [vmem:[#allocation15 + $0x2c0] ss:$16 sps:$4 sm:$0xff]   ;;  %v8921_v57 = vld [vmem:[#allocation15 + $0x2e4] ss:$16 sps:$4 sm:$0xff]   ;;  %v548_v59 = vrot.slane %v10273_v47, %v10290_v54 }
 0x1ae   :  { %v561_v0 = vmax.f32 %v557_v61, 0.0  ;;  %v414_v8 = vadd.f32 %v413_v3, %v308_v50  ;;  %v415_v10 = vpop.f32.mrb[9].mxu1  ;;  %v8907_v50 = vld [vmem:[#allocation15 + $0x2a0] ss:$16 sps:$4 sm:$0xff]   ;;  %v8922_v61 = vld [vmem:[#allocation15 + $0x2e8] ss:$16 sps:$4 sm:$0xff]  }
 0x1af   :  { %v562_v5 = vmax.f32 %v558_v63, 0.0  ;;  %v416_v14 = vadd.f32 %v415_v10, %v310_v51  ;;  %v417_v15 = vpop.f32.mrb[10].mxu1  ;;  %v8910_v51 = vld [vmem:[#allocation15 + $0x2a8] ss:$16 sps:$4 sm:$0xff]   ;;  %v8927_v62 = vld [vmem:[#allocation15 + $0x304] ss:$16 sps:$4 sm:$0xff]  }
 0x1b0   :  { %v418_v17 = vpop.f32.mrb[11].mxu1  ;;  %v565_v19 = vpack.c.bf16 %v561_v0, %v561_v0  ;;  %v8930_v63 = vld [vmem:[#allocation15 + $0x30c] ss:$16 sps:$4 sm:$0xff]   ;;  %v8925_v0 = vld [vmem:[#allocation15 + $0x300] ss:$16 sps:$4 sm:$0xff]  }
 0x1b1   :  { %v566_v16 = vpack.c.bf16 %v562_v5, %v562_v5  ;;  %v8928_v3 = vld [vmem:[#allocation15 + $0x308] ss:$16 sps:$4 sm:$0xff]   ;;  %v8932_v5 = vld [vmem:[%s11005_s10 + $0x40] sm:$0xff]   ;;  %v8937_v15 = vld [vmem:[%s11005_s10 + $0x90] sm:$0xff]  }
 0x1b2   :  { %v8941_v17 = vld [vmem:[%s11005_s10 + $0x58] sm:$0xff]  }
 0x1b3   :  { %1226 = vmatprep.mubr.bf16.mxu0 %v566_v16  ;;  %1308 = vmatprep.mubr.bf16.mxu1 %v566_v16  ;;  %v8939_v16 = vld [vmem:[%s11005_s10 + $0x10] sm:$0xff]  }
 0x1b4   :  { %1227 = vmatmul.mubr.bf16.vlgmr.msra.gmra.mrb[8].mxu0 %v565_v19  ;;  %1309 = vmatmul.mubr.bf16.vlgmr.msra.gmra.mrb[16].mxu1 %v565_v19  ;;  %v8940_v19 = vld [vmem:[%s11005_s10 + $0x98] sm:$0xff]  }
 0x1b5   :  { %1236 = vmatpush1.bf16.msra.mxu0 %v8877_v6  ;;  %1318 = vmatpush1.bf16.msra.mxu1 %v8880_v7  ;;  %v524_v25 = vpop.f32.mrb[12].mxu1  ;;  %v8931_v6 = vld [vmem:[%s11005_s10 + $0x80] sm:$0xff]  }
 0x1b6   :  { %1237 = vmatprep.subr.bf16.mxu0 %v8885_v11  ;;  %1319 = vmatprep.subr.bf16.mxu1 %v8888_v12  ;;  %v533_v30 = vadd.f32 %v524_v25, %v414_v8  ;;  %v526_v31 = vpop.f32.mrb[13].mxu1  ;;  %v8933_v7 = vld [vmem:[%s11005_s10] sm:$0xff]   ;;  %v8935_v8 = vld [vmem:[%s11005_s10 + $0x48] sm:$0xff]  }
 0x1b7   :  { %v534_v32 = vadd.f32 %v526_v31, %v416_v14  ;;  %v528_v35 = vpop.f32.mrb[14].mxu1  ;;  %v8934_v11 = vld [vmem:[%s11005_s10 + $0x88] sm:$0xff]   ;;  %v8938_v14 = vld [vmem:[%s11005_s10 + $0x50] sm:$0xff]  }
 0x1b8   :  { %v529_v36 = vpop.f32.mrb[15].mxu1  ;;  %v559_v2 = vadd.f32 %v548_v59, %v533_v30  ;;  %v8936_v12 = vld [vmem:[%s11005_s10 + $0x8] sm:$0xff]   ;;  %v8950_v30 = vld [vmem:[%s11005_s10 + $0x70] sm:$0xff]   ;;  %v8955_v35 = vld [vmem:[%s11005_s10 + $0xc0] sm:$0xff]  }
 0x1b9   :  { %1238 = vmatpush1.bf16.msra.mxu0 %v8883_v21  ;;  %1320 = vmatpush1.bf16.msra.mxu1 %v8886_v22  ;;  %v560_v37 = vadd.f32 %v552_v26, %v534_v32  ;;  %v8942_v21 = vld [vmem:[%s11005_s10 + $0x18] sm:$0xff]   ;;  %v8944_v22 = vld [vmem:[%s11005_s10 + $0x60] sm:$0xff]   ;;  %v8947_v25 = vld [vmem:[%s11005_s10 + $0x68] sm:$0xff]  }
 0x1ba   :  { %1239 = vmatprep.subr.bf16.mxu0 %v8891_v23  ;;  %1321 = vmatprep.subr.bf16.mxu1 %v8894_v24  ;;  %v563_v47 = vmax.f32 %v559_v2, 0.0  ;;  %v8943_v23 = vld [vmem:[%s11005_s10 + $0xa0] sm:$0xff]   ;;  %v8946_v26 = vld [vmem:[%s11005_s10 + $0xa8] sm:$0xff]   ;;  %v8951_v31 = vld [vmem:[%s11005_s10 + $0x30] sm:$0xff]  }
 0x1bb   :  { %v564_v40 = vmax.f32 %v560_v37, 0.0  ;;  %v8945_v24 = vld [vmem:[%s11005_s10 + $0x20] sm:$0xff]   ;;  %v8952_v32 = vld [vmem:[%s11005_s10 + $0xb8] sm:$0xff]  }
 0x1bc   :  { %v567_v10 = vpack.c.bf16 %v563_v47, %v563_v47  ;;  %v669_v36 = vld [vmem:[#allocation16] sm:$0xf]  ;;  %v8956_v2 = vld [vmem:[#allocation10 + $0x20] ss:$16 sps:$4 sm:$0xff]  }
 0x1bd   :  { %1240 = vmatpush1.bf16.msra.mxu0 %v8889_v28  ;;  %1322 = vmatpush1.bf16.msra.mxu1 %v8892_v29  ;;  %v568_v43 = vpack.c.bf16 %v564_v40, %v564_v40  ;;  %v8948_v28 = vld [vmem:[%s11005_s10 + $0x28] sm:$0xff]   ;;  %v8949_v29 = vld [vmem:[%s11005_s10 + $0xb0] sm:$0xff]   ;;  %v674_v37 = vrot.slane %v669_v36, %v10242_v4  ;;  %v686_v40 = vrot.slane %v669_v36, %v10283_v20 }
 0x1be   :  { %1241 = vmatprep.subr.bf16.mxu0 %v8897_v33  ;;  %1323 = vmatprep.subr.bf16.mxu1 %v8900_v34  ;;  %v8953_v33 = vld [vmem:[%s11005_s10 + $0x78] sm:$0xff]  }
 0x1bf   :  { %7751 = vmatprep.mubr.msk.bf16.mxu0 %vm229_vm1, %v568_v43  ;;  %7752 = vmatprep.mubr.msk.bf16.mxu1 %vm229_vm1, %v568_v43  ;;  %v8954_v34 = vld [vmem:[%s11005_s10 + $0x38] sm:$0xff]  }
 0x1c1   :  { %1242 = vmatpush1.bf16.msra.mxu0 %v8895_v38  ;;  %1324 = vmatpush1.bf16.msra.mxu1 %v8898_v39  ;;  %v682_v38 = vrot.slane %v669_v36, %v10290_v54  ;;  %v678_v39 = vrot.slane %v669_v36, %v10276_v49 }
 0x1c2   :  { %1243 = vmatprep.subr.bf16.mxu0 %v8903_v41  ;;  %1325 = vmatprep.subr.bf16.mxu1 %v8906_v42 }
 0x1c5   :  { %1244 = vmatpush1.bf16.msra.mxu0 %v8901_v44  ;;  %1326 = vmatpush1.bf16.msra.mxu1 %v8904_v45 }
 0x1c6   :  { %1245 = vmatprep.subr.bf16.mxu0 %v8909_v46  ;;  %1327 = vmatprep.subr.bf16.mxu1 %v8912_v48 }
 0x1c9   :  { %1246 = vmatpush1.bf16.msra.mxu0 %v8907_v50  ;;  %1328 = vmatpush1.bf16.msra.mxu1 %v8910_v51 }
 0x1ca   :  { %1247 = vmatprep.subr.bf16.mxu0 %v8915_v52  ;;  %1329 = vmatprep.subr.bf16.mxu1 %v8918_v53 }
 0x1cd   :  { %1248 = vmatpush1.bf16.msra.mxu0 %v8913_v55  ;;  %1330 = vmatpush1.bf16.msra.mxu1 %v8916_v56 }
 0x1ce   :  { %1249 = vmatprep.subr.bf16.mxu0 %v8921_v57  ;;  %1331 = vmatprep.subr.bf16.mxu1 %v8924_v58 }
 0x1d1   :  { %1250 = vmatpush1.bf16.msra.mxu0 %v8919_v60  ;;  %1332 = vmatpush1.bf16.msra.mxu1 %v8922_v61 }
 0x1d2   :  { %1251 = vmatprep.subr.bf16.mxu0 %v8927_v62  ;;  %1333 = vmatprep.subr.bf16.mxu1 %v8930_v63 }
 0x1d5   :  { %1252 = vmatpush1.bf16.msra.mxu0 %v8925_v0  ;;  %1334 = vmatpush1.bf16.msra.mxu1 %v8928_v3  ;;  %v8958_v0 = vld [vmem:[#allocation10 + $0x24] ss:$16 sps:$4 sm:$0xff]   ;;  %v8961_v3 = vld [vmem:[#allocation10 + $0x2c] ss:$16 sps:$4 sm:$0xff]  }
 0x1d6   :  { %1616 = vmatprep.subr.bf16.mxu1 %v10012_v1  ;;  %8577 = vmatprep.subr.bf16.mxu0 %v8932_v5  ;;  %v8959_v5 = vld [vmem:[#allocation10 + $0x28] ss:$16 sps:$4 sm:$0xff]  }
 0x1d8   :  { %1268 = vmatmul.mubr.bf16.vlgmr.msra.gmra.mrb[8].mxu0 %v567_v10  ;;  %1350 = vmatmul.mubr.bf16.vlgmr.msra.gmra.mrb[16].mxu1 %v567_v10 }
 0x1d9   :  { %1617 = vmatpush1.bf16.msra.mxu1 %v8931_v6  ;;  %8578 = vmatpush3.bf16.msra.mxu0 %v8933_v7  ;;  %v7753_v7 = vld [vmem:[#allocation18] ss:$0 sm:$0xff] }
 0x1da   :  { %1618 = vmatprep.subr.bf16.mxu1 %v10012_v1  ;;  %8579 = vmatprep.subr.bf16.mxu0 %v8935_v8 }
 0x1dd   :  { %1619 = vmatpush1.bf16.msra.mxu1 %v8934_v11  ;;  %8580 = vmatpush3.bf16.msra.mxu0 %v8936_v12  ;;  %v8964_v11 = vld [vmem:[#allocation9 + $0x24] ss:$16 sps:$4 sm:$0xff]   ;;  %v8967_v12 = vld [vmem:[#allocation9 + $0x2c] ss:$16 sps:$4 sm:$0xff]  }
 0x1de   :  { %1620 = vmatprep.subr.bf16.mxu1 %v10012_v1  ;;  %8581 = vmatprep.subr.bf16.mxu0 %v8938_v14 }
 0x1e1   :  { %1621 = vmatpush1.bf16.msra.mxu1 %v8937_v15  ;;  %8582 = vmatpush3.bf16.msra.mxu0 %v8939_v16 }
 0x1e2   :  { %1622 = vmatprep.subr.bf16.mxu1 %v10012_v1  ;;  %8583 = vmatprep.subr.bf16.mxu0 %v8941_v17  ;;  %v8962_v17 = vld [vmem:[#allocation9 + $0x20] ss:$16 sps:$4 sm:$0xff]  }
 0x1e5   :  { %1623 = vmatpush1.bf16.msra.mxu1 %v8940_v19  ;;  %8584 = vmatpush3.bf16.msra.mxu0 %v8942_v21  ;;  %v8965_v19 = vld [vmem:[#allocation9 + $0x28] ss:$16 sps:$4 sm:$0xff]  }
 0x1e6   :  { %1624 = vmatprep.subr.bf16.mxu1 %v10012_v1  ;;  %8585 = vmatprep.subr.bf16.mxu0 %v8944_v22 }
 0x1e9   :  { %1625 = vmatpush1.bf16.msra.mxu1 %v8943_v23  ;;  %8586 = vmatpush3.bf16.msra.mxu0 %v8945_v24 }
 0x1ea   :  { %1626 = vmatprep.subr.bf16.mxu1 %v10012_v1  ;;  %8587 = vmatprep.subr.bf16.mxu0 %v8947_v25  ;;  %v1905_v25 = vld [vmem:[#allocation12 + $0x10] sm:$0xff] }
 0x1ed   :  { %1627 = vmatpush1.bf16.msra.mxu1 %v8946_v26  ;;  %8588 = vmatpush3.bf16.msra.mxu0 %v8948_v28  ;;  %v7793_v26 = vcombine.high %v1905_v25, %v1905_v25  ;;  %v1906_v28 = vld [vmem:[#allocation12 + $0x18] sm:$0xff] }
 0x1ee   :  { %1628 = vmatprep.subr.bf16.mxu1 %v10012_v1  ;;  %8589 = vmatprep.subr.bf16.mxu0 %v8950_v30 }
 0x1f1   :  { %1629 = vmatpush1.bf16.msra.mxu1 %v8949_v29  ;;  %8590 = vmatpush3.bf16.msra.mxu0 %v8951_v31  ;;  %v7795_v29 = vcombine.high %v1906_v28, %v1906_v28 }
 0x1f2   :  { %1630 = vmatprep.subr.bf16.mxu1 %v10012_v1  ;;  %8591 = vmatprep.subr.bf16.mxu0 %v8953_v33 }
 0x1f5   :  { %1631 = vmatpush1.bf16.msra.mxu1 %v8952_v32  ;;  %8592 = vmatpush3.bf16.msra.mxu0 %v8954_v34 }
 0x1f6   :  { %1632 = vmatprep.subr.bf16.mxu1 %v10012_v1  ;;  %1717 = vmatprep.subr.bf16.mxu0 %v8958_v0  ;;  %v8984_v0 = vld [vmem:[#allocation15 + $0x360] ss:$16 sps:$4 sm:$0xff]  }
 0x1f9   :  { %1633 = vmatpush1.bf16.msra.mxu1 %v8955_v35 }
 0x1fa   :  { %1758 = vmatprep.subr.bf16.mxu1 %v8961_v3  ;;  %v8987_v3 = vld [vmem:[#allocation15 + $0x368] ss:$16 sps:$4 sm:$0xff]  }
 0x2ab   :  { %v1269_v41 = vpop.f32.mrb[8].mxu0  ;;  %v1351_v42 = vpop.f32.mrb[16].mxu1 }
 0x2ac   :  { %v8687_v43 = vadd.f32 %v1269_v41, %v674_v37  ;;  %v8689_v44 = vadd.f32 %v1351_v42, %v682_v38  ;;  %v1271_v45 = vpop.f32.mrb[9].mxu0  ;;  %v1353_v46 = vpop.f32.mrb[17].mxu1  ;;  %v9740_v37 = vld [vmem:[#allocation7] sm:$0x1]  ;;  %v10407_v42 = vld [vmem:[#allocation7 + $0x1] sm:$0x1] }
 0x2ad   :  { %v8688_v48 = vadd.f32 %v1271_v45, %v678_v39  ;;  %v8690_v50 = vadd.f32 %v1353_v46, %v686_v40  ;;  %v1273_v51 = vpop.f32.mrb[10].mxu0  ;;  %v1355_v52 = vpop.f32.mrb[18].mxu1  ;;  %v192_v38 = vsub.f32 1.0, %v9740_v37  ;;  %v1683_v45 = vrot.slane %v10407_v42, %v10242_v4  ;;  %v9028_v37 = vld [vmem:[#allocation15 + $0x444] ss:$16 sps:$4 sm:$0xff]  }
 0x2ae   :  { %v1358_v53 = vmax.f32 %v8687_v43, 0.0  ;;  %v1360_v55 = vmax.f32 %v8689_v44, 0.0  ;;  %v1274_v56 = vpop.f32.mrb[11].mxu0  ;;  %v1356_v57 = vpop.f32.mrb[19].mxu1  ;;  %v7794_v51 = vcombine.low %v1906_v28, %v1906_v28  ;;  %v9017_v28 = vld [vmem:[#allocation15 + $0x408] ss:$16 sps:$4 sm:$0xff]  }
 0x2af   :  { %v1359_v58 = vmax.f32 %v8688_v48, 0.0  ;;  %v1361_v59 = vmax.f32 %v8690_v50, 0.0  ;;  %v10404_v40 = vrot.slane %v192_v38, %v10242_v4  ;;  %v7792_v50 = vcombine.low %v1905_v25, %v1905_v25  ;;  %v8974_v56 = vld [vmem:[#allocation15 + $0x324] ss:$16 sps:$4 sm:$0xff]   ;;  %v8977_v57 = vld [vmem:[#allocation15 + $0x32c] ss:$16 sps:$4 sm:$0xff]  }
 0x2b0   :  { %v1362_v62 = vpack.c.bf16 %v1358_v53, %v1358_v53  ;;  %v1364_v63 = vpack.c.bf16 %v1360_v55, %v1360_v55  ;;  %v1924_v55 = vsel %vm436_vm0, %v7794_v51, 0  ;;  %v9019_v25 = vld [vmem:[#allocation15 + $0x40c] ss:$16 sps:$4 sm:$0xff]  }
 0x2b1   :  { %v1363_v60 = vpack.c.bf16 %v1359_v58, %v1359_v58  ;;  %v1365_v61 = vpack.c.bf16 %v1361_v59, %v1361_v59  ;;  %v1918_v53 = vsel %vm436_vm0, %v7792_v50, 0  ;;  %v8975_v58 = vld [vmem:[#allocation15 + $0x328] ss:$16 sps:$4 sm:$0xff]   ;;  %v8980_v59 = vld [vmem:[#allocation15 + $0x344] ss:$16 sps:$4 sm:$0xff]  }
 0x2b2   :  { %v9031_v38 = vld [vmem:[#allocation15 + $0x44c] ss:$16 sps:$4 sm:$0xff]   ;;  %v9040_v50 = vld [vmem:[#allocation15 + $0x484] ss:$16 sps:$4 sm:$0xff]  }
 0x2b3   :  { %1608 = vmatprep.mubr.bf16.mxu0 %v1363_v60  ;;  %7779 = vmatprep.mubr.msk.bf16.mxu1 %vm229_vm1, %v1365_v61  ;;  %v8983_v60 = vld [vmem:[#allocation15 + $0x34c] ss:$16 sps:$4 sm:$0xff]   ;;  %v8978_v61 = vld [vmem:[#allocation15 + $0x340] ss:$16 sps:$4 sm:$0xff]  }
 0x2b4   :  { %1609 = vmatmul.mubr.bf16.vlgmr.msra.gmra.mrb[12].mxu0 %v1362_v62  ;;  %1649 = vmatmul.mubr.bf16.vlgmr.msra.gmra.mrb[20].mxu1 %v1364_v63  ;;  %v8981_v62 = vld [vmem:[#allocation15 + $0x348] ss:$16 sps:$4 sm:$0xff]   ;;  %v8986_v63 = vld [vmem:[#allocation15 + $0x364] ss:$16 sps:$4 sm:$0xff]   ;;  %v9043_v51 = vld [vmem:[#allocation15 + $0x48c] ss:$16 sps:$4 sm:$0xff]  }
 0x2b5   :  { %1749 = vmatprep.mubr.bf16.mxu0 %v10012_v1  ;;  %1790 = vmatprep.mubr.bf16.mxu1 %v10012_v1 }
 0x2b6   :  { %1718 = vmatpush1.bf16.msra.mxu0 %v8956_v2  ;;  %1759 = vmatpush1.bf16.msra.mxu1 %v8959_v5  ;;  %v8989_v2 = vld [vmem:[#allocation15 + $0x36c] ss:$16 sps:$4 sm:$0xff]   ;;  %v8992_v5 = vld [vmem:[#allocation15 + $0x384] ss:$16 sps:$4 sm:$0xff]  }
 0x2b7   :  { %1822 = vmatprep.subr.bf16.mxu0 %v8964_v11  ;;  %1863 = vmatprep.subr.bf16.mxu1 %v8967_v12  ;;  %v8996_v11 = vld [vmem:[#allocation15 + $0x3a0] ss:$16 sps:$4 sm:$0xff]   ;;  %v8999_v12 = vld [vmem:[#allocation15 + $0x3a8] ss:$16 sps:$4 sm:$0xff]  }
 0x2bc   :  { %7784 = vmatmul.mubr.msk.bf16.vlgmr.msra.gmra.mrb[16].mxu0 %vm229_vm1, %v10244_v9  ;;  %7785 = vmatmul.mubr.msk.bf16.vlgmr.msra.gmra.mrb[24].mxu1 %vm229_vm1, %v10244_v9 }
 0x2bd   :  { %1854 = vmatprep.mubr.bf16.mxu0 %v10012_v1  ;;  %1895 = vmatprep.mubr.bf16.mxu1 %v10012_v1 }
 0x2be   :  { %1823 = vmatpush1.bf16.msra.mxu0 %v8962_v17  ;;  %1864 = vmatpush1.bf16.msra.mxu1 %v8965_v19  ;;  %v9005_v17 = vld [vmem:[#allocation15 + $0x3c8] ss:$16 sps:$4 sm:$0xff]   ;;  %v9010_v19 = vld [vmem:[#allocation15 + $0x3e4] ss:$16 sps:$4 sm:$0xff]  }
 0x2bf   :  { %7796 = vmatprep.subr.msk.bf16.mxu0 %vm436_vm0, %v7793_v26  ;;  %7798 = vmatprep.subr.msk.bf16.mxu1 %vm436_vm0, %v7795_v29  ;;  %v9014_v26 = vld [vmem:[#allocation15 + $0x400] ss:$16 sps:$4 sm:$0xff]   ;;  %v9022_v29 = vld [vmem:[#allocation15 + $0x424] ss:$16 sps:$4 sm:$0xff]  }
 0x387   :  { %v8593_v47 = vpop.f32.mrb[12].mxu0  ;;  %v1650_v6 = vpop.f32.mrb[20].mxu1 }
 0x388   :  { %v8594_v8 = vpop.f32.mrb[13].mxu0  ;;  %v1652_v10 = vpop.f32.mrb[21].mxu1 }
 0x389   :  { %v8595_v14 = vadd.f32 %v8594_v8, %v8593_v47  ;;  %v8596_v15 = vpop.f32.mrb[14].mxu0  ;;  %v1653_v16 = vpop.f32.mrb[22].mxu1  ;;  %v8995_v47 = vld [vmem:[#allocation15 + $0x38c] ss:$16 sps:$4 sm:$0xff]   ;;  %v8998_v8 = vld [vmem:[#allocation15 + $0x3a4] ss:$16 sps:$4 sm:$0xff]  }
 0x38a   :  { %v8597_v21 = vpop.f32.mrb[15].mxu0  ;;  %v1654_v22 = vpop.f32.mrb[23].mxu1  ;;  %v9001_v10 = vld [vmem:[#allocation15 + $0x3ac] ss:$16 sps:$4 sm:$0xff]   ;;  %v9002_v16 = vld [vmem:[#allocation15 + $0x3c0] ss:$16 sps:$4 sm:$0xff]  }
 0x38b   :  { %v1611_v23 = vadd.f32 %v8595_v14, %v7753_v7  ;;  %v8993_v7 = vld [vmem:[#allocation15 + $0x388] ss:$16 sps:$4 sm:$0xff]   ;;  %v9004_v14 = vld [vmem:[#allocation15 + $0x3c4] ss:$16 sps:$4 sm:$0xff]   ;;  %v9007_v15 = vld [vmem:[#allocation15 + $0x3cc] ss:$16 sps:$4 sm:$0xff]  }
 0x38c   :  { %v9013_v21 = vld [vmem:[#allocation15 + $0x3ec] ss:$16 sps:$4 sm:$0xff]   ;;  %v9008_v22 = vld [vmem:[#allocation15 + $0x3e0] ss:$16 sps:$4 sm:$0xff]  }
 0x38d   :  { %v1651_v24 = vadd.f32 %v1650_v6, %v1611_v23  ;;  %v8990_v6 = vld [vmem:[#allocation15 + $0x380] ss:$16 sps:$4 sm:$0xff]   ;;  %v9011_v23 = vld [vmem:[#allocation15 + $0x3e8] ss:$16 sps:$4 sm:$0xff]  }
 0x38f   :  { %1658 = vrot.lane.b32.xlu0 %v1651_v24, %s10013_s18  ;;  %9720 = vtanh.f32 %v1651_v24  ;;  %v10399_v33 = vpop.f32.mrb[16].mxu0  ;;  %v9016_v24 = vld [vmem:[#allocation15 + $0x404] ss:$16 sps:$4 sm:$0xff]  }
 0x390   :  { %v10401_v34 = vpop.f32.mrb[17].mxu0 }
 0x391   :  { %v1755_v35 = vpop.f32.mrb[18].mxu0 }
 0x392   :  { %v1756_v36 = vpop.f32.mrb[19].mxu0  ;;  %v9020_v35 = vld [vmem:[#allocation15 + $0x420] ss:$16 sps:$4 sm:$0xff]  }
 0x393   :  { %v9023_v36 = vld [vmem:[#allocation15 + $0x428] ss:$16 sps:$4 sm:$0xff]  }
 0x399   :  { %v10394_v30 = vpop.eup %9720 }
 0x39a   :  { %v1669_v31 = vsub.f32 0.0, %v10394_v30 }
 0x39c   :  { %v1670_v32 = vmul.f32 1.442695, %v1669_v31 }
 0x39e   :  { %9722 = vpow2.f32 %v1670_v32  ;;  %v9025_v32 = vld [vmem:[#allocation15 + $0x42c] ss:$16 sps:$4 sm:$0xff]  }
 0x3a8   :  { %v9723_v44 = vpop.eup %9722 }
 0x401   :  { %v1659_v39 = vpop.permute.xlu0 %1658 }
 0x402   :  { %v1661_v41 = vsub.f32 %v10246_v13, %v1659_v39  ;;  %v9026_v39 = vld [vmem:[#allocation15 + $0x440] ss:$16 sps:$4 sm:$0xff]  }
 0x404   :  { %v1668_v43 = vmul.f32 %v10404_v40, %v1661_v41  ;;  %v9029_v41 = vld [vmem:[#allocation15 + $0x448] ss:$16 sps:$4 sm:$0xff]  }
 0x406   :  { %v1672_v46 = vmul.f32 %v9723_v44, %v1668_v43  ;;  %v9034_v43 = vld [vmem:[#allocation15 + $0x464] ss:$16 sps:$4 sm:$0xff]   ;;  %v9037_v44 = vld [vmem:[#allocation15 + $0x46c] ss:$16 sps:$4 sm:$0xff]  }
 0x408   :  { %v10413_v48 = vadd.f32 %v1672_v46, %v10249_v18  ;;  %v8972_v18 = vld [vmem:[#allocation15 + $0x320] ss:$16 sps:$4 sm:$0xff]   ;;  %v9035_v46 = vld [vmem:[#allocation15 + $0x468] ss:$16 sps:$4 sm:$0xff]  }
 0x40a   :  { %v10416_v52 = vmul.f32 %v1683_v45, %v10413_v48  ;;  %v9032_v45 = vld [vmem:[#allocation15 + $0x460] ss:$16 sps:$4 sm:$0xff]  }
 0x40c   :  { %v1686_v13 = vpack.c.bf16 %v10416_v52, %v10416_v52 }
 0x40e   :  { %7790 = vmatmul.mubr.msk.bf16.vlgmr.msra.gmra.mrb[20].mxu0 %vm229_vm1, %v1686_v13  ;;  %7791 = vmatmul.mubr.msk.bf16.vlgmr.msra.gmra.mrb[28].mxu1 %vm229_vm1, %v1686_v13  ;;  %v9038_v13 = vld [vmem:[#allocation15 + $0x480] ss:$16 sps:$4 sm:$0xff]  }
 0x40f   :  { %1930 = vmatpush1.bf16.msra.mxu0 %v1918_v53  ;;  %1971 = vmatpush1.bf16.msra.mxu1 %v1924_v55  ;;  %v9041_v53 = vld [vmem:[#allocation15 + $0x488] ss:$16 sps:$4 sm:$0xff]   ;;  %v1792_v55 = vpop.f32.mrb[24].mxu1 }
 0x410   :  { %1961 = vmatprep.mubr.bf16.mxu0 %v10012_v1  ;;  %2002 = vmatprep.mubr.bf16.mxu1 %v10012_v1 }
 0x411   :  { %2677 = vmatprep.subr.bf16.mxu0 %v8974_v56  ;;  %2759 = vmatprep.subr.bf16.mxu1 %v8977_v57  ;;  %v1794_v56 = vpop.f32.mrb[25].mxu1 }
 0x412   :  { %v1796_v57 = vpop.f32.mrb[26].mxu1 }
 0x416   :  { %7797 = vmatmul.mubr.msk.bf16.vlgmr.msra.gmra.mrb[24].mxu0 %vm432_vm2, %v10260_v27  ;;  %7799 = vmatmul.mubr.msk.bf16.vlgmr.msra.gmra.mrb[32].mxu1 %vm432_vm2, %v10260_v27 }
 0x417   :  { %2678 = vmatpush1.bf16.msra.mxu0 %v8972_v18  ;;  %2760 = vmatpush1.bf16.msra.mxu1 %v8975_v58  ;;  %v1797_v18 = vpop.f32.mrb[27].mxu1  ;;  %v9046_v58 = vld [vmem:[#allocation15 + $0x4a4] ss:$16 sps:$4 sm:$0xff]  }
 0x418   :  { %2679 = vmatprep.subr.bf16.mxu0 %v8980_v59  ;;  %2761 = vmatprep.subr.bf16.mxu1 %v8983_v60  ;;  %v9049_v59 = vld [vmem:[#allocation15 + $0x4ac] ss:$16 sps:$4 sm:$0xff]   ;;  %v9044_v60 = vld [vmem:[#allocation15 + $0x4a0] ss:$16 sps:$4 sm:$0xff]  }
 0x41b   :  { %2680 = vmatpush1.bf16.msra.mxu0 %v8978_v61  ;;  %2762 = vmatpush1.bf16.msra.mxu1 %v8981_v62  ;;  %v9047_v61 = vld [vmem:[#allocation15 + $0x4a8] ss:$16 sps:$4 sm:$0xff]   ;;  %v9050_v62 = vld [vmem:[#allocation15 + $0x4c0] ss:$16 sps:$4 sm:$0xff]  }
 0x41c   :  { %2681 = vmatprep.subr.bf16.mxu0 %v8986_v63  ;;  %2763 = vmatprep.subr.bf16.mxu1 %v8989_v2  ;;  %v9052_v63 = vld [vmem:[#allocation15 + $0x4c4] ss:$16 sps:$4 sm:$0xff]   ;;  %v9053_v2 = vld [vmem:[#allocation15 + $0x4c8] ss:$16 sps:$4 sm:$0xff]  }
 0x41f   :  { %2682 = vmatpush1.bf16.msra.mxu0 %v8984_v0  ;;  %2764 = vmatpush1.bf16.msra.mxu1 %v8987_v3  ;;  %v9055_v0 = vld [vmem:[#allocation15 + $0x4cc] ss:$16 sps:$4 sm:$0xff]   ;;  %v9058_v3 = vld [vmem:[#allocation15 + $0x4e4] ss:$16 sps:$4 sm:$0xff]  }
 0x420   :  { %2683 = vmatprep.subr.bf16.mxu0 %v8992_v5  ;;  %2765 = vmatprep.subr.bf16.mxu1 %v8995_v47  ;;  %v9061_v5 = vld [vmem:[#allocation15 + $0x4ec] ss:$16 sps:$4 sm:$0xff]   ;;  %v9056_v47 = vld [vmem:[#allocation15 + $0x4e0] ss:$16 sps:$4 sm:$0xff]  }
 0x423   :  { %2684 = vmatpush1.bf16.msra.mxu0 %v8990_v6  ;;  %2766 = vmatpush1.bf16.msra.mxu1 %v8993_v7  ;;  %v9059_v6 = vld [vmem:[#allocation15 + $0x4e8] ss:$16 sps:$4 sm:$0xff]   ;;  %v9064_v7 = vld [vmem:[#allocation15 + $0x504] ss:$16 sps:$4 sm:$0xff]  }
 0x424   :  { %2685 = vmatprep.subr.bf16.mxu0 %v8998_v8  ;;  %2767 = vmatprep.subr.bf16.mxu1 %v9001_v10  ;;  %v9067_v8 = vld [vmem:[#allocation15 + $0x50c] ss:$16 sps:$4 sm:$0xff]   ;;  %v9062_v10 = vld [vmem:[#allocation15 + $0x500] ss:$16 sps:$4 sm:$0xff]  }
 0x427   :  { %2686 = vmatpush1.bf16.msra.mxu0 %v8996_v11  ;;  %2768 = vmatpush1.bf16.msra.mxu1 %v8999_v12  ;;  %v9065_v11 = vld [vmem:[#allocation15 + $0x508] ss:$16 sps:$4 sm:$0xff]   ;;  %v9070_v12 = vld [vmem:[#allocation15 + $0x524] ss:$16 sps:$4 sm:$0xff]  }
 0x428   :  { %2687 = vmatprep.subr.bf16.mxu0 %v9004_v14  ;;  %2769 = vmatprep.subr.bf16.mxu1 %v9007_v15  ;;  %v9073_v14 = vld [vmem:[#allocation15 + $0x52c] ss:$16 sps:$4 sm:$0xff]  }
 0x42b   :  { %2688 = vmatpush1.bf16.msra.mxu0 %v9002_v16  ;;  %2770 = vmatpush1.bf16.msra.mxu1 %v9005_v17 }
 0x42c   :  { %2689 = vmatprep.subr.bf16.mxu0 %v9010_v19  ;;  %2771 = vmatprep.subr.bf16.mxu1 %v9013_v21 }
 0x42f   :  { %2690 = vmatpush1.bf16.msra.mxu0 %v9008_v22  ;;  %2772 = vmatpush1.bf16.msra.mxu1 %v9011_v23 }
 0x430   :  { %2691 = vmatprep.subr.bf16.mxu0 %v9016_v24  ;;  %2773 = vmatprep.subr.bf16.mxu1 %v9019_v25 }
 0x433   :  { %2692 = vmatpush1.bf16.msra.mxu0 %v9014_v26  ;;  %2774 = vmatpush1.bf16.msra.mxu1 %v9017_v28 }
 0x434   :  { %2693 = vmatprep.subr.bf16.mxu0 %v9022_v29  ;;  %2775 = vmatprep.subr.bf16.mxu1 %v9025_v32  ;;  %v10432_v32 = vld [vmem:[#allocation13 + $0x4] sm:$0xf] }
 0x437   :  { %2694 = vmatpush1.bf16.msra.mxu0 %v9020_v35  ;;  %2776 = vmatpush1.bf16.msra.mxu1 %v9023_v36  ;;  %v2021_v35 = vrot.slane %v10432_v32, %v10242_v4 }
 0x438   :  { %2695 = vmatprep.subr.bf16.mxu0 %v9028_v37  ;;  %2777 = vmatprep.subr.bf16.mxu1 %v9031_v38  ;;  %v2033_v38 = vrot.slane %v10432_v32, %v10283_v20 }
 0x43b   :  { %2696 = vmatpush1.bf16.msra.mxu0 %v9026_v39  ;;  %2778 = vmatpush1.bf16.msra.mxu1 %v9029_v41 }
 0x43c   :  { %2697 = vmatprep.subr.bf16.mxu0 %v9034_v43  ;;  %2779 = vmatprep.subr.bf16.mxu1 %v9037_v44 }
 0x43f   :  { %2698 = vmatpush1.bf16.msra.mxu0 %v9032_v45  ;;  %2780 = vmatpush1.bf16.msra.mxu1 %v9035_v46 }
 0x440   :  { %2699 = vmatprep.subr.bf16.mxu0 %v9040_v50  ;;  %2781 = vmatprep.subr.bf16.mxu1 %v9043_v51 }
 0x443   :  { %2700 = vmatpush1.bf16.msra.mxu0 %v9038_v13  ;;  %2782 = vmatpush1.bf16.msra.mxu1 %v9041_v53 }
 0x444   :  { %2701 = vmatprep.subr.bf16.mxu0 %v9046_v58  ;;  %2783 = vmatprep.subr.bf16.mxu1 %v9049_v59 }
 0x447   :  { %2702 = vmatpush1.bf16.msra.mxu0 %v9044_v60  ;;  %2784 = vmatpush1.bf16.msra.mxu1 %v9047_v61  ;;  %v9068_v60 = vld [vmem:[#allocation15 + $0x520] ss:$16 sps:$4 sm:$0xff]   ;;  %v9071_v61 = vld [vmem:[#allocation15 + $0x528] ss:$16 sps:$4 sm:$0xff]  }
 0x448   :  { %2703 = vmatprep.subr.bf16.mxu0 %v9052_v63  ;;  %2785 = vmatprep.subr.bf16.mxu1 %v9055_v0  ;;  %v9076_v63 = vld [vmem:[#allocation15 + $0x544] ss:$16 sps:$4 sm:$0xff]  }
 0x44b   :  { %2704 = vmatpush1.bf16.msra.mxu0 %v9050_v62  ;;  %2786 = vmatpush1.bf16.msra.mxu1 %v9053_v2  ;;  %v9079_v2 = vld [vmem:[#allocation15 + $0x54c] ss:$16 sps:$4 sm:$0xff]  }
 0x44c   :  { %2705 = vmatprep.subr.bf16.mxu0 %v9058_v3  ;;  %2787 = vmatprep.subr.bf16.mxu1 %v9061_v5  ;;  %v9074_v3 = vld [vmem:[#allocation15 + $0x540] ss:$16 sps:$4 sm:$0xff]   ;;  %v9077_v5 = vld [vmem:[#allocation15 + $0x548] ss:$16 sps:$4 sm:$0xff]  }
 0x44f   :  { %2706 = vmatpush1.bf16.msra.mxu0 %v9056_v47  ;;  %2788 = vmatpush1.bf16.msra.mxu1 %v9059_v6  ;;  %v9082_v47 = vld [vmem:[#allocation15 + $0x564] ss:$16 sps:$4 sm:$0xff]   ;;  %v9085_v6 = vld [vmem:[#allocation15 + $0x56c] ss:$16 sps:$4 sm:$0xff]  }
 0x450   :  { %2707 = vmatprep.subr.bf16.mxu0 %v9064_v7  ;;  %2789 = vmatprep.subr.bf16.mxu1 %v9067_v8  ;;  %v9080_v7 = vld [vmem:[#allocation15 + $0x560] ss:$16 sps:$4 sm:$0xff]   ;;  %v9083_v8 = vld [vmem:[#allocation15 + $0x568] ss:$16 sps:$4 sm:$0xff]  }
 0x453   :  { %2708 = vmatpush1.bf16.msra.mxu0 %v9062_v10  ;;  %2790 = vmatpush1.bf16.msra.mxu1 %v9065_v11  ;;  %v9088_v10 = vld [vmem:[#allocation15 + $0x584] ss:$16 sps:$4 sm:$0xff]   ;;  %v9091_v11 = vld [vmem:[#allocation15 + $0x58c] ss:$16 sps:$4 sm:$0xff]  }
 0x454   :  { %2718 = vmatprep.subr.bf16.mxu0 %v9070_v12  ;;  %2800 = vmatprep.subr.bf16.mxu1 %v9073_v14  ;;  %v9086_v12 = vld [vmem:[#allocation15 + $0x580] ss:$16 sps:$4 sm:$0xff]   ;;  %v9089_v14 = vld [vmem:[#allocation15 + $0x588] ss:$16 sps:$4 sm:$0xff]  }
 0x4e1   :  { %v1856_v15 = vpop.f32.mrb[20].mxu0  ;;  %v1897_v16 = vpop.f32.mrb[28].mxu1 }
 0x4e2   :  { %v1857_v17 = vadd.f32 %v1856_v15, %v10399_v33  ;;  %v1898_v19 = vadd.f32 %v1897_v16, %v1792_v55  ;;  %v1858_v21 = vpop.f32.mrb[21].mxu0  ;;  %v1899_v22 = vpop.f32.mrb[29].mxu1  ;;  %v2025_v33 = vrot.slane %v10432_v32, %v10276_v49  ;;  %v9094_v15 = vld [vmem:[#allocation15 + $0x5a4] ss:$16 sps:$4 sm:$0xff]   ;;  %v9097_v16 = vld [vmem:[#allocation15 + $0x5ac] ss:$16 sps:$4 sm:$0xff]  }
 0x4e3   :  { %v1859_v23 = vadd.f32 %v1858_v21, %v10401_v34  ;;  %v1900_v24 = vadd.f32 %v1899_v22, %v1794_v56  ;;  %v1860_v25 = vpop.f32.mrb[22].mxu0  ;;  %v1901_v26 = vpop.f32.mrb[30].mxu1  ;;  %v9100_v21 = vld [vmem:[#allocation15 + $0x5c4] ss:$16 sps:$4 sm:$0xff]   ;;  %v9103_v22 = vld [vmem:[#allocation15 + $0x5cc] ss:$16 sps:$4 sm:$0xff]  }
 0x4e4   :  { %v1861_v28 = vpop.f32.mrb[23].mxu0  ;;  %v1902_v29 = vpop.f32.mrb[31].mxu1  ;;  %v9106_v25 = vld [vmem:[#allocation15 + $0x5e4] ss:$16 sps:$4 sm:$0xff]   ;;  %v9109_v26 = vld [vmem:[#allocation15 + $0x5ec] ss:$16 sps:$4 sm:$0xff]  }
 0x4e5   :  { %v9104_v28 = vld [vmem:[#allocation15 + $0x5e0] ss:$16 sps:$4 sm:$0xff]   ;;  %v9107_v29 = vld [vmem:[#allocation15 + $0x5e8] ss:$16 sps:$4 sm:$0xff]  }
 0x4e9   :  { %v1963_v36 = vpop.f32.mrb[24].mxu0  ;;  %v2004_v37 = vpop.f32.mrb[32].mxu1 }
 0x4ea   :  { %v2011_v39 = vadd.f32 %v1963_v36, %v1857_v17  ;;  %v10440_v34 = vadd.f32 %v2004_v37, %v1898_v19  ;;  %v1965_v41 = vpop.f32.mrb[25].mxu0  ;;  %v2006_v43 = vpop.f32.mrb[33].mxu1  ;;  %v9092_v17 = vld [vmem:[#allocation15 + $0x5a0] ss:$16 sps:$4 sm:$0xff]   ;;  %v9095_v19 = vld [vmem:[#allocation15 + $0x5a8] ss:$16 sps:$4 sm:$0xff]  }
 0x4eb   :  { %v2012_v44 = vadd.f32 %v1965_v41, %v1859_v23  ;;  %v2014_v45 = vadd.f32 %v2006_v43, %v1900_v24  ;;  %v1967_v46 = vpop.f32.mrb[26].mxu0  ;;  %v2008_v50 = vpop.f32.mrb[34].mxu1  ;;  %v9098_v23 = vld [vmem:[#allocation15 + $0x5c0] ss:$16 sps:$4 sm:$0xff]   ;;  %v9101_v24 = vld [vmem:[#allocation15 + $0x5c8] ss:$16 sps:$4 sm:$0xff]  }
 0x4ec   :  { %v2038_v51 = vadd.f32 %v2021_v35, %v2011_v39  ;;  %v1968_v13 = vpop.f32.mrb[27].mxu0  ;;  %v2009_v53 = vpop.f32.mrb[35].mxu1  ;;  %v2029_v35 = vrot.slane %v10432_v32, %v10290_v54  ;;  %v9112_v36 = vld [vmem:[#allocation15 + $0x604] ss:$16 sps:$4 sm:$0xff]   ;;  %v9115_v37 = vld [vmem:[#allocation15 + $0x60c] ss:$16 sps:$4 sm:$0xff]  }
 0x4ed   :  { %v2039_v55 = vadd.f32 %v2025_v33, %v2012_v44  ;;  %v2041_v56 = vadd.f32 %v2033_v38, %v2014_v45  ;;  %v9110_v33 = vld [vmem:[#allocation15 + $0x600] ss:$16 sps:$4 sm:$0xff]   ;;  %v9113_v38 = vld [vmem:[#allocation15 + $0x608] ss:$16 sps:$4 sm:$0xff]   ;;  %v9118_v41 = vld [vmem:[#allocation15 + $0x624] ss:$16 sps:$4 sm:$0xff]  }
 0x4ee   :  { %v2042_v57 = vmax.f32 %v2038_v51, 0.0  ;;  %v2040_v39 = vadd.f32 %v2029_v35, %v10440_v34  ;;  %v9121_v43 = vld [vmem:[#allocation15 + $0x62c] ss:$16 sps:$4 sm:$0xff]   ;;  %v9116_v44 = vld [vmem:[#allocation15 + $0x620] ss:$16 sps:$4 sm:$0xff]  }
 0x4ef   :  { %v2043_v18 = vmax.f32 %v2039_v55, 0.0  ;;  %v2045_v58 = vmax.f32 %v2041_v56, 0.0  ;;  %v9119_v45 = vld [vmem:[#allocation15 + $0x628] ss:$16 sps:$4 sm:$0xff]   ;;  %v9126_v13 = vld [vmem:[%s11005_s10 + $0x110] sm:$0xff]  }
 0x4f0   :  { %v2046_v62 = vpack.c.bf16 %v2042_v57, %v2042_v57  ;;  %v2044_v46 = vmax.f32 %v2040_v39, 0.0  ;;  %v9123_v32 = vld [vmem:[%s11005_s10 + $0x108] sm:$0xff]   ;;  %v9125_v53 = vld [vmem:[%s11005_s10 + $0x150] sm:$0xff]   ;;  %v9129_v56 = vld [vmem:[%s11005_s10 + $0x118] sm:$0xff]  }
 0x4f1   :  { %v2047_v59 = vpack.c.bf16 %v2043_v18, %v2043_v18  ;;  %v2049_v0 = vpack.c.bf16 %v2045_v58, %v2045_v58  ;;  %v9122_v34 = vld [vmem:[%s11005_s10 + $0x148] sm:$0xff]   ;;  %v9127_v55 = vld [vmem:[%s11005_s10 + $0xd0] sm:$0xff]   ;;  %v9128_v57 = vld [vmem:[%s11005_s10 + $0x158] sm:$0xff]  }
 0x4f2   :  { %v9124_v50 = vld [vmem:[%s11005_s10 + $0xc8] sm:$0xff]   ;;  %v2048_v51 = vpack.c.bf16 %v2044_v46, %v2044_v46  ;;  %v9130_v18 = vld [vmem:[%s11005_s10 + $0xd8] sm:$0xff]   ;;  %v9132_v58 = vld [vmem:[%s11005_s10 + $0x120] sm:$0xff]  }
 0x4f3   :  { %2709 = vmatprep.mubr.bf16.mxu0 %v2047_v59  ;;  %2791 = vmatprep.mubr.bf16.mxu1 %v2047_v59  ;;  %v9131_v59 = vld [vmem:[%s11005_s10 + $0x160] sm:$0xff]  }
 0x4f4   :  { %2710 = vmatmul.mubr.bf16.vlgmr.msra.gmra.mrb[28].mxu0 %v2046_v62  ;;  %2792 = vmatmul.mubr.bf16.vlgmr.msra.gmra.mrb[36].mxu1 %v2046_v62  ;;  %v9134_v62 = vld [vmem:[%s11005_s10 + $0x168] sm:$0xff]  }
 0x4f5   :  { %2719 = vmatpush1.bf16.msra.mxu0 %v9068_v60  ;;  %2801 = vmatpush1.bf16.msra.mxu1 %v9071_v61  ;;  %v9133_v60 = vld [vmem:[%s11005_s10 + $0xe0] sm:$0xff]   ;;  %v9135_v61 = vld [vmem:[%s11005_s10 + $0x128] sm:$0xff]  }
 0x4f6   :  { %7900 = vmatprep.mubr.msk.bf16.mxu0 %vm229_vm1, %v2049_v0  ;;  %7901 = vmatprep.mubr.msk.bf16.mxu1 %vm229_vm1, %v2049_v0  ;;  %v9137_v0 = vld [vmem:[%s11005_s10 + $0x170] sm:$0xff]  }
 0x4f7   :  { %2720 = vmatprep.subr.bf16.mxu0 %v9076_v63  ;;  %2802 = vmatprep.subr.bf16.mxu1 %v9079_v2  ;;  %v9136_v63 = vld [vmem:[%s11005_s10 + $0xe8] sm:$0xff]   ;;  %v9138_v2 = vld [vmem:[%s11005_s10 + $0x130] sm:$0xff]  }
 0x4f9   :  { %2721 = vmatpush1.bf16.msra.mxu0 %v9074_v3  ;;  %2803 = vmatpush1.bf16.msra.mxu1 %v9077_v5  ;;  %v9139_v3 = vld [vmem:[%s11005_s10 + $0xf0] sm:$0xff]   ;;  %v9140_v5 = vld [vmem:[%s11005_s10 + $0x178] sm:$0xff]  }
 0x4fa   :  { %2722 = vmatprep.subr.bf16.mxu0 %v9082_v47  ;;  %2804 = vmatprep.subr.bf16.mxu1 %v9085_v6  ;;  %v9141_v47 = vld [vmem:[%s11005_s10 + $0x138] sm:$0xff]  }
 0x4fb   :  { %v9142_v6 = vld [vmem:[%s11005_s10 + $0xf8] sm:$0xff]  }
 0x4fd   :  { %2723 = vmatpush1.bf16.msra.mxu0 %v9080_v7  ;;  %2805 = vmatpush1.bf16.msra.mxu1 %v9083_v8  ;;  %v9143_v7 = vld [vmem:[%s11005_s10 + $0x180] sm:$0xff]  }
 0x4fe   :  { %2724 = vmatprep.subr.bf16.mxu0 %v9088_v10  ;;  %2806 = vmatprep.subr.bf16.mxu1 %v9091_v11  ;;  %v9144_v8 = vld [vmem:[%s11005_s10 + $0x140] sm:$0xff]   ;;  %v9146_v11 = vld [vmem:[%s11005_s10 + $0x188] sm:$0xff]  }
 0x4ff   :  { %v9145_v10 = vld [vmem:[%s11005_s10 + $0x100] sm:$0xff]  }
 0x501   :  { %2725 = vmatpush1.bf16.msra.mxu0 %v9086_v12  ;;  %2807 = vmatpush1.bf16.msra.mxu1 %v9089_v14  ;;  %v2152_v12 = vld [vmem:[#allocation16 + $0x4] sm:$0xf] }
 0x502   :  { %2726 = vmatprep.subr.bf16.mxu0 %v9094_v15  ;;  %2808 = vmatprep.subr.bf16.mxu1 %v9097_v16  ;;  %v2157_v14 = vrot.slane %v2152_v12, %v10242_v4  ;;  %v2165_v15 = vrot.slane %v2152_v12, %v10290_v54  ;;  %v2161_v16 = vrot.slane %v2152_v12, %v10276_v49 }
 0x505   :  { %2727 = vmatpush1.bf16.msra.mxu0 %v9092_v17  ;;  %2809 = vmatpush1.bf16.msra.mxu1 %v9095_v19  ;;  %v2169_v17 = vrot.slane %v2152_v12, %v10283_v20 }
 0x506   :  { %2728 = vmatprep.subr.bf16.mxu0 %v9100_v21  ;;  %2810 = vmatprep.subr.bf16.mxu1 %v9103_v22 }
 0x509   :  { %2729 = vmatpush1.bf16.msra.mxu0 %v9098_v23  ;;  %2811 = vmatpush1.bf16.msra.mxu1 %v9101_v24 }
 0x50a   :  { %2730 = vmatprep.subr.bf16.mxu0 %v9106_v25  ;;  %2812 = vmatprep.subr.bf16.mxu1 %v9109_v26 }
 0x50d   :  { %2731 = vmatpush1.bf16.msra.mxu0 %v9104_v28  ;;  %2813 = vmatpush1.bf16.msra.mxu1 %v9107_v29 }
 0x50e   :  { %2732 = vmatprep.subr.bf16.mxu0 %v9112_v36  ;;  %2814 = vmatprep.subr.bf16.mxu1 %v9115_v37 }
 0x511   :  { %2733 = vmatpush1.bf16.msra.mxu0 %v9110_v33  ;;  %2815 = vmatpush1.bf16.msra.mxu1 %v9113_v38 }
 0x512   :  { %2734 = vmatprep.subr.bf16.mxu0 %v9118_v41  ;;  %2816 = vmatprep.subr.bf16.mxu1 %v9121_v43 }
 0x515   :  { %2735 = vmatpush1.bf16.msra.mxu0 %v9116_v44  ;;  %2817 = vmatpush1.bf16.msra.mxu1 %v9119_v45 }
 0x516   :  { %3101 = vmatprep.subr.bf16.mxu1 %v10012_v1  ;;  %8599 = vmatprep.subr.bf16.mxu0 %v9123_v32  ;;  %v9147_v32 = vld [vmem:[#allocation10 + $0x40] ss:$16 sps:$4 sm:$0xff]  }
 0x518   :  { %2751 = vmatmul.mubr.bf16.vlgmr.msra.gmra.mrb[28].mxu0 %v2048_v51  ;;  %2833 = vmatmul.mubr.bf16.vlgmr.msra.gmra.mrb[36].mxu1 %v2048_v51  ;;  %v9150_v51 = vld [vmem:[#allocation10 + $0x48] ss:$16 sps:$4 sm:$0xff]  }
 0x519   :  { %3102 = vmatpush1.bf16.msra.mxu1 %v9122_v34  ;;  %8600 = vmatpush3.bf16.msra.mxu0 %v9124_v50  ;;  %v9149_v34 = vld [vmem:[#allocation10 + $0x44] ss:$16 sps:$4 sm:$0xff]   ;;  %v9152_v50 = vld [vmem:[#allocation10 + $0x4c] ss:$16 sps:$4 sm:$0xff]  }
 0x51a   :  { %3103 = vmatprep.subr.bf16.mxu1 %v10012_v1  ;;  %8601 = vmatprep.subr.bf16.mxu0 %v9126_v13 }
 0x51d   :  { %3104 = vmatpush1.bf16.msra.mxu1 %v9125_v53  ;;  %8602 = vmatpush3.bf16.msra.mxu0 %v9127_v55  ;;  %v7952_v55 = vld [vmem:[#allocation18 + $0x1] ss:$0 sm:$0xff] }
 0x51e   :  { %3105 = vmatprep.subr.bf16.mxu1 %v10012_v1  ;;  %8603 = vmatprep.subr.bf16.mxu0 %v9129_v56 }
 0x521   :  { %3106 = vmatpush1.bf16.msra.mxu1 %v9128_v57  ;;  %8604 = vmatpush3.bf16.msra.mxu0 %v9130_v18  ;;  %v9155_v18 = vld [vmem:[#allocation9 + $0x44] ss:$16 sps:$4 sm:$0xff]  }
 0x522   :  { %3107 = vmatprep.subr.bf16.mxu1 %v10012_v1  ;;  %8605 = vmatprep.subr.bf16.mxu0 %v9132_v58  ;;  %v9158_v58 = vld [vmem:[#allocation9 + $0x4c] ss:$16 sps:$4 sm:$0xff]  }
 0x525   :  { %3108 = vmatpush1.bf16.msra.mxu1 %v9131_v59  ;;  %8606 = vmatpush3.bf16.msra.mxu0 %v9133_v60 }
 0x526   :  { %3109 = vmatprep.subr.bf16.mxu1 %v10012_v1  ;;  %8607 = vmatprep.subr.bf16.mxu0 %v9135_v61 }
 0x529   :  { %3110 = vmatpush1.bf16.msra.mxu1 %v9134_v62  ;;  %8608 = vmatpush3.bf16.msra.mxu0 %v9136_v63  ;;  %v9153_v62 = vld [vmem:[#allocation9 + $0x40] ss:$16 sps:$4 sm:$0xff]   ;;  %v9156_v63 = vld [vmem:[#allocation9 + $0x48] ss:$16 sps:$4 sm:$0xff]  }
 0x52a   :  { %3111 = vmatprep.subr.bf16.mxu1 %v10012_v1  ;;  %8609 = vmatprep.subr.bf16.mxu0 %v9138_v2 }
 0x52d   :  { %3112 = vmatpush1.bf16.msra.mxu1 %v9137_v0  ;;  %8610 = vmatpush3.bf16.msra.mxu0 %v9139_v3 }
 0x52e   :  { %3113 = vmatprep.subr.bf16.mxu1 %v10012_v1  ;;  %8611 = vmatprep.subr.bf16.mxu0 %v9141_v47  ;;  %v3390_v47 = vld [vmem:[#allocation12 + $0x20] sm:$0xff] }
 0x531   :  { %3114 = vmatpush1.bf16.msra.mxu1 %v9140_v5  ;;  %8612 = vmatpush3.bf16.msra.mxu0 %v9142_v6  ;;  %v7992_v6 = vcombine.high %v3390_v47, %v3390_v47 }
 0x532   :  { %3115 = vmatprep.subr.bf16.mxu1 %v10012_v1  ;;  %8613 = vmatprep.subr.bf16.mxu0 %v9144_v8 }
 0x535   :  { %3116 = vmatpush1.bf16.msra.mxu1 %v9143_v7  ;;  %8614 = vmatpush3.bf16.msra.mxu0 %v9145_v10  ;;  %v3391_v7 = vld [vmem:[#allocation12 + $0x28] sm:$0xff]  ;;  %v1678_v10 = vsub.f32 1.0, %v10407_v42 }
 0x536   :  { %3117 = vmatprep.subr.bf16.mxu1 %v10012_v1  ;;  %3202 = vmatprep.subr.bf16.mxu0 %v9149_v34  ;;  %v7994_v8 = vcombine.high %v3391_v7, %v3391_v7  ;;  %v9177_v34 = vld [vmem:[#allocation15 + $0x684] ss:$16 sps:$4 sm:$0xff]  }
 0x539   :  { %3118 = vmatpush1.bf16.msra.mxu1 %v9146_v11  ;;  %v3151_v11 = vrot.slane %v1678_v10, %v10242_v4  ;;  %v9208_v10 = vld [vmem:[#allocation15 + $0x728] ss:$16 sps:$4 sm:$0xff]  }
 0x53a   :  { %3307 = vmatprep.subr.bf16.mxu1 %v9155_v18  ;;  %v9189_v18 = vld [vmem:[#allocation15 + $0x6c4] ss:$16 sps:$4 sm:$0xff]  }
 0x5eb   :  { %v2752_v19 = vpop.f32.mrb[28].mxu0  ;;  %v2834_v21 = vpop.f32.mrb[36].mxu1 }
 0x5ec   :  { %v8691_v22 = vadd.f32 %v2752_v19, %v2157_v14  ;;  %v8693_v23 = vadd.f32 %v2834_v21, %v2165_v15  ;;  %v2754_v24 = vpop.f32.mrb[29].mxu0  ;;  %v2836_v25 = vpop.f32.mrb[37].mxu1  ;;  %v1674_v15 = vmul.f32 %v1669_v31, %v10404_v40 }
 0x5ed   :  { %v8692_v26 = vadd.f32 %v2754_v24, %v2161_v16  ;;  %v8694_v28 = vadd.f32 %v2836_v25, %v2169_v17  ;;  %v2756_v29 = vpop.f32.mrb[30].mxu0  ;;  %v2838_v35 = vpop.f32.mrb[38].mxu1 }
 0x5ee   :  { %v2841_v36 = vmax.f32 %v8691_v22, 0.0  ;;  %v2843_v37 = vmax.f32 %v8693_v23, 0.0  ;;  %v2757_v33 = vpop.f32.mrb[31].mxu0  ;;  %v2839_v38 = vpop.f32.mrb[39].mxu1  ;;  %v7991_v35 = vcombine.low %v3390_v47, %v3390_v47  ;;  %v9202_v47 = vld [vmem:[#allocation15 + $0x708] ss:$16 sps:$4 sm:$0xff]  }
 0x5ef   :  { %v2842_v39 = vmax.f32 %v8692_v26, 0.0  ;;  %v2844_v41 = vmax.f32 %v8694_v28, 0.0  ;;  %v10559_v26 = vld [vmem:[#allocation7 + $0x2] sm:$0x1] }
 0x5f0   :  { %v2845_v45 = vpack.c.bf16 %v2841_v36, %v2841_v36  ;;  %v2847_v46 = vpack.c.bf16 %v2843_v37, %v2843_v37  ;;  %v3168_v30 = vrot.slane %v10559_v26, %v10242_v4  ;;  %v7993_v36 = vcombine.low %v3391_v7, %v3391_v7  ;;  %v9210_v7 = vld [vmem:[#allocation15 + $0x72c] ss:$16 sps:$4 sm:$0xff]  }
 0x5f1   :  { %v2846_v43 = vpack.c.bf16 %v2842_v39, %v2842_v39  ;;  %v2848_v44 = vpack.c.bf16 %v2844_v41, %v2844_v41  ;;  %v9165_v39 = vld [vmem:[#allocation15 + $0x644] ss:$16 sps:$4 sm:$0xff]   ;;  %v9168_v41 = vld [vmem:[#allocation15 + $0x64c] ss:$16 sps:$4 sm:$0xff]  }
 0x5f2   :  { %v3409_v38 = vsel %vm436_vm0, %v7993_v36, 0  ;;  %v9232_v36 = vld [vmem:[#allocation15 + $0x7a8] ss:$16 sps:$4 sm:$0xff]  }
 0x5f3   :  { %3093 = vmatprep.mubr.bf16.mxu0 %v2846_v43  ;;  %7978 = vmatprep.mubr.msk.bf16.mxu1 %vm229_vm1, %v2848_v44  ;;  %v9166_v43 = vld [vmem:[#allocation15 + $0x648] ss:$16 sps:$4 sm:$0xff]   ;;  %v9171_v44 = vld [vmem:[#allocation15 + $0x664] ss:$16 sps:$4 sm:$0xff]  }
 0x5f4   :  { %3094 = vmatmul.mubr.bf16.vlgmr.msra.gmra.mrb[32].mxu0 %v2845_v45  ;;  %3134 = vmatmul.mubr.bf16.vlgmr.msra.gmra.mrb[40].mxu1 %v2847_v46  ;;  %v9174_v45 = vld [vmem:[#allocation15 + $0x66c] ss:$16 sps:$4 sm:$0xff]   ;;  %v9169_v46 = vld [vmem:[#allocation15 + $0x660] ss:$16 sps:$4 sm:$0xff]  }
 0x5f5   :  { %3234 = vmatprep.mubr.bf16.mxu0 %v10012_v1  ;;  %3339 = vmatprep.mubr.bf16.mxu1 %v10012_v1 }
 0x5f6   :  { %3203 = vmatpush1.bf16.msra.mxu0 %v9147_v32  ;;  %3308 = vmatpush1.bf16.msra.mxu1 %v9153_v62  ;;  %v9172_v32 = vld [vmem:[#allocation15 + $0x668] ss:$16 sps:$4 sm:$0xff]   ;;  %v9198_v62 = vld [vmem:[#allocation15 + $0x6ec] ss:$16 sps:$4 sm:$0xff]  }
 0x5f7   :  { %3243 = vmatprep.subr.bf16.mxu0 %v9152_v50  ;;  %7995 = vmatprep.subr.msk.bf16.mxu1 %vm436_vm0, %v7992_v6  ;;  %v9180_v50 = vld [vmem:[#allocation15 + $0x68c] ss:$16 sps:$4 sm:$0xff]   ;;  %v9207_v6 = vld [vmem:[#allocation15 + $0x724] ss:$16 sps:$4 sm:$0xff]  }
 0x5fc   :  { %7983 = vmatmul.mubr.msk.bf16.vlgmr.msra.gmra.mrb[36].mxu0 %vm229_vm1, %v10244_v9 }
 0x5fd   :  { %3275 = vmatprep.mubr.bf16.mxu0 %v10012_v1  ;;  %3244 = vmatpush1.bf16.msra.mxu0 %v9150_v51  ;;  %v9175_v51 = vld [vmem:[#allocation15 + $0x680] ss:$16 sps:$4 sm:$0xff]  }
 0x5fe   :  { %3348 = vmatprep.subr.bf16.mxu0 %v9158_v58  ;;  %v9192_v58 = vld [vmem:[#allocation15 + $0x6cc] ss:$16 sps:$4 sm:$0xff]  }
 0x604   :  { %7984 = vmatmul.mubr.msk.bf16.vlgmr.msra.gmra.mrb[40].mxu0 %vm229_vm1, %v10244_v9 }
 0x605   :  { %3380 = vmatprep.mubr.bf16.mxu0 %v10012_v1  ;;  %3349 = vmatpush1.bf16.msra.mxu0 %v9156_v63  ;;  %v9193_v63 = vld [vmem:[#allocation15 + $0x6e0] ss:$16 sps:$4 sm:$0xff]  }
 0x606   :  { %7997 = vmatprep.subr.msk.bf16.mxu0 %vm436_vm0, %v7994_v8  ;;  %v9205_v8 = vld [vmem:[#allocation15 + $0x720] ss:$16 sps:$4 sm:$0xff]  }
 0x6c7   :  { %v8615_v13 = vpop.f32.mrb[32].mxu0  ;;  %v3135_v53 = vpop.f32.mrb[40].mxu1 }
 0x6c8   :  { %v8616_v56 = vpop.f32.mrb[33].mxu0  ;;  %v3137_v57 = vpop.f32.mrb[41].mxu1 }
 0x6c9   :  { %v8617_v59 = vadd.f32 %v8616_v56, %v8615_v13  ;;  %v8618_v60 = vpop.f32.mrb[34].mxu0  ;;  %v3138_v61 = vpop.f32.mrb[42].mxu1  ;;  %v9178_v13 = vld [vmem:[#allocation15 + $0x688] ss:$16 sps:$4 sm:$0xff]   ;;  %v9181_v56 = vld [vmem:[#allocation15 + $0x6a0] ss:$16 sps:$4 sm:$0xff]  }
 0x6ca   :  { %v8619_v2 = vpop.f32.mrb[35].mxu0  ;;  %v3139_v0 = vpop.f32.mrb[43].mxu1  ;;  %v9184_v57 = vld [vmem:[#allocation15 + $0x6a8] ss:$16 sps:$4 sm:$0xff]   ;;  %v9195_v61 = vld [vmem:[#allocation15 + $0x6e4] ss:$16 sps:$4 sm:$0xff]  }
 0x6cb   :  { %v3096_v3 = vadd.f32 %v8617_v59, %v7952_v55  ;;  %v9186_v55 = vld [vmem:[#allocation15 + $0x6ac] ss:$16 sps:$4 sm:$0xff]   ;;  %v9187_v59 = vld [vmem:[#allocation15 + $0x6c0] ss:$16 sps:$4 sm:$0xff]   ;;  %v9190_v60 = vld [vmem:[#allocation15 + $0x6c8] ss:$16 sps:$4 sm:$0xff]  }
 0x6cc   :  { %v9196_v2 = vld [vmem:[#allocation15 + $0x6e8] ss:$16 sps:$4 sm:$0xff]   ;;  %v9201_v0 = vld [vmem:[#allocation15 + $0x704] ss:$16 sps:$4 sm:$0xff]  }
 0x6cd   :  { %v3136_v5 = vadd.f32 %v3135_v53, %v3096_v3  ;;  %v9183_v53 = vld [vmem:[#allocation15 + $0x6a4] ss:$16 sps:$4 sm:$0xff]   ;;  %v9204_v3 = vld [vmem:[#allocation15 + $0x70c] ss:$16 sps:$4 sm:$0xff]  }
 0x6cf   :  { %3143 = vrot.lane.b32.xlu0 %v3136_v5, %s10013_s18  ;;  %9724 = vtanh.f32 %v3136_v5  ;;  %v10554_v19 = vpop.f32.mrb[36].mxu0  ;;  %v9199_v5 = vld [vmem:[#allocation15 + $0x700] ss:$16 sps:$4 sm:$0xff]  }
 0x6d0   :  { %v10556_v21 = vpop.f32.mrb[37].mxu0 }
 0x6d1   :  { %v3240_v22 = vpop.f32.mrb[38].mxu0 }
 0x6d2   :  { %v3241_v23 = vpop.f32.mrb[39].mxu0  ;;  %v9222_v22 = vld [vmem:[#allocation15 + $0x76c] ss:$16 sps:$4 sm:$0xff]  }
 0x6d3   :  { %v9217_v23 = vld [vmem:[#allocation15 + $0x760] ss:$16 sps:$4 sm:$0xff]  }
 0x6d9   :  { %v9725_v12 = vpop.eup %9724 }
 0x6da   :  { %v3154_v14 = vsub.f32 0.0, %v9725_v12  ;;  %v9216_v12 = vld [vmem:[#allocation15 + $0x74c] ss:$16 sps:$4 sm:$0xff]  }
 0x6dc   :  { %v3159_v16 = vmul.f32 %v3154_v14, %v3151_v11  ;;  %v3155_v24 = vmul.f32 1.442695, %v3154_v14  ;;  %v9211_v14 = vld [vmem:[#allocation15 + $0x740] ss:$16 sps:$4 sm:$0xff]  }
 0x6de   :  { %v10552_v17 = vadd.f32 %v3159_v16, %v1674_v15  ;;  %9726 = vpow2.f32 %v3155_v24  ;;  %v9214_v15 = vld [vmem:[#allocation15 + $0x748] ss:$16 sps:$4 sm:$0xff]   ;;  %v9219_v16 = vld [vmem:[#allocation15 + $0x764] ss:$16 sps:$4 sm:$0xff]  }
 0x6df   :  { %v9220_v24 = vld [vmem:[#allocation15 + $0x768] ss:$16 sps:$4 sm:$0xff]  }
 0x6e8   :  { %v9727_v29 = vpop.eup %9726 }
 0x741   :  { %v3144_v42 = vpop.permute.xlu0 %3143 }
 0x742   :  { %v3146_v25 = vsub.f32 %v10413_v48, %v3144_v42  ;;  %v3403_v48 = vsel %vm436_vm0, %v7991_v35, 0  ;;  %v9225_v42 = vld [vmem:[#allocation15 + $0x784] ss:$16 sps:$4 sm:$0xff]   ;;  %v9229_v35 = vld [vmem:[#allocation15 + $0x7a0] ss:$16 sps:$4 sm:$0xff]  }
 0x744   :  { %v3153_v28 = vmul.f32 %v3151_v11, %v3146_v25  ;;  %v9213_v11 = vld [vmem:[#allocation15 + $0x744] ss:$16 sps:$4 sm:$0xff]   ;;  %v9228_v25 = vld [vmem:[#allocation15 + $0x78c] ss:$16 sps:$4 sm:$0xff]  }
 0x746   :  { %v3157_v31 = vmul.f32 %v9727_v29, %v3153_v28  ;;  %v9223_v28 = vld [vmem:[#allocation15 + $0x780] ss:$16 sps:$4 sm:$0xff]   ;;  %v9226_v29 = vld [vmem:[#allocation15 + $0x788] ss:$16 sps:$4 sm:$0xff]  }
 0x748   :  { %v10564_v40 = vadd.f32 %v3157_v31, %v10416_v52  ;;  %v9163_v52 = vld [vmem:[#allocation15 + $0x640] ss:$16 sps:$4 sm:$0xff]   ;;  %v9234_v31 = vld [vmem:[#allocation15 + $0x7ac] ss:$16 sps:$4 sm:$0xff]  }
 0x74a   :  { %v10567_v37 = vmul.f32 %v3168_v30, %v10564_v40  ;;  %v9231_v30 = vld [vmem:[#allocation15 + $0x7a4] ss:$16 sps:$4 sm:$0xff]  }
 0x74c   :  { %v3171_v33 = vpack.c.bf16 %v10567_v37, %v10567_v37 }
 0x74e   :  { %7989 = vmatmul.mubr.msk.bf16.vlgmr.msra.gmra.mrb[44].mxu1 %vm229_vm1, %v3171_v33  ;;  %7990 = vmatmul.mubr.msk.bf16.vlgmr.msra.gmra.mrb[44].mxu0 %vm229_vm1, %v3171_v33  ;;  %v3277_v33 = vpop.f32.mrb[40].mxu0 }
 0x74f   :  { %3415 = vmatpush1.bf16.msra.mxu1 %v3403_v48  ;;  %3456 = vmatpush1.bf16.msra.mxu0 %v3409_v38  ;;  %v3279_v48 = vpop.f32.mrb[41].mxu0 }
 0x750   :  { %3446 = vmatprep.mubr.bf16.mxu1 %v10012_v1  ;;  %3487 = vmatprep.mubr.bf16.mxu0 %v10012_v1  ;;  %v3281_v38 = vpop.f32.mrb[42].mxu0 }
 0x751   :  { %4162 = vmatprep.subr.bf16.mxu1 %v9165_v39  ;;  %4244 = vmatprep.subr.bf16.mxu0 %v9168_v41  ;;  %v3282_v39 = vpop.f32.mrb[43].mxu0  ;;  %v9237_v41 = vld [vmem:[#allocation15 + $0x7c4] ss:$16 sps:$4 sm:$0xff]  }
 0x756   :  { %7996 = vmatmul.mubr.msk.bf16.vlgmr.msra.gmra.mrb[48].mxu1 %vm432_vm2, %v10260_v27  ;;  %7998 = vmatmul.mubr.msk.bf16.vlgmr.msra.gmra.mrb[48].mxu0 %vm432_vm2, %v10260_v27 }
 0x757   :  { %4163 = vmatpush1.bf16.msra.mxu1 %v9163_v52  ;;  %4245 = vmatpush1.bf16.msra.mxu0 %v9166_v43  ;;  %v9240_v52 = vld [vmem:[#allocation15 + $0x7cc] ss:$16 sps:$4 sm:$0xff]   ;;  %v9235_v43 = vld [vmem:[#allocation15 + $0x7c0] ss:$16 sps:$4 sm:$0xff]  }
 0x758   :  { %4164 = vmatprep.subr.bf16.mxu1 %v9171_v44  ;;  %4246 = vmatprep.subr.bf16.mxu0 %v9174_v45  ;;  %v9238_v44 = vld [vmem:[#allocation15 + $0x7c8] ss:$16 sps:$4 sm:$0xff]   ;;  %v9241_v45 = vld [vmem:[#allocation15 + $0x7e0] ss:$16 sps:$4 sm:$0xff]  }
 0x75b   :  { %4165 = vmatpush1.bf16.msra.mxu1 %v9169_v46  ;;  %4247 = vmatpush1.bf16.msra.mxu0 %v9172_v32  ;;  %v9243_v46 = vld [vmem:[#allocation15 + $0x7e4] ss:$16 sps:$4 sm:$0xff]   ;;  %v9244_v32 = vld [vmem:[#allocation15 + $0x7e8] ss:$16 sps:$4 sm:$0xff]  }
 0x75c   :  { %4166 = vmatprep.subr.bf16.mxu1 %v9177_v34  ;;  %4248 = vmatprep.subr.bf16.mxu0 %v9180_v50  ;;  %v9246_v34 = vld [vmem:[#allocation15 + $0x7ec] ss:$16 sps:$4 sm:$0xff]   ;;  %v9249_v50 = vld [vmem:[#allocation15 + $0x804] ss:$16 sps:$4 sm:$0xff]  }
 0x75f   :  { %4167 = vmatpush1.bf16.msra.mxu1 %v9175_v51  ;;  %4249 = vmatpush1.bf16.msra.mxu0 %v9178_v13  ;;  %v9252_v51 = vld [vmem:[#allocation15 + $0x80c] ss:$16 sps:$4 sm:$0xff]   ;;  %v9247_v13 = vld [vmem:[#allocation15 + $0x800] ss:$16 sps:$4 sm:$0xff]  }
 0x760   :  { %4168 = vmatprep.subr.bf16.mxu1 %v9183_v53  ;;  %4250 = vmatprep.subr.bf16.mxu0 %v9186_v55  ;;  %v9250_v53 = vld [vmem:[#allocation15 + $0x808] ss:$16 sps:$4 sm:$0xff]   ;;  %v9255_v55 = vld [vmem:[#allocation15 + $0x824] ss:$16 sps:$4 sm:$0xff]  }
 0x763   :  { %4169 = vmatpush1.bf16.msra.mxu1 %v9181_v56  ;;  %4251 = vmatpush1.bf16.msra.mxu0 %v9184_v57  ;;  %v9258_v56 = vld [vmem:[#allocation15 + $0x82c] ss:$16 sps:$4 sm:$0xff]   ;;  %v9253_v57 = vld [vmem:[#allocation15 + $0x820] ss:$16 sps:$4 sm:$0xff]  }
 0x764   :  { %4170 = vmatprep.subr.bf16.mxu1 %v9189_v18  ;;  %4252 = vmatprep.subr.bf16.mxu0 %v9192_v58  ;;  %v9256_v18 = vld [vmem:[#allocation15 + $0x828] ss:$16 sps:$4 sm:$0xff]   ;;  %v9261_v58 = vld [vmem:[#allocation15 + $0x844] ss:$16 sps:$4 sm:$0xff]  }
 0x767   :  { %4171 = vmatpush1.bf16.msra.mxu1 %v9187_v59  ;;  %4253 = vmatpush1.bf16.msra.mxu0 %v9190_v60  ;;  %v9264_v59 = vld [vmem:[#allocation15 + $0x84c] ss:$16 sps:$4 sm:$0xff]  }
 0x768   :  { %4172 = vmatprep.subr.bf16.mxu1 %v9195_v61  ;;  %4254 = vmatprep.subr.bf16.mxu0 %v9198_v62 }
 0x76b   :  { %4173 = vmatpush1.bf16.msra.mxu1 %v9193_v63  ;;  %4255 = vmatpush1.bf16.msra.mxu0 %v9196_v2 }
 0x76c   :  { %4174 = vmatprep.subr.bf16.mxu1 %v9201_v0  ;;  %4256 = vmatprep.subr.bf16.mxu0 %v9204_v3 }
 0x76f   :  { %4175 = vmatpush1.bf16.msra.mxu1 %v9199_v5  ;;  %4257 = vmatpush1.bf16.msra.mxu0 %v9202_v47 }
 0x770   :  { %4176 = vmatprep.subr.bf16.mxu1 %v9207_v6  ;;  %4258 = vmatprep.subr.bf16.mxu0 %v9210_v7 }
 0x773   :  { %4177 = vmatpush1.bf16.msra.mxu1 %v9205_v8  ;;  %4259 = vmatpush1.bf16.msra.mxu0 %v9208_v10  ;;  %v10583_v10 = vld [vmem:[#allocation13 + $0x8] sm:$0xf] }
 0x774   :  { %4178 = vmatprep.subr.bf16.mxu1 %v9213_v11  ;;  %4260 = vmatprep.subr.bf16.mxu0 %v9216_v12  ;;  %v3506_v11 = vrot.slane %v10583_v10, %v10242_v4 }
 0x777   :  { %4179 = vmatpush1.bf16.msra.mxu1 %v9211_v14  ;;  %4261 = vmatpush1.bf16.msra.mxu0 %v9214_v15  ;;  %v3518_v15 = vrot.slane %v10583_v10, %v10283_v20 }
 0x778   :  { %4180 = vmatprep.subr.bf16.mxu1 %v9219_v16  ;;  %4262 = vmatprep.subr.bf16.mxu0 %v9222_v22 }
 0x77b   :  { %4181 = vmatpush1.bf16.msra.mxu1 %v9217_v23  ;;  %4263 = vmatpush1.bf16.msra.mxu0 %v9220_v24 }
 0x77c   :  { %4182 = vmatprep.subr.bf16.mxu1 %v9225_v42  ;;  %4264 = vmatprep.subr.bf16.mxu0 %v9228_v25 }
 0x77f   :  { %4183 = vmatpush1.bf16.msra.mxu1 %v9223_v28  ;;  %4265 = vmatpush1.bf16.msra.mxu0 %v9226_v29 }
 0x780   :  { %4184 = vmatprep.subr.bf16.mxu1 %v9231_v30  ;;  %4266 = vmatprep.subr.bf16.mxu0 %v9234_v31 }
 0x783   :  { %4185 = vmatpush1.bf16.msra.mxu1 %v9229_v35  ;;  %4267 = vmatpush1.bf16.msra.mxu0 %v9232_v36 }
 0x784   :  { %4186 = vmatprep.subr.bf16.mxu1 %v9237_v41  ;;  %4268 = vmatprep.subr.bf16.mxu0 %v9240_v52  ;;  %v9259_v41 = vld [vmem:[#allocation15 + $0x840] ss:$16 sps:$4 sm:$0xff]   ;;  %v9262_v52 = vld [vmem:[#allocation15 + $0x848] ss:$16 sps:$4 sm:$0xff]  }
 0x787   :  { %4187 = vmatpush1.bf16.msra.mxu1 %v9235_v43  ;;  %4269 = vmatpush1.bf16.msra.mxu0 %v9238_v44  ;;  %v9267_v44 = vld [vmem:[#allocation15 + $0x864] ss:$16 sps:$4 sm:$0xff]  }
 0x788   :  { %4188 = vmatprep.subr.bf16.mxu1 %v9243_v46  ;;  %4270 = vmatprep.subr.bf16.mxu0 %v9246_v34  ;;  %v9268_v34 = vld [vmem:[#allocation15 + $0x868] ss:$16 sps:$4 sm:$0xff]  }
 0x78b   :  { %4189 = vmatpush1.bf16.msra.mxu1 %v9241_v45  ;;  %4271 = vmatpush1.bf16.msra.mxu0 %v9244_v32  ;;  %v9270_v45 = vld [vmem:[#allocation15 + $0x86c] ss:$16 sps:$4 sm:$0xff]   ;;  %v9265_v32 = vld [vmem:[#allocation15 + $0x860] ss:$16 sps:$4 sm:$0xff]  }
 0x78c   :  { %4190 = vmatprep.subr.bf16.mxu1 %v9249_v50  ;;  %4272 = vmatprep.subr.bf16.mxu0 %v9252_v51  ;;  %v9273_v50 = vld [vmem:[#allocation15 + $0x884] ss:$16 sps:$4 sm:$0xff]   ;;  %v9276_v51 = vld [vmem:[#allocation15 + $0x88c] ss:$16 sps:$4 sm:$0xff]  }
 0x78f   :  { %4191 = vmatpush1.bf16.msra.mxu1 %v9247_v13  ;;  %4273 = vmatpush1.bf16.msra.mxu0 %v9250_v53  ;;  %v9271_v13 = vld [vmem:[#allocation15 + $0x880] ss:$16 sps:$4 sm:$0xff]   ;;  %v9274_v53 = vld [vmem:[#allocation15 + $0x888] ss:$16 sps:$4 sm:$0xff]  }
 0x790   :  { %4192 = vmatprep.subr.bf16.mxu1 %v9255_v55  ;;  %4274 = vmatprep.subr.bf16.mxu0 %v9258_v56  ;;  %v9279_v55 = vld [vmem:[#allocation15 + $0x8a4] ss:$16 sps:$4 sm:$0xff]   ;;  %v9282_v56 = vld [vmem:[#allocation15 + $0x8ac] ss:$16 sps:$4 sm:$0xff]  }
 0x793   :  { %4193 = vmatpush1.bf16.msra.mxu1 %v9253_v57  ;;  %4275 = vmatpush1.bf16.msra.mxu0 %v9256_v18  ;;  %v9277_v57 = vld [vmem:[#allocation15 + $0x8a0] ss:$16 sps:$4 sm:$0xff]   ;;  %v9280_v18 = vld [vmem:[#allocation15 + $0x8a8] ss:$16 sps:$4 sm:$0xff]  }
 0x794   :  { %4203 = vmatprep.subr.bf16.mxu1 %v9261_v58  ;;  %4285 = vmatprep.subr.bf16.mxu0 %v9264_v59  ;;  %v9285_v58 = vld [vmem:[#allocation15 + $0x8c4] ss:$16 sps:$4 sm:$0xff]   ;;  %v9288_v59 = vld [vmem:[#allocation15 + $0x8cc] ss:$16 sps:$4 sm:$0xff]  }
 0x821   :  { %v3341_v60 = vpop.f32.mrb[44].mxu1  ;;  %v3382_v61 = vpop.f32.mrb[44].mxu0 }
 0x822   :  { %v3342_v62 = vadd.f32 %v3341_v60, %v10554_v19  ;;  %v3383_v63 = vadd.f32 %v3382_v61, %v3277_v33  ;;  %v3343_v2 = vpop.f32.mrb[45].mxu1  ;;  %v3384_v0 = vpop.f32.mrb[45].mxu0  ;;  %v3510_v19 = vrot.slane %v10583_v10, %v10276_v49  ;;  %v9283_v60 = vld [vmem:[#allocation15 + $0x8c0] ss:$16 sps:$4 sm:$0xff]   ;;  %v9286_v61 = vld [vmem:[#allocation15 + $0x8c8] ss:$16 sps:$4 sm:$0xff]  }
 0x823   :  { %v3344_v3 = vadd.f32 %v3343_v2, %v10556_v21  ;;  %v3385_v5 = vadd.f32 %v3384_v0, %v3279_v48  ;;  %v3345_v47 = vpop.f32.mrb[46].mxu1  ;;  %v3386_v6 = vpop.f32.mrb[46].mxu0  ;;  %v9289_v2 = vld [vmem:[#allocation15 + $0x8e0] ss:$16 sps:$4 sm:$0xff]   ;;  %v9292_v0 = vld [vmem:[#allocation15 + $0x8e8] ss:$16 sps:$4 sm:$0xff]  }
 0x824   :  { %v3346_v7 = vpop.f32.mrb[47].mxu1  ;;  %v3387_v8 = vpop.f32.mrb[47].mxu0  ;;  %v9295_v47 = vld [vmem:[#allocation15 + $0x900] ss:$16 sps:$4 sm:$0xff]   ;;  %v9298_v6 = vld [vmem:[#allocation15 + $0x908] ss:$16 sps:$4 sm:$0xff]  }
 0x825   :  { %v3514_v7 = vrot.slane %v10583_v10, %v10290_v54  ;;  %v9303_v8 = vld [vmem:[#allocation15 + $0x924] ss:$16 sps:$4 sm:$0xff]  }
 0x826   :  { %v9314_v10 = vld [vmem:[%s11005_s10 + $0x1d0] sm:$0xff]  }
 0x829   :  { %v3448_v12 = vpop.f32.mrb[48].mxu1  ;;  %v3489_v14 = vpop.f32.mrb[48].mxu0 }
 0x82a   :  { %v3496_v16 = vadd.f32 %v3448_v12, %v3342_v62  ;;  %v10591_v21 = vadd.f32 %v3489_v14, %v3383_v63  ;;  %v3450_v22 = vpop.f32.mrb[49].mxu1  ;;  %v3491_v23 = vpop.f32.mrb[49].mxu0  ;;  %v9291_v62 = vld [vmem:[#allocation15 + $0x8e4] ss:$16 sps:$4 sm:$0xff]   ;;  %v9294_v63 = vld [vmem:[#allocation15 + $0x8ec] ss:$16 sps:$4 sm:$0xff]  }
 0x82b   :  { %v3497_v24 = vadd.f32 %v3450_v22, %v3344_v3  ;;  %v3499_v42 = vadd.f32 %v3491_v23, %v3385_v5  ;;  %v3452_v25 = vpop.f32.mrb[50].mxu1  ;;  %v3493_v28 = vpop.f32.mrb[50].mxu0  ;;  %v9297_v3 = vld [vmem:[#allocation15 + $0x904] ss:$16 sps:$4 sm:$0xff]   ;;  %v9300_v5 = vld [vmem:[#allocation15 + $0x90c] ss:$16 sps:$4 sm:$0xff]  }
 0x82c   :  { %v3523_v29 = vadd.f32 %v3506_v11, %v3496_v16  ;;  %v3453_v30 = vpop.f32.mrb[51].mxu1  ;;  %v3494_v31 = vpop.f32.mrb[51].mxu0  ;;  %v9306_v11 = vld [vmem:[#allocation15 + $0x92c] ss:$16 sps:$4 sm:$0xff]   ;;  %v9301_v12 = vld [vmem:[#allocation15 + $0x920] ss:$16 sps:$4 sm:$0xff]  }
 0x82d   :  { %v3524_v35 = vadd.f32 %v3510_v19, %v3497_v24  ;;  %v3526_v36 = vadd.f32 %v3518_v15, %v3499_v42  ;;  %v9304_v14 = vld [vmem:[#allocation15 + $0x928] ss:$16 sps:$4 sm:$0xff]   ;;  %v3525_v19 = vadd.f32 %v3514_v7, %v10591_v21  ;;  %v9309_v15 = vld [vmem:[#allocation15 + $0x944] ss:$16 sps:$4 sm:$0xff]   ;;  %v9312_v16 = vld [vmem:[#allocation15 + $0x94c] ss:$16 sps:$4 sm:$0xff]  }
 0x82e   :  { %v3527_v33 = vmax.f32 %v3523_v29, 0.0  ;;  %v9307_v22 = vld [vmem:[#allocation15 + $0x940] ss:$16 sps:$4 sm:$0xff]   ;;  %v9310_v23 = vld [vmem:[#allocation15 + $0x948] ss:$16 sps:$4 sm:$0xff]  }
 0x82f   :  { %v3528_v48 = vmax.f32 %v3524_v35, 0.0  ;;  %v3530_v38 = vmax.f32 %v3526_v36, 0.0  ;;  %v3529_v24 = vmax.f32 %v3525_v19, 0.0  ;;  %v9313_v21 = vld [vmem:[%s11005_s10 + $0x210] sm:$0xff]   ;;  %v9317_v28 = vld [vmem:[%s11005_s10 + $0x1d8] sm:$0xff]   ;;  %v9320_v31 = vld [vmem:[%s11005_s10 + $0x1e0] sm:$0xff]  }
 0x830   :  { %v3531_v43 = vpack.c.bf16 %v3527_v33, %v3527_v33  ;;  %v9315_v42 = vld [vmem:[%s11005_s10 + $0x190] sm:$0xff]   ;;  %v9316_v29 = vld [vmem:[%s11005_s10 + $0x218] sm:$0xff]   ;;  %v9319_v35 = vld [vmem:[%s11005_s10 + $0x220] sm:$0xff]  }
 0x831   :  { %v3532_v39 = vpack.c.bf16 %v3528_v48, %v3528_v48  ;;  %v3534_v46 = vpack.c.bf16 %v3530_v38, %v3530_v38  ;;  %v3533_v25 = vpack.c.bf16 %v3529_v24, %v3529_v24  ;;  %v9318_v30 = vld [vmem:[%s11005_s10 + $0x198] sm:$0xff]   ;;  %v9321_v36 = vld [vmem:[%s11005_s10 + $0x1a0] sm:$0xff]   ;;  %v9323_v33 = vld [vmem:[%s11005_s10 + $0x1e8] sm:$0xff]  }
 0x832   :  { %v9322_v48 = vld [vmem:[%s11005_s10 + $0x228] sm:$0xff]   ;;  %v9340_v24 = vld [vmem:[#allocation10 + $0x64] ss:$16 sps:$4 sm:$0xff]  }
 0x833   :  { %4194 = vmatprep.mubr.bf16.mxu1 %v3532_v39  ;;  %4276 = vmatprep.mubr.bf16.mxu0 %v3532_v39  ;;  %v9324_v38 = vld [vmem:[%s11005_s10 + $0x1a8] sm:$0xff]   ;;  %v9326_v39 = vld [vmem:[%s11005_s10 + $0x1f0] sm:$0xff]  }
 0x834   :  { %4195 = vmatmul.mubr.bf16.vlgmr.msra.gmra.mrb[52].mxu1 %v3531_v43  ;;  %4277 = vmatmul.mubr.bf16.vlgmr.msra.gmra.mrb[52].mxu0 %v3531_v43  ;;  %v9329_v43 = vld [vmem:[%s11005_s10 + $0x1f8] sm:$0xff]  }
 0x835   :  { %4204 = vmatpush1.bf16.msra.mxu1 %v9259_v41  ;;  %4286 = vmatpush1.bf16.msra.mxu0 %v9262_v52  ;;  %v9325_v41 = vld [vmem:[%s11005_s10 + $0x230] sm:$0xff]  }
 0x836   :  { %8099 = vmatprep.mubr.msk.bf16.mxu1 %vm229_vm1, %v3534_v46  ;;  %8100 = vmatprep.mubr.msk.bf16.mxu0 %vm229_vm1, %v3534_v46  ;;  %v9327_v52 = vld [vmem:[%s11005_s10 + $0x1b0] sm:$0xff]   ;;  %v9331_v46 = vld [vmem:[%s11005_s10 + $0x240] sm:$0xff]  }
 0x837   :  { %4205 = vmatprep.subr.bf16.mxu1 %v9267_v44  ;;  %4287 = vmatprep.subr.bf16.mxu0 %v9270_v45  ;;  %v9328_v44 = vld [vmem:[%s11005_s10 + $0x238] sm:$0xff]  }
 0x838   :  { %v9330_v45 = vld [vmem:[%s11005_s10 + $0x1b8] sm:$0xff]  }
 0x839   :  { %4206 = vmatpush1.bf16.msra.mxu1 %v9265_v32  ;;  %4288 = vmatpush1.bf16.msra.mxu0 %v9268_v34  ;;  %v9332_v32 = vld [vmem:[%s11005_s10 + $0x200] sm:$0xff]  }
 0x83a   :  { %4207 = vmatprep.subr.bf16.mxu1 %v9273_v50  ;;  %4289 = vmatprep.subr.bf16.mxu0 %v9276_v51  ;;  %v9333_v34 = vld [vmem:[%s11005_s10 + $0x1c0] sm:$0xff]   ;;  %v9334_v50 = vld [vmem:[%s11005_s10 + $0x248] sm:$0xff]  }
 0x83b   :  { %v9335_v51 = vld [vmem:[%s11005_s10 + $0x208] sm:$0xff]  }
 0x83d   :  { %4208 = vmatpush1.bf16.msra.mxu1 %v9271_v13  ;;  %4290 = vmatpush1.bf16.msra.mxu0 %v9274_v53  ;;  %v9336_v13 = vld [vmem:[%s11005_s10 + $0x1c8] sm:$0xff]   ;;  %v9337_v53 = vld [vmem:[%s11005_s10 + $0x250] sm:$0xff]  }
 0x83e   :  { %4209 = vmatprep.subr.bf16.mxu1 %v9279_v55  ;;  %4291 = vmatprep.subr.bf16.mxu0 %v9282_v56  ;;  %v3637_v55 = vld [vmem:[#allocation16 + $0x8] sm:$0xf] }
 0x83f   :  { %v3642_v56 = vrot.slane %v3637_v55, %v10242_v4 }
 0x841   :  { %4210 = vmatpush1.bf16.msra.mxu1 %v9277_v57  ;;  %4292 = vmatpush1.bf16.msra.mxu0 %v9280_v18  ;;  %v3650_v57 = vrot.slane %v3637_v55, %v10290_v54  ;;  %v3646_v18 = vrot.slane %v3637_v55, %v10276_v49 }
 0x842   :  { %4211 = vmatprep.subr.bf16.mxu1 %v9285_v58  ;;  %4293 = vmatprep.subr.bf16.mxu0 %v9288_v59  ;;  %v3654_v58 = vrot.slane %v3637_v55, %v10283_v20 }
 0x845   :  { %4212 = vmatpush1.bf16.msra.mxu1 %v9283_v60  ;;  %4294 = vmatpush1.bf16.msra.mxu0 %v9286_v61 }
 0x846   :  { %4213 = vmatprep.subr.bf16.mxu1 %v9291_v62  ;;  %4295 = vmatprep.subr.bf16.mxu0 %v9294_v63 }
 0x849   :  { %4214 = vmatpush1.bf16.msra.mxu1 %v9289_v2  ;;  %4296 = vmatpush1.bf16.msra.mxu0 %v9292_v0 }
 0x84a   :  { %4215 = vmatprep.subr.bf16.mxu1 %v9297_v3  ;;  %4297 = vmatprep.subr.bf16.mxu0 %v9300_v5 }
 0x84d   :  { %4216 = vmatpush1.bf16.msra.mxu1 %v9295_v47  ;;  %4298 = vmatpush1.bf16.msra.mxu0 %v9298_v6 }
 0x84e   :  { %4217 = vmatprep.subr.bf16.mxu1 %v9303_v8  ;;  %4299 = vmatprep.subr.bf16.mxu0 %v9306_v11 }
 0x851   :  { %4218 = vmatpush1.bf16.msra.mxu1 %v9301_v12  ;;  %4300 = vmatpush1.bf16.msra.mxu0 %v9304_v14 }
 0x852   :  { %4219 = vmatprep.subr.bf16.mxu1 %v9309_v15  ;;  %4301 = vmatprep.subr.bf16.mxu0 %v9312_v16 }
 0x855   :  { %4220 = vmatpush1.bf16.msra.mxu1 %v9307_v22  ;;  %4302 = vmatpush1.bf16.msra.mxu0 %v9310_v23  ;;  %v9338_v23 = vld [vmem:[#allocation10 + $0x60] ss:$16 sps:$4 sm:$0xff]  }
 0x856   :  { %4586 = vmatprep.subr.bf16.mxu0 %v10012_v1  ;;  %8621 = vmatprep.subr.bf16.mxu1 %v9314_v10  ;;  %v9343_v10 = vld [vmem:[#allocation10 + $0x6c] ss:$16 sps:$4 sm:$0xff]  }
 0x858   :  { %4236 = vmatmul.mubr.bf16.vlgmr.msra.gmra.mrb[52].mxu1 %v3533_v25  ;;  %4318 = vmatmul.mubr.bf16.vlgmr.msra.gmra.mrb[52].mxu0 %v3533_v25 }
 0x859   :  { %4587 = vmatpush1.bf16.msra.mxu0 %v9313_v21  ;;  %8622 = vmatpush3.bf16.msra.mxu1 %v9315_v42  ;;  %v9341_v21 = vld [vmem:[#allocation10 + $0x68] ss:$16 sps:$4 sm:$0xff]  }
 0x85a   :  { %4588 = vmatprep.subr.bf16.mxu0 %v10012_v1  ;;  %8623 = vmatprep.subr.bf16.mxu1 %v9317_v28  ;;  %v8151_v28 = vld [vmem:[#allocation18 + $0x2] ss:$0 sm:$0xff] }
 0x85d   :  { %4589 = vmatpush1.bf16.msra.mxu0 %v9316_v29  ;;  %8624 = vmatpush3.bf16.msra.mxu1 %v9318_v30 }
 0x85e   :  { %4590 = vmatprep.subr.bf16.mxu0 %v10012_v1  ;;  %8625 = vmatprep.subr.bf16.mxu1 %v9320_v31  ;;  %v9346_v31 = vld [vmem:[#allocation9 + $0x64] ss:$16 sps:$4 sm:$0xff]  }
 0x861   :  { %4591 = vmatpush1.bf16.msra.mxu0 %v9319_v35  ;;  %8626 = vmatpush3.bf16.msra.mxu1 %v9321_v36  ;;  %v9349_v35 = vld [vmem:[#allocation9 + $0x6c] ss:$16 sps:$4 sm:$0xff]  }
 0x862   :  { %4592 = vmatprep.subr.bf16.mxu0 %v10012_v1  ;;  %8627 = vmatprep.subr.bf16.mxu1 %v9323_v33 }
 0x865   :  { %4593 = vmatpush1.bf16.msra.mxu0 %v9322_v48  ;;  %8628 = vmatpush3.bf16.msra.mxu1 %v9324_v38  ;;  %v9344_v38 = vld [vmem:[#allocation9 + $0x60] ss:$16 sps:$4 sm:$0xff]  }
 0x866   :  { %4594 = vmatprep.subr.bf16.mxu0 %v10012_v1  ;;  %8629 = vmatprep.subr.bf16.mxu1 %v9326_v39  ;;  %v9347_v39 = vld [vmem:[#allocation9 + $0x68] ss:$16 sps:$4 sm:$0xff]  }
 0x869   :  { %4595 = vmatpush1.bf16.msra.mxu0 %v9325_v41  ;;  %8630 = vmatpush3.bf16.msra.mxu1 %v9327_v52 }
 0x86a   :  { %4596 = vmatprep.subr.bf16.mxu0 %v10012_v1  ;;  %8631 = vmatprep.subr.bf16.mxu1 %v9329_v43 }
 0x86d   :  { %4597 = vmatpush1.bf16.msra.mxu0 %v9328_v44  ;;  %8632 = vmatpush3.bf16.msra.mxu1 %v9330_v45  ;;  %v4875_v45 = vld [vmem:[#allocation12 + $0x30] sm:$0xff] }
 0x86e   :  { %4598 = vmatprep.subr.bf16.mxu0 %v10012_v1  ;;  %8633 = vmatprep.subr.bf16.mxu1 %v9332_v32  ;;  %v4876_v32 = vld [vmem:[#allocation12 + $0x38] sm:$0xff] }
 0x871   :  { %4599 = vmatpush1.bf16.msra.mxu0 %v9331_v46  ;;  %8634 = vmatpush3.bf16.msra.mxu1 %v9333_v34  ;;  %v8191_v46 = vcombine.high %v4875_v45, %v4875_v45  ;;  %v8193_v34 = vcombine.high %v4876_v32, %v4876_v32 }
 0x872   :  { %4600 = vmatprep.subr.bf16.mxu0 %v10012_v1  ;;  %8635 = vmatprep.subr.bf16.mxu1 %v9335_v51 }
 0x875   :  { %4601 = vmatpush1.bf16.msra.mxu0 %v9334_v50  ;;  %8636 = vmatpush3.bf16.msra.mxu1 %v9336_v13  ;;  %v3163_v50 = vsub.f32 1.0, %v10559_v26  ;;  %v10708_v26 = vld [vmem:[#allocation7 + $0x3] sm:$0x1] }
 0x876   :  { %4602 = vmatprep.subr.bf16.mxu0 %v10012_v1  ;;  %4687 = vmatprep.subr.bf16.mxu1 %v9340_v24  ;;  %v9371_v24 = vld [vmem:[#allocation15 + $0x9ac] ss:$16 sps:$4 sm:$0xff]  }
 0x877   :  { %v4636_v51 = vrot.slane %v3163_v50, %v10242_v4  ;;  %v9404_v50 = vld [vmem:[#allocation15 + $0xa64] ss:$16 sps:$4 sm:$0xff]  }
 0x879   :  { %4603 = vmatpush1.bf16.msra.mxu0 %v9337_v53 }
 0x87a   :  { %4792 = vmatprep.subr.bf16.mxu0 %v9346_v31  ;;  %v9383_v31 = vld [vmem:[#allocation15 + $0x9ec] ss:$16 sps:$4 sm:$0xff]  }
 0x92b   :  { %v4237_v59 = vpop.f32.mrb[52].mxu1  ;;  %v4319_v60 = vpop.f32.mrb[52].mxu0 }
 0x92c   :  { %v8695_v61 = vadd.f32 %v4237_v59, %v3642_v56  ;;  %v8697_v62 = vadd.f32 %v4319_v60, %v3650_v57  ;;  %v4239_v63 = vpop.f32.mrb[53].mxu1  ;;  %v4321_v2 = vpop.f32.mrb[53].mxu0 }
 0x92d   :  { %v8696_v0 = vadd.f32 %v4239_v63, %v3646_v18  ;;  %v8698_v3 = vadd.f32 %v4321_v2, %v3654_v58  ;;  %v4241_v5 = vpop.f32.mrb[54].mxu1  ;;  %v4323_v47 = vpop.f32.mrb[54].mxu0 }
 0x92e   :  { %v4326_v6 = vmax.f32 %v8695_v61, 0.0  ;;  %v4328_v7 = vmax.f32 %v8697_v62, 0.0  ;;  %v4242_v8 = vpop.f32.mrb[55].mxu1  ;;  %v4324_v11 = vpop.f32.mrb[55].mxu0  ;;  %v8190_v5 = vcombine.low %v4875_v45, %v4875_v45  ;;  %v8192_v47 = vcombine.low %v4876_v32, %v4876_v32  ;;  %v9398_v45 = vld [vmem:[#allocation15 + $0xa44] ss:$16 sps:$4 sm:$0xff]  }
 0x92f   :  { %v4327_v12 = vmax.f32 %v8696_v0, 0.0  ;;  %v4329_v14 = vmax.f32 %v8698_v3, 0.0  ;;  %v4653_v0 = vrot.slane %v10708_v26, %v10242_v4  ;;  %v9356_v11 = vld [vmem:[#allocation15 + $0x964] ss:$16 sps:$4 sm:$0xff]   ;;  %v9396_v32 = vld [vmem:[#allocation15 + $0xa40] ss:$16 sps:$4 sm:$0xff]  }
 0x930   :  { %v4330_v16 = vpack.c.bf16 %v4326_v6, %v4326_v6  ;;  %v4332_v22 = vpack.c.bf16 %v4328_v7, %v4328_v7  ;;  %v4894_v8 = vsel %vm436_vm0, %v8192_v47, 0  ;;  %v9423_v47 = vld [vmem:[#allocation15 + $0xac8] ss:$16 sps:$4 sm:$0xff]  }
 0x931   :  { %v4331_v19 = vpack.c.bf16 %v4327_v12, %v4327_v12  ;;  %v4333_v15 = vpack.c.bf16 %v4329_v14, %v4329_v14  ;;  %v9359_v12 = vld [vmem:[#allocation15 + $0x96c] ss:$16 sps:$4 sm:$0xff]   ;;  %v9357_v14 = vld [vmem:[#allocation15 + $0x968] ss:$16 sps:$4 sm:$0xff]  }
 0x933   :  { %4578 = vmatprep.mubr.bf16.mxu1 %v4331_v19  ;;  %8177 = vmatprep.mubr.msk.bf16.mxu0 %vm229_vm1, %v4333_v15  ;;  %v9362_v19 = vld [vmem:[#allocation15 + $0x984] ss:$16 sps:$4 sm:$0xff]   ;;  %v9365_v15 = vld [vmem:[#allocation15 + $0x98c] ss:$16 sps:$4 sm:$0xff]  }
 0x934   :  { %4579 = vmatmul.mubr.bf16.vlgmr.msra.gmra.mrb[56].mxu1 %v4330_v16  ;;  %4619 = vmatmul.mubr.bf16.vlgmr.msra.gmra.mrb[56].mxu0 %v4332_v22  ;;  %v9360_v16 = vld [vmem:[#allocation15 + $0x980] ss:$16 sps:$4 sm:$0xff]   ;;  %v9363_v22 = vld [vmem:[#allocation15 + $0x988] ss:$16 sps:$4 sm:$0xff]  }
 0x935   :  { %4719 = vmatprep.mubr.bf16.mxu1 %v10012_v1  ;;  %4824 = vmatprep.mubr.bf16.mxu0 %v10012_v1 }
 0x936   :  { %4688 = vmatpush1.bf16.msra.mxu1 %v9338_v23  ;;  %4793 = vmatpush1.bf16.msra.mxu0 %v9344_v38  ;;  %v9368_v23 = vld [vmem:[#allocation15 + $0x9a4] ss:$16 sps:$4 sm:$0xff]   ;;  %v9384_v38 = vld [vmem:[#allocation15 + $0xa00] ss:$16 sps:$4 sm:$0xff]  }
 0x937   :  { %4728 = vmatprep.subr.bf16.mxu1 %v9343_v10  ;;  %8194 = vmatprep.subr.msk.bf16.mxu0 %vm436_vm0, %v8191_v46  ;;  %v9366_v10 = vld [vmem:[#allocation15 + $0x9a0] ss:$16 sps:$4 sm:$0xff]   ;;  %v9401_v46 = vld [vmem:[#allocation15 + $0xa4c] ss:$16 sps:$4 sm:$0xff]  }
 0x93c   :  { %8182 = vmatmul.mubr.msk.bf16.vlgmr.msra.gmra.mrb[60].mxu1 %vm229_vm1, %v10244_v9 }
 0x93d   :  { %4760 = vmatprep.mubr.bf16.mxu1 %v10012_v1  ;;  %4729 = vmatpush1.bf16.msra.mxu1 %v9341_v21  ;;  %v9369_v21 = vld [vmem:[#allocation15 + $0x9a8] ss:$16 sps:$4 sm:$0xff]  }
 0x93e   :  { %4833 = vmatprep.subr.bf16.mxu1 %v9349_v35  ;;  %v9378_v35 = vld [vmem:[#allocation15 + $0x9e0] ss:$16 sps:$4 sm:$0xff]  }
 0x944   :  { %8183 = vmatmul.mubr.msk.bf16.vlgmr.msra.gmra.mrb[64].mxu1 %vm229_vm1, %v10244_v9 }
 0x945   :  { %4865 = vmatprep.mubr.bf16.mxu1 %v10012_v1  ;;  %4834 = vmatpush1.bf16.msra.mxu1 %v9347_v39  ;;  %v9387_v39 = vld [vmem:[#allocation15 + $0xa08] ss:$16 sps:$4 sm:$0xff]  }
 0x946   :  { %8196 = vmatprep.subr.msk.bf16.mxu1 %vm436_vm0, %v8193_v34  ;;  %v9399_v34 = vld [vmem:[#allocation15 + $0xa48] ss:$16 sps:$4 sm:$0xff]  }
 0xa07   :  { %v8637_v42 = vpop.f32.mrb[56].mxu1  ;;  %v4620_v25 = vpop.f32.mrb[56].mxu0 }
 0xa08   :  { %v8638_v29 = vpop.f32.mrb[57].mxu1  ;;  %v4622_v30 = vpop.f32.mrb[57].mxu0 }
 0xa09   :  { %v8639_v36 = vadd.f32 %v8638_v29, %v8637_v42  ;;  %v8640_v33 = vpop.f32.mrb[58].mxu1  ;;  %v4623_v48 = vpop.f32.mrb[58].mxu0  ;;  %v9374_v42 = vld [vmem:[#allocation15 + $0x9c4] ss:$16 sps:$4 sm:$0xff]   ;;  %v9375_v29 = vld [vmem:[#allocation15 + $0x9c8] ss:$16 sps:$4 sm:$0xff]  }
 0xa0a   :  { %v8641_v41 = vpop.f32.mrb[59].mxu1  ;;  %v4624_v52 = vpop.f32.mrb[59].mxu0  ;;  %v9380_v30 = vld [vmem:[#allocation15 + $0x9e4] ss:$16 sps:$4 sm:$0xff]   ;;  %v9389_v48 = vld [vmem:[#allocation15 + $0xa0c] ss:$16 sps:$4 sm:$0xff]  }
 0xa0b   :  { %v4581_v43 = vadd.f32 %v8639_v36, %v8151_v28  ;;  %v9372_v28 = vld [vmem:[#allocation15 + $0x9c0] ss:$16 sps:$4 sm:$0xff]   ;;  %v9381_v36 = vld [vmem:[#allocation15 + $0x9e8] ss:$16 sps:$4 sm:$0xff]   ;;  %v9386_v33 = vld [vmem:[#allocation15 + $0xa04] ss:$16 sps:$4 sm:$0xff]  }
 0xa0c   :  { %v9392_v41 = vld [vmem:[#allocation15 + $0xa24] ss:$16 sps:$4 sm:$0xff]   ;;  %v9395_v52 = vld [vmem:[#allocation15 + $0xa2c] ss:$16 sps:$4 sm:$0xff]  }
 0xa0d   :  { %v4621_v44 = vadd.f32 %v4620_v25, %v4581_v43  ;;  %v9377_v25 = vld [vmem:[#allocation15 + $0x9cc] ss:$16 sps:$4 sm:$0xff]   ;;  %v9390_v43 = vld [vmem:[#allocation15 + $0xa20] ss:$16 sps:$4 sm:$0xff]  }
 0xa0f   :  { %4628 = vrot.lane.b32.xlu1 %v4621_v44, %s10013_s18  ;;  %9728 = vtanh.f32 %v4621_v44  ;;  %v10703_v18 = vpop.f32.mrb[60].mxu1  ;;  %v9393_v44 = vld [vmem:[#allocation15 + $0xa28] ss:$16 sps:$4 sm:$0xff]  }
 0xa10   :  { %v10705_v58 = vpop.f32.mrb[61].mxu1 }
 0xa11   :  { %v4725_v59 = vpop.f32.mrb[62].mxu1 }
 0xa12   :  { %v4726_v60 = vpop.f32.mrb[63].mxu1  ;;  %v9408_v59 = vld [vmem:[#allocation15 + $0xa80] ss:$16 sps:$4 sm:$0xff]  }
 0xa13   :  { %v9411_v60 = vld [vmem:[#allocation15 + $0xa88] ss:$16 sps:$4 sm:$0xff]  }
 0xa19   :  { %v9729_v13 = vpop.eup %9728 }
 0xa1a   :  { %v4639_v53 = vsub.f32 0.0, %v9729_v13  ;;  %v9402_v13 = vld [vmem:[#allocation15 + $0xa60] ss:$16 sps:$4 sm:$0xff]  }
 0xa1c   :  { %v4644_v55 = vmul.f32 %v4639_v53, %v4636_v51  ;;  %v4640_v57 = vmul.f32 1.442695, %v4639_v53  ;;  %v9405_v53 = vld [vmem:[#allocation15 + $0xa68] ss:$16 sps:$4 sm:$0xff]  }
 0xa1e   :  { %v10701_v56 = vadd.f32 %v4644_v55, %v10552_v17  ;;  %9730 = vpow2.f32 %v4640_v57  ;;  %v9410_v55 = vld [vmem:[#allocation15 + $0xa84] ss:$16 sps:$4 sm:$0xff]   ;;  %v9413_v57 = vld [vmem:[#allocation15 + $0xa8c] ss:$16 sps:$4 sm:$0xff]  }
 0xa28   :  { %v9731_v2 = vpop.eup %9730 }
 0xa81   :  { %v4629_v61 = vpop.permute.xlu1 %4628 }
 0xa82   :  { %v4631_v62 = vsub.f32 %v10564_v40, %v4629_v61  ;;  %v4888_v40 = vsel %vm436_vm0, %v8190_v5, 0  ;;  %v9416_v61 = vld [vmem:[#allocation15 + $0xaa4] ss:$16 sps:$4 sm:$0xff]   ;;  %v9420_v5 = vld [vmem:[#allocation15 + $0xac0] ss:$16 sps:$4 sm:$0xff]  }
 0xa84   :  { %v4638_v63 = vmul.f32 %v4636_v51, %v4631_v62  ;;  %v9407_v51 = vld [vmem:[#allocation15 + $0xa6c] ss:$16 sps:$4 sm:$0xff]  }
 0xa85   :  { %v9419_v62 = vld [vmem:[#allocation15 + $0xaac] ss:$16 sps:$4 sm:$0xff]  }
 0xa86   :  { %v4642_v17 = vmul.f32 %v9731_v2, %v4638_v63  ;;  %v9414_v63 = vld [vmem:[#allocation15 + $0xaa0] ss:$16 sps:$4 sm:$0xff]   ;;  %v9417_v2 = vld [vmem:[#allocation15 + $0xaa8] ss:$16 sps:$4 sm:$0xff]  }
 0xa88   :  { %v10713_v3 = vadd.f32 %v4642_v17, %v10567_v37  ;;  %v9354_v37 = vld [vmem:[#allocation15 + $0x960] ss:$16 sps:$4 sm:$0xff]   ;;  %v9425_v17 = vld [vmem:[#allocation15 + $0xacc] ss:$16 sps:$4 sm:$0xff]  }
 0xa8a   :  { %v10716_v6 = vmul.f32 %v4653_v0, %v10713_v3  ;;  %v9422_v0 = vld [vmem:[#allocation15 + $0xac4] ss:$16 sps:$4 sm:$0xff]  }
 0xa8c   :  { %v4656_v7 = vpack.c.bf16 %v10716_v6, %v10716_v6 }
 0xa8e   :  { %8188 = vmatmul.mubr.msk.bf16.vlgmr.msra.gmra.mrb[60].mxu0 %vm229_vm1, %v4656_v7  ;;  %8189 = vmatmul.mubr.msk.bf16.vlgmr.msra.gmra.mrb[68].mxu1 %vm229_vm1, %v4656_v7  ;;  %v4762_v7 = vpop.f32.mrb[64].mxu1 }
 0xa8f   :  { %4900 = vmatpush1.bf16.msra.mxu0 %v4888_v40  ;;  %4941 = vmatpush1.bf16.msra.mxu1 %v4894_v8  ;;  %v4764_v40 = vpop.f32.mrb[65].mxu1 }
 0xa90   :  { %4931 = vmatprep.mubr.bf16.mxu0 %v10012_v1  ;;  %4972 = vmatprep.mubr.bf16.mxu1 %v10012_v1  ;;  %v4766_v8 = vpop.f32.mrb[66].mxu1 }
 0xa91   :  { %5647 = vmatprep.subr.bf16.mxu0 %v9356_v11  ;;  %5729 = vmatprep.subr.bf16.mxu1 %v9359_v12  ;;  %v4767_v11 = vpop.f32.mrb[67].mxu1  ;;  %v9428_v12 = vld [vmem:[#allocation15 + $0xae4] ss:$16 sps:$4 sm:$0xff]  }
 0xa96   :  { %8195 = vmatmul.mubr.msk.bf16.vlgmr.msra.gmra.mrb[64].mxu0 %vm432_vm2, %v10260_v27  ;;  %8197 = vmatmul.mubr.msk.bf16.vlgmr.msra.gmra.mrb[72].mxu1 %vm432_vm2, %v10260_v27 }
 0xa97   :  { %5648 = vmatpush1.bf16.msra.mxu0 %v9354_v37  ;;  %5730 = vmatpush1.bf16.msra.mxu1 %v9357_v14  ;;  %v9431_v37 = vld [vmem:[#allocation15 + $0xaec] ss:$16 sps:$4 sm:$0xff]   ;;  %v9426_v14 = vld [vmem:[#allocation15 + $0xae0] ss:$16 sps:$4 sm:$0xff]  }
 0xa98   :  { %5649 = vmatprep.subr.bf16.mxu0 %v9362_v19  ;;  %5731 = vmatprep.subr.bf16.mxu1 %v9365_v15  ;;  %v9429_v19 = vld [vmem:[#allocation15 + $0xae8] ss:$16 sps:$4 sm:$0xff]   ;;  %v9432_v15 = vld [vmem:[#allocation15 + $0xb00] ss:$16 sps:$4 sm:$0xff]  }
 0xa9b   :  { %5650 = vmatpush1.bf16.msra.mxu0 %v9360_v16  ;;  %5732 = vmatpush1.bf16.msra.mxu1 %v9363_v22  ;;  %v9434_v16 = vld [vmem:[#allocation15 + $0xb04] ss:$16 sps:$4 sm:$0xff]   ;;  %v9435_v22 = vld [vmem:[#allocation15 + $0xb08] ss:$16 sps:$4 sm:$0xff]  }
 0xa9c   :  { %5651 = vmatprep.subr.bf16.mxu0 %v9368_v23  ;;  %5733 = vmatprep.subr.bf16.mxu1 %v9371_v24  ;;  %v9437_v23 = vld [vmem:[#allocation15 + $0xb0c] ss:$16 sps:$4 sm:$0xff]   ;;  %v9440_v24 = vld [vmem:[#allocation15 + $0xb24] ss:$16 sps:$4 sm:$0xff]  }
 0xa9f   :  { %5652 = vmatpush1.bf16.msra.mxu0 %v9366_v10  ;;  %5734 = vmatpush1.bf16.msra.mxu1 %v9369_v21  ;;  %v9443_v10 = vld [vmem:[#allocation15 + $0xb2c] ss:$16 sps:$4 sm:$0xff]   ;;  %v9438_v21 = vld [vmem:[#allocation15 + $0xb20] ss:$16 sps:$4 sm:$0xff]  }
 0xaa0   :  { %5653 = vmatprep.subr.bf16.mxu0 %v9374_v42  ;;  %5735 = vmatprep.subr.bf16.mxu1 %v9377_v25  ;;  %v9441_v42 = vld [vmem:[#allocation15 + $0xb28] ss:$16 sps:$4 sm:$0xff]   ;;  %v9446_v25 = vld [vmem:[#allocation15 + $0xb44] ss:$16 sps:$4 sm:$0xff]  }
 0xaa3   :  { %5654 = vmatpush1.bf16.msra.mxu0 %v9372_v28  ;;  %5736 = vmatpush1.bf16.msra.mxu1 %v9375_v29  ;;  %v9449_v28 = vld [vmem:[#allocation15 + $0xb4c] ss:$16 sps:$4 sm:$0xff]   ;;  %v9444_v29 = vld [vmem:[#allocation15 + $0xb40] ss:$16 sps:$4 sm:$0xff]  }
 0xaa4   :  { %5655 = vmatprep.subr.bf16.mxu0 %v9380_v30  ;;  %5737 = vmatprep.subr.bf16.mxu1 %v9383_v31  ;;  %v9447_v30 = vld [vmem:[#allocation15 + $0xb48] ss:$16 sps:$4 sm:$0xff]   ;;  %v9452_v31 = vld [vmem:[#allocation15 + $0xb64] ss:$16 sps:$4 sm:$0xff]  }
 0xaa7   :  { %5656 = vmatpush1.bf16.msra.mxu0 %v9378_v35  ;;  %5738 = vmatpush1.bf16.msra.mxu1 %v9381_v36  ;;  %v9455_v35 = vld [vmem:[#allocation15 + $0xb6c] ss:$16 sps:$4 sm:$0xff]  }
 0xaa8   :  { %5657 = vmatprep.subr.bf16.mxu0 %v9386_v33  ;;  %5739 = vmatprep.subr.bf16.mxu1 %v9389_v48 }
 0xaab   :  { %5658 = vmatpush1.bf16.msra.mxu0 %v9384_v38  ;;  %5740 = vmatpush1.bf16.msra.mxu1 %v9387_v39 }
 0xaac   :  { %5659 = vmatprep.subr.bf16.mxu0 %v9392_v41  ;;  %5741 = vmatprep.subr.bf16.mxu1 %v9395_v52 }
 0xaaf   :  { %5660 = vmatpush1.bf16.msra.mxu0 %v9390_v43  ;;  %5742 = vmatpush1.bf16.msra.mxu1 %v9393_v44 }
 0xab0   :  { %5661 = vmatprep.subr.bf16.mxu0 %v9398_v45  ;;  %5743 = vmatprep.subr.bf16.mxu1 %v9401_v46 }
 0xab3   :  { %5662 = vmatpush1.bf16.msra.mxu0 %v9396_v32  ;;  %5744 = vmatpush1.bf16.msra.mxu1 %v9399_v34  ;;  %v10732_v34 = vld [vmem:[#allocation13 + $0xc] sm:$0xf] }
 0xab4   :  { %5663 = vmatprep.subr.bf16.mxu0 %v9404_v50  ;;  %5745 = vmatprep.subr.bf16.mxu1 %v9407_v51  ;;  %v4991_v50 = vrot.slane %v10732_v34, %v10242_v4 }
 0xab7   :  { %5664 = vmatpush1.bf16.msra.mxu0 %v9402_v13  ;;  %5746 = vmatpush1.bf16.msra.mxu1 %v9405_v53  ;;  %v5003_v53 = vrot.slane %v10732_v34, %v10283_v20 }
 0xab8   :  { %5665 = vmatprep.subr.bf16.mxu0 %v9410_v55  ;;  %5747 = vmatprep.subr.bf16.mxu1 %v9413_v57 }
 0xabb   :  { %5666 = vmatpush1.bf16.msra.mxu0 %v9408_v59  ;;  %5748 = vmatpush1.bf16.msra.mxu1 %v9411_v60 }
 0xabc   :  { %5667 = vmatprep.subr.bf16.mxu0 %v9416_v61  ;;  %5749 = vmatprep.subr.bf16.mxu1 %v9419_v62 }
 0xabf   :  { %5668 = vmatpush1.bf16.msra.mxu0 %v9414_v63  ;;  %5750 = vmatpush1.bf16.msra.mxu1 %v9417_v2 }
 0xac0   :  { %5669 = vmatprep.subr.bf16.mxu0 %v9422_v0  ;;  %5751 = vmatprep.subr.bf16.mxu1 %v9425_v17 }
 0xac3   :  { %5670 = vmatpush1.bf16.msra.mxu0 %v9420_v5  ;;  %5752 = vmatpush1.bf16.msra.mxu1 %v9423_v47 }
 0xac4   :  { %5671 = vmatprep.subr.bf16.mxu0 %v9428_v12  ;;  %5753 = vmatprep.subr.bf16.mxu1 %v9431_v37  ;;  %v9450_v12 = vld [vmem:[#allocation15 + $0xb60] ss:$16 sps:$4 sm:$0xff]   ;;  %v9453_v37 = vld [vmem:[#allocation15 + $0xb68] ss:$16 sps:$4 sm:$0xff]  }
 0xac7   :  { %5672 = vmatpush1.bf16.msra.mxu0 %v9426_v14  ;;  %5754 = vmatpush1.bf16.msra.mxu1 %v9429_v19  ;;  %v9458_v19 = vld [vmem:[#allocation15 + $0xb84] ss:$16 sps:$4 sm:$0xff]  }
 0xac8   :  { %5673 = vmatprep.subr.bf16.mxu0 %v9434_v16  ;;  %5755 = vmatprep.subr.bf16.mxu1 %v9437_v23  ;;  %v9459_v23 = vld [vmem:[#allocation15 + $0xb88] ss:$16 sps:$4 sm:$0xff]  }
 0xacb   :  { %5674 = vmatpush1.bf16.msra.mxu0 %v9432_v15  ;;  %5756 = vmatpush1.bf16.msra.mxu1 %v9435_v22  ;;  %v9461_v15 = vld [vmem:[#allocation15 + $0xb8c] ss:$16 sps:$4 sm:$0xff]   ;;  %v9456_v22 = vld [vmem:[#allocation15 + $0xb80] ss:$16 sps:$4 sm:$0xff]  }
 0xacc   :  { %5675 = vmatprep.subr.bf16.mxu0 %v9440_v24  ;;  %5757 = vmatprep.subr.bf16.mxu1 %v9443_v10  ;;  %v9464_v24 = vld [vmem:[#allocation15 + $0xba4] ss:$16 sps:$4 sm:$0xff]   ;;  %v9467_v10 = vld [vmem:[#allocation15 + $0xbac] ss:$16 sps:$4 sm:$0xff]  }
 0xacf   :  { %5676 = vmatpush1.bf16.msra.mxu0 %v9438_v21  ;;  %5758 = vmatpush1.bf16.msra.mxu1 %v9441_v42  ;;  %v9462_v21 = vld [vmem:[#allocation15 + $0xba0] ss:$16 sps:$4 sm:$0xff]   ;;  %v9465_v42 = vld [vmem:[#allocation15 + $0xba8] ss:$16 sps:$4 sm:$0xff]  }
 0xad0   :  { %5677 = vmatprep.subr.bf16.mxu0 %v9446_v25  ;;  %5759 = vmatprep.subr.bf16.mxu1 %v9449_v28  ;;  %v9470_v25 = vld [vmem:[#allocation15 + $0xbc4] ss:$16 sps:$4 sm:$0xff]   ;;  %v9473_v28 = vld [vmem:[#allocation15 + $0xbcc] ss:$16 sps:$4 sm:$0xff]  }
 0xad3   :  { %5678 = vmatpush1.bf16.msra.mxu0 %v9444_v29  ;;  %5760 = vmatpush1.bf16.msra.mxu1 %v9447_v30  ;;  %v9468_v29 = vld [vmem:[#allocation15 + $0xbc0] ss:$16 sps:$4 sm:$0xff]   ;;  %v9471_v30 = vld [vmem:[#allocation15 + $0xbc8] ss:$16 sps:$4 sm:$0xff]  }
 0xad4   :  { %5688 = vmatprep.subr.bf16.mxu0 %v9452_v31  ;;  %5770 = vmatprep.subr.bf16.mxu1 %v9455_v35  ;;  %v9476_v31 = vld [vmem:[#allocation15 + $0xbe4] ss:$16 sps:$4 sm:$0xff]   ;;  %v9479_v35 = vld [vmem:[#allocation15 + $0xbec] ss:$16 sps:$4 sm:$0xff]  }
 0xb61   :  { %v4826_v36 = vpop.f32.mrb[60].mxu0  ;;  %v4867_v33 = vpop.f32.mrb[68].mxu1 }
 0xb62   :  { %v4827_v48 = vadd.f32 %v4826_v36, %v10703_v18  ;;  %v4868_v38 = vadd.f32 %v4867_v33, %v4762_v7  ;;  %v4828_v39 = vpop.f32.mrb[61].mxu0  ;;  %v4869_v41 = vpop.f32.mrb[69].mxu1  ;;  %v4995_v18 = vrot.slane %v10732_v34, %v10276_v49  ;;  %v9474_v36 = vld [vmem:[#allocation15 + $0xbe0] ss:$16 sps:$4 sm:$0xff]   ;;  %v9477_v33 = vld [vmem:[#allocation15 + $0xbe8] ss:$16 sps:$4 sm:$0xff]  }
 0xb63   :  { %v4829_v52 = vadd.f32 %v4828_v39, %v10705_v58  ;;  %v4870_v43 = vadd.f32 %v4869_v41, %v4764_v40  ;;  %v4830_v44 = vpop.f32.mrb[62].mxu0  ;;  %v4871_v45 = vpop.f32.mrb[70].mxu1  ;;  %v9480_v39 = vld [vmem:[#allocation15 + $0xc00] ss:$16 sps:$4 sm:$0xff]   ;;  %v9483_v41 = vld [vmem:[#allocation15 + $0xc08] ss:$16 sps:$4 sm:$0xff]  }
 0xb64   :  { %v4831_v46 = vpop.f32.mrb[63].mxu0  ;;  %v4872_v32 = vpop.f32.mrb[71].mxu1  ;;  %v9486_v44 = vld [vmem:[#allocation15 + $0xc20] ss:$16 sps:$4 sm:$0xff]   ;;  %v9489_v45 = vld [vmem:[#allocation15 + $0xc28] ss:$16 sps:$4 sm:$0xff]  }
 0xb65   :  { %v4999_v46 = vrot.slane %v10732_v34, %v10290_v54  ;;  %v9494_v32 = vld [vmem:[#allocation15 + $0xc44] ss:$16 sps:$4 sm:$0xff]  }
 0xb66   :  { %v9505_v34 = vld [vmem:[%s11005_s10 + $0x298] sm:$0xff]  }
 0xb69   :  { %v4933_v51 = vpop.f32.mrb[64].mxu0  ;;  %v4974_v13 = vpop.f32.mrb[72].mxu1 }
 0xb6a   :  { %v4981_v55 = vadd.f32 %v4933_v51, %v4827_v48  ;;  %v10740_v58 = vadd.f32 %v4974_v13, %v4868_v38  ;;  %v4935_v57 = vpop.f32.mrb[65].mxu0  ;;  %v4976_v59 = vpop.f32.mrb[73].mxu1  ;;  %v9482_v48 = vld [vmem:[#allocation15 + $0xc04] ss:$16 sps:$4 sm:$0xff]   ;;  %v9485_v38 = vld [vmem:[#allocation15 + $0xc0c] ss:$16 sps:$4 sm:$0xff]  }
 0xb6b   :  { %v4982_v60 = vadd.f32 %v4935_v57, %v4829_v52  ;;  %v4984_v61 = vadd.f32 %v4976_v59, %v4870_v43  ;;  %v4937_v62 = vpop.f32.mrb[66].mxu0  ;;  %v4978_v63 = vpop.f32.mrb[74].mxu1  ;;  %v9488_v52 = vld [vmem:[#allocation15 + $0xc24] ss:$16 sps:$4 sm:$0xff]   ;;  %v9491_v43 = vld [vmem:[#allocation15 + $0xc2c] ss:$16 sps:$4 sm:$0xff]  }
 0xb6c   :  { %v5008_v2 = vadd.f32 %v4991_v50, %v4981_v55  ;;  %v4938_v0 = vpop.f32.mrb[67].mxu0  ;;  %v4979_v17 = vpop.f32.mrb[75].mxu1  ;;  %v9497_v50 = vld [vmem:[#allocation15 + $0xc4c] ss:$16 sps:$4 sm:$0xff]   ;;  %v9492_v51 = vld [vmem:[#allocation15 + $0xc40] ss:$16 sps:$4 sm:$0xff]  }
 0xb6d   :  { %v5009_v5 = vadd.f32 %v4995_v18, %v4982_v60  ;;  %v5011_v47 = vadd.f32 %v5003_v53, %v4984_v61  ;;  %v9495_v13 = vld [vmem:[#allocation15 + $0xc48] ss:$16 sps:$4 sm:$0xff]   ;;  %v5010_v18 = vadd.f32 %v4999_v46, %v10740_v58  ;;  %v9500_v53 = vld [vmem:[#allocation15 + $0xc64] ss:$16 sps:$4 sm:$0xff]   ;;  %v9503_v55 = vld [vmem:[#allocation15 + $0xc6c] ss:$16 sps:$4 sm:$0xff]  }
 0xb6e   :  { %v5012_v7 = vmax.f32 %v5008_v2, 0.0  ;;  %v9498_v57 = vld [vmem:[#allocation15 + $0xc60] ss:$16 sps:$4 sm:$0xff]   ;;  %v9501_v59 = vld [vmem:[#allocation15 + $0xc68] ss:$16 sps:$4 sm:$0xff]  }
 0xb6f   :  { %v5013_v40 = vmax.f32 %v5009_v5, 0.0  ;;  %v5015_v8 = vmax.f32 %v5011_v47, 0.0  ;;  %v5014_v60 = vmax.f32 %v5010_v18, 0.0  ;;  %v9504_v58 = vld [vmem:[%s11005_s10 + $0x2d8] sm:$0xff]   ;;  %v9508_v63 = vld [vmem:[%s11005_s10 + $0x2a0] sm:$0xff]   ;;  %v9511_v17 = vld [vmem:[%s11005_s10 + $0x2a8] sm:$0xff]  }
 0xb70   :  { %v5016_v14 = vpack.c.bf16 %v5012_v7, %v5012_v7  ;;  %v9506_v61 = vld [vmem:[%s11005_s10 + $0x258] sm:$0xff]   ;;  %v9507_v2 = vld [vmem:[%s11005_s10 + $0x2e0] sm:$0xff]   ;;  %v9510_v5 = vld [vmem:[%s11005_s10 + $0x2e8] sm:$0xff]  }
 0xb71   :  { %v5017_v11 = vpack.c.bf16 %v5013_v40, %v5013_v40  ;;  %v5019_v16 = vpack.c.bf16 %v5015_v8, %v5015_v8  ;;  %v5018_v62 = vpack.c.bf16 %v5014_v60, %v5014_v60  ;;  %v9509_v0 = vld [vmem:[%s11005_s10 + $0x260] sm:$0xff]   ;;  %v9512_v47 = vld [vmem:[%s11005_s10 + $0x268] sm:$0xff]   ;;  %v9514_v7 = vld [vmem:[%s11005_s10 + $0x2b0] sm:$0xff]  }
 0xb72   :  { %v9513_v40 = vld [vmem:[%s11005_s10 + $0x2f0] sm:$0xff]  }
 0xb73   :  { %5679 = vmatprep.mubr.bf16.mxu0 %v5017_v11  ;;  %5761 = vmatprep.mubr.bf16.mxu1 %v5017_v11  ;;  %v9515_v8 = vld [vmem:[%s11005_s10 + $0x270] sm:$0xff]   ;;  %v9517_v11 = vld [vmem:[%s11005_s10 + $0x2b8] sm:$0xff]  }
 0xb74   :  { %5680 = vmatmul.mubr.bf16.vlgmr.msra.gmra.mrb[68].mxu0 %v5016_v14  ;;  %5762 = vmatmul.mubr.bf16.vlgmr.msra.gmra.mrb[76].mxu1 %v5016_v14  ;;  %v9520_v14 = vld [vmem:[%s11005_s10 + $0x2c0] sm:$0xff]  }
 0xb75   :  { %5689 = vmatpush1.bf16.msra.mxu0 %v9450_v12  ;;  %5771 = vmatpush1.bf16.msra.mxu1 %v9453_v37  ;;  %v9516_v12 = vld [vmem:[%s11005_s10 + $0x2f8] sm:$0xff]   ;;  %v9531_v60 = vld [vmem:[#allocation10 + $0x84] ss:$16 sps:$4 sm:$0xff]  }
 0xb76   :  { %8298 = vmatprep.mubr.msk.bf16.mxu0 %vm229_vm1, %v5019_v16  ;;  %8299 = vmatprep.mubr.msk.bf16.mxu1 %vm229_vm1, %v5019_v16  ;;  %v9518_v37 = vld [vmem:[%s11005_s10 + $0x278] sm:$0xff]   ;;  %v9522_v16 = vld [vmem:[%s11005_s10 + $0x308] sm:$0xff]  }
 0xb77   :  { %5690 = vmatprep.subr.bf16.mxu0 %v9458_v19  ;;  %5772 = vmatprep.subr.bf16.mxu1 %v9461_v15  ;;  %v9519_v19 = vld [vmem:[%s11005_s10 + $0x300] sm:$0xff]  }
 0xb78   :  { %v9521_v15 = vld [vmem:[%s11005_s10 + $0x280] sm:$0xff]  }
 0xb79   :  { %5691 = vmatpush1.bf16.msra.mxu0 %v9456_v22  ;;  %5773 = vmatpush1.bf16.msra.mxu1 %v9459_v23  ;;  %v9523_v22 = vld [vmem:[%s11005_s10 + $0x2c8] sm:$0xff]  }
 0xb7a   :  { %5692 = vmatprep.subr.bf16.mxu0 %v9464_v24  ;;  %5774 = vmatprep.subr.bf16.mxu1 %v9467_v10  ;;  %v9524_v23 = vld [vmem:[%s11005_s10 + $0x288] sm:$0xff]   ;;  %v9525_v24 = vld [vmem:[%s11005_s10 + $0x310] sm:$0xff]  }
 0xb7b   :  { %v9526_v10 = vld [vmem:[%s11005_s10 + $0x2d0] sm:$0xff]  }
 0xb7d   :  { %5693 = vmatpush1.bf16.msra.mxu0 %v9462_v21  ;;  %5775 = vmatpush1.bf16.msra.mxu1 %v9465_v42  ;;  %v9527_v21 = vld [vmem:[%s11005_s10 + $0x290] sm:$0xff]   ;;  %v9528_v42 = vld [vmem:[%s11005_s10 + $0x318] sm:$0xff]  }
 0xb7e   :  { %5694 = vmatprep.subr.bf16.mxu0 %v9470_v25  ;;  %5776 = vmatprep.subr.bf16.mxu1 %v9473_v28  ;;  %v5122_v25 = vld [vmem:[#allocation16 + $0xc] sm:$0xf] }
 0xb7f   :  { %v5127_v28 = vrot.slane %v5122_v25, %v10242_v4 }
 0xb81   :  { %5695 = vmatpush1.bf16.msra.mxu0 %v9468_v29  ;;  %5777 = vmatpush1.bf16.msra.mxu1 %v9471_v30  ;;  %v5135_v29 = vrot.slane %v5122_v25, %v10290_v54  ;;  %v5131_v30 = vrot.slane %v5122_v25, %v10276_v49 }
 0xb82   :  { %5696 = vmatprep.subr.bf16.mxu0 %v9476_v31  ;;  %5778 = vmatprep.subr.bf16.mxu1 %v9479_v35  ;;  %v5139_v31 = vrot.slane %v5122_v25, %v10283_v20 }
 0xb85   :  { %5697 = vmatpush1.bf16.msra.mxu0 %v9474_v36  ;;  %5779 = vmatpush1.bf16.msra.mxu1 %v9477_v33 }
 0xb86   :  { %5698 = vmatprep.subr.bf16.mxu0 %v9482_v48  ;;  %5780 = vmatprep.subr.bf16.mxu1 %v9485_v38 }
 0xb89   :  { %5699 = vmatpush1.bf16.msra.mxu0 %v9480_v39  ;;  %5781 = vmatpush1.bf16.msra.mxu1 %v9483_v41 }
 0xb8a   :  { %5700 = vmatprep.subr.bf16.mxu0 %v9488_v52  ;;  %5782 = vmatprep.subr.bf16.mxu1 %v9491_v43 }
 0xb8d   :  { %5701 = vmatpush1.bf16.msra.mxu0 %v9486_v44  ;;  %5783 = vmatpush1.bf16.msra.mxu1 %v9489_v45 }
 0xb8e   :  { %5702 = vmatprep.subr.bf16.mxu0 %v9494_v32  ;;  %5784 = vmatprep.subr.bf16.mxu1 %v9497_v50 }
 0xb91   :  { %5703 = vmatpush1.bf16.msra.mxu0 %v9492_v51  ;;  %5785 = vmatpush1.bf16.msra.mxu1 %v9495_v13 }
 0xb92   :  { %5704 = vmatprep.subr.bf16.mxu0 %v9500_v53  ;;  %5786 = vmatprep.subr.bf16.mxu1 %v9503_v55 }
 0xb95   :  { %5705 = vmatpush1.bf16.msra.mxu0 %v9498_v57  ;;  %5787 = vmatpush1.bf16.msra.mxu1 %v9501_v59  ;;  %v9529_v59 = vld [vmem:[#allocation10 + $0x80] ss:$16 sps:$4 sm:$0xff]  }
 0xb96   :  { %6071 = vmatprep.subr.bf16.mxu1 %v10012_v1  ;;  %8643 = vmatprep.subr.bf16.mxu0 %v9505_v34  ;;  %v9534_v34 = vld [vmem:[#allocation10 + $0x8c] ss:$16 sps:$4 sm:$0xff]  }
 0xb98   :  { %5721 = vmatmul.mubr.bf16.vlgmr.msra.gmra.mrb[68].mxu0 %v5018_v62  ;;  %5803 = vmatmul.mubr.bf16.vlgmr.msra.gmra.mrb[76].mxu1 %v5018_v62 }
 0xb99   :  { %6072 = vmatpush1.bf16.msra.mxu1 %v9504_v58  ;;  %8644 = vmatpush3.bf16.msra.mxu0 %v9506_v61  ;;  %v9532_v58 = vld [vmem:[#allocation10 + $0x88] ss:$16 sps:$4 sm:$0xff]  }
 0xb9a   :  { %6073 = vmatprep.subr.bf16.mxu1 %v10012_v1  ;;  %8645 = vmatprep.subr.bf16.mxu0 %v9508_v63  ;;  %v8350_v63 = vld [vmem:[#allocation18 + $0x3] ss:$0 sm:$0xff] }
 0xb9d   :  { %6074 = vmatpush1.bf16.msra.mxu1 %v9507_v2  ;;  %8646 = vmatpush3.bf16.msra.mxu0 %v9509_v0 }
 0xb9e   :  { %6075 = vmatprep.subr.bf16.mxu1 %v10012_v1  ;;  %8647 = vmatprep.subr.bf16.mxu0 %v9511_v17  ;;  %v9537_v17 = vld [vmem:[#allocation9 + $0x84] ss:$16 sps:$4 sm:$0xff]  }
 0xba1   :  { %6076 = vmatpush1.bf16.msra.mxu1 %v9510_v5  ;;  %8648 = vmatpush3.bf16.msra.mxu0 %v9512_v47  ;;  %v9540_v5 = vld [vmem:[#allocation9 + $0x8c] ss:$16 sps:$4 sm:$0xff]  }
 0xba2   :  { %6077 = vmatprep.subr.bf16.mxu1 %v10012_v1  ;;  %8649 = vmatprep.subr.bf16.mxu0 %v9514_v7 }
 0xba5   :  { %6078 = vmatpush1.bf16.msra.mxu1 %v9513_v40  ;;  %8650 = vmatpush3.bf16.msra.mxu0 %v9515_v8  ;;  %v9535_v8 = vld [vmem:[#allocation9 + $0x80] ss:$16 sps:$4 sm:$0xff]  }
 0xba6   :  { %6079 = vmatprep.subr.bf16.mxu1 %v10012_v1  ;;  %8651 = vmatprep.subr.bf16.mxu0 %v9517_v11  ;;  %v9538_v11 = vld [vmem:[#allocation9 + $0x88] ss:$16 sps:$4 sm:$0xff]  }
 0xba9   :  { %6080 = vmatpush1.bf16.msra.mxu1 %v9516_v12  ;;  %8652 = vmatpush3.bf16.msra.mxu0 %v9518_v37 }
 0xbaa   :  { %6081 = vmatprep.subr.bf16.mxu1 %v10012_v1  ;;  %8653 = vmatprep.subr.bf16.mxu0 %v9520_v14 }
 0xbad   :  { %6082 = vmatpush1.bf16.msra.mxu1 %v9519_v19  ;;  %8654 = vmatpush3.bf16.msra.mxu0 %v9521_v15  ;;  %v6360_v19 = vld [vmem:[#allocation12 + $0x40] sm:$0xff] }
 0xbae   :  { %6083 = vmatprep.subr.bf16.mxu1 %v10012_v1  ;;  %8655 = vmatprep.subr.bf16.mxu0 %v9523_v22  ;;  %v8390_v15 = vcombine.high %v6360_v19, %v6360_v19 }
 0xbb1   :  { %6084 = vmatpush1.bf16.msra.mxu1 %v9522_v16  ;;  %8656 = vmatpush3.bf16.msra.mxu0 %v9524_v23  ;;  %v6361_v16 = vld [vmem:[#allocation12 + $0x48] sm:$0xff]  ;;  %v4648_v23 = vsub.f32 1.0, %v10708_v26  ;;  %v10857_v26 = vld [vmem:[#allocation7 + $0x4] sm:$0x1] }
 0xbb2   :  { %6085 = vmatprep.subr.bf16.mxu1 %v10012_v1  ;;  %8657 = vmatprep.subr.bf16.mxu0 %v9526_v10  ;;  %v8392_v22 = vcombine.high %v6361_v16, %v6361_v16 }
 0xbb5   :  { %6086 = vmatpush1.bf16.msra.mxu1 %v9525_v24  ;;  %8658 = vmatpush3.bf16.msra.mxu0 %v9527_v21  ;;  %v6121_v24 = vrot.slane %v4648_v23, %v10242_v4  ;;  %v9593_v23 = vld [vmem:[#allocation15 + $0xd80] ss:$16 sps:$4 sm:$0xff]  }
 0xbb6   :  { %6087 = vmatprep.subr.bf16.mxu1 %v10012_v1  ;;  %6172 = vmatprep.subr.bf16.mxu0 %v9531_v60  ;;  %v9557_v60 = vld [vmem:[#allocation15 + $0xcc0] ss:$16 sps:$4 sm:$0xff]  }
 0xbb9   :  { %6088 = vmatpush1.bf16.msra.mxu1 %v9528_v42 }
 0xbba   :  { %6277 = vmatprep.subr.bf16.mxu1 %v9537_v17  ;;  %v9572_v17 = vld [vmem:[#allocation15 + $0xd08] ss:$16 sps:$4 sm:$0xff]  }
 0xc6b   :  { %v5722_v35 = vpop.f32.mrb[68].mxu0  ;;  %v5804_v36 = vpop.f32.mrb[76].mxu1 }
 0xc6c   :  { %v8699_v33 = vadd.f32 %v5722_v35, %v5127_v28  ;;  %v8701_v48 = vadd.f32 %v5804_v36, %v5135_v29  ;;  %v5724_v38 = vpop.f32.mrb[69].mxu0  ;;  %v5806_v39 = vpop.f32.mrb[77].mxu1 }
 0xc6d   :  { %v8700_v41 = vadd.f32 %v5724_v38, %v5131_v30  ;;  %v8702_v52 = vadd.f32 %v5806_v39, %v5139_v31  ;;  %v5726_v43 = vpop.f32.mrb[70].mxu0  ;;  %v5808_v44 = vpop.f32.mrb[78].mxu1  ;;  %v6138_v39 = vrot.slane %v10857_v26, %v10242_v4 }
 0xc6e   :  { %v5811_v45 = vmax.f32 %v8699_v33, 0.0  ;;  %v5813_v46 = vmax.f32 %v8701_v48, 0.0  ;;  %v5727_v32 = vpop.f32.mrb[71].mxu0  ;;  %v5809_v50 = vpop.f32.mrb[79].mxu1  ;;  %v8391_v43 = vcombine.low %v6361_v16, %v6361_v16  ;;  %v9595_v16 = vld [vmem:[#allocation15 + $0xd84] ss:$16 sps:$4 sm:$0xff]  }
 0xc6f   :  { %v5812_v51 = vmax.f32 %v8700_v41, 0.0  ;;  %v5814_v13 = vmax.f32 %v8702_v52, 0.0  ;;  %v8389_v52 = vcombine.low %v6360_v19, %v6360_v19  ;;  %v9547_v32 = vld [vmem:[#allocation15 + $0xc84] ss:$16 sps:$4 sm:$0xff]   ;;  %v9550_v50 = vld [vmem:[#allocation15 + $0xc8c] ss:$16 sps:$4 sm:$0xff]  }
 0xc70   :  { %v5815_v55 = vpack.c.bf16 %v5811_v45, %v5811_v45  ;;  %v5817_v57 = vpack.c.bf16 %v5813_v46, %v5813_v46  ;;  %v6379_v46 = vsel %vm436_vm0, %v8391_v43, 0  ;;  %v9587_v19 = vld [vmem:[#allocation15 + $0xd60] ss:$16 sps:$4 sm:$0xff]  }
 0xc71   :  { %v5816_v18 = vpack.c.bf16 %v5812_v51, %v5812_v51  ;;  %v5818_v53 = vpack.c.bf16 %v5814_v13, %v5814_v13  ;;  %v9548_v51 = vld [vmem:[#allocation15 + $0xc88] ss:$16 sps:$4 sm:$0xff]   ;;  %v9553_v13 = vld [vmem:[#allocation15 + $0xca4] ss:$16 sps:$4 sm:$0xff]  }
 0xc73   :  { %6063 = vmatprep.mubr.bf16.mxu0 %v5816_v18  ;;  %8376 = vmatprep.mubr.msk.bf16.mxu1 %vm229_vm1, %v5818_v53  ;;  %v9556_v18 = vld [vmem:[#allocation15 + $0xcac] ss:$16 sps:$4 sm:$0xff]   ;;  %v9551_v53 = vld [vmem:[#allocation15 + $0xca0] ss:$16 sps:$4 sm:$0xff]  }
 0xc74   :  { %6064 = vmatmul.mubr.bf16.vlgmr.msra.gmra.mrb[72].mxu0 %v5815_v55  ;;  %6104 = vmatmul.mubr.bf16.vlgmr.msra.gmra.mrb[80].mxu1 %v5817_v57  ;;  %v9554_v55 = vld [vmem:[#allocation15 + $0xca8] ss:$16 sps:$4 sm:$0xff]   ;;  %v9559_v57 = vld [vmem:[#allocation15 + $0xcc4] ss:$16 sps:$4 sm:$0xff]  }
 0xc75   :  { %6204 = vmatprep.mubr.bf16.mxu0 %v10012_v1  ;;  %6309 = vmatprep.mubr.bf16.mxu1 %v10012_v1 }
 0xc76   :  { %6173 = vmatpush1.bf16.msra.mxu0 %v9529_v59  ;;  %6278 = vmatpush1.bf16.msra.mxu1 %v9535_v8  ;;  %v9562_v59 = vld [vmem:[#allocation15 + $0xccc] ss:$16 sps:$4 sm:$0xff]   ;;  %v9583_v8 = vld [vmem:[#allocation15 + $0xd44] ss:$16 sps:$4 sm:$0xff]  }
 0xc77   :  { %6213 = vmatprep.subr.bf16.mxu0 %v9534_v34  ;;  %8393 = vmatprep.subr.msk.bf16.mxu1 %vm436_vm0, %v8390_v15  ;;  %v9560_v34 = vld [vmem:[#allocation15 + $0xcc8] ss:$16 sps:$4 sm:$0xff]  }
 0xc78   :  { %v9590_v15 = vld [vmem:[#allocation15 + $0xd68] ss:$16 sps:$4 sm:$0xff]  }
 0xc7c   :  { %8381 = vmatmul.mubr.msk.bf16.vlgmr.msra.gmra.mrb[76].mxu0 %vm229_vm1, %v10244_v9 }
 0xc7d   :  { %6245 = vmatprep.mubr.bf16.mxu0 %v10012_v1  ;;  %6214 = vmatpush1.bf16.msra.mxu0 %v9532_v58  ;;  %v9565_v58 = vld [vmem:[#allocation15 + $0xce4] ss:$16 sps:$4 sm:$0xff]  }
 0xc7e   :  { %6318 = vmatprep.subr.bf16.mxu0 %v9540_v5  ;;  %v9577_v5 = vld [vmem:[#allocation15 + $0xd24] ss:$16 sps:$4 sm:$0xff]  }
 0xc84   :  { %8382 = vmatmul.mubr.msk.bf16.vlgmr.msra.gmra.mrb[80].mxu0 %vm229_vm1, %v10244_v9 }
 0xc85   :  { %6350 = vmatprep.mubr.bf16.mxu0 %v10012_v1  ;;  %6319 = vmatpush1.bf16.msra.mxu0 %v9538_v11  ;;  %v9586_v11 = vld [vmem:[#allocation15 + $0xd4c] ss:$16 sps:$4 sm:$0xff]  }
 0xc86   :  { %8395 = vmatprep.subr.msk.bf16.mxu0 %vm436_vm0, %v8392_v22  ;;  %v9598_v22 = vld [vmem:[#allocation15 + $0xd8c] ss:$16 sps:$4 sm:$0xff]  }
 0xd47   :  { %v8659_v61 = vpop.f32.mrb[72].mxu0  ;;  %v6105_v62 = vpop.f32.mrb[80].mxu1 }
 0xd48   :  { %v8660_v2 = vpop.f32.mrb[73].mxu0  ;;  %v6107_v0 = vpop.f32.mrb[81].mxu1 }
 0xd49   :  { %v8661_v47 = vadd.f32 %v8660_v2, %v8659_v61  ;;  %v8662_v7 = vpop.f32.mrb[74].mxu0  ;;  %v6108_v40 = vpop.f32.mrb[82].mxu1  ;;  %v9568_v61 = vld [vmem:[#allocation15 + $0xcec] ss:$16 sps:$4 sm:$0xff]   ;;  %v9569_v0 = vld [vmem:[#allocation15 + $0xd00] ss:$16 sps:$4 sm:$0xff]  }
 0xd4a   :  { %v8663_v12 = vpop.f32.mrb[75].mxu0  ;;  %v6109_v37 = vpop.f32.mrb[83].mxu1  ;;  %v9574_v2 = vld [vmem:[#allocation15 + $0xd0c] ss:$16 sps:$4 sm:$0xff]   ;;  %v9575_v7 = vld [vmem:[#allocation15 + $0xd20] ss:$16 sps:$4 sm:$0xff]  }
 0xd4b   :  { %v6066_v14 = vadd.f32 %v8661_v47, %v8350_v63  ;;  %v9571_v63 = vld [vmem:[#allocation15 + $0xd04] ss:$16 sps:$4 sm:$0xff]   ;;  %v9580_v47 = vld [vmem:[#allocation15 + $0xd2c] ss:$16 sps:$4 sm:$0xff]   ;;  %v9578_v40 = vld [vmem:[#allocation15 + $0xd28] ss:$16 sps:$4 sm:$0xff]  }
 0xd4c   :  { %v9581_v12 = vld [vmem:[#allocation15 + $0xd40] ss:$16 sps:$4 sm:$0xff]   ;;  %v9584_v37 = vld [vmem:[#allocation15 + $0xd48] ss:$16 sps:$4 sm:$0xff]  }
 0xd4d   :  { %v6106_v9 = vadd.f32 %v6105_v62, %v6066_v14  ;;  %v9563_v62 = vld [vmem:[#allocation15 + $0xce0] ss:$16 sps:$4 sm:$0xff]   ;;  %v9589_v14 = vld [vmem:[#allocation15 + $0xd64] ss:$16 sps:$4 sm:$0xff]  }
 0xd4f   :  { %6113 = vrot.lane.b32.xlu1 %v6106_v9, %s10013_s18  ;;  %9732 = vtanh.f32 %v6106_v9  ;;  %v10852_v28 = vpop.f32.mrb[76].mxu0  ;;  %v9592_v9 = vld [vmem:[#allocation15 + $0xd6c] ss:$16 sps:$4 sm:$0xff]  }
 0xd50   :  { %v10854_v29 = vpop.f32.mrb[77].mxu0 }
 0xd51   :  { %v6210_v30 = vpop.f32.mrb[78].mxu0 }
 0xd52   :  { %v6211_v31 = vpop.f32.mrb[79].mxu0  ;;  %v9602_v30 = vld [vmem:[#allocation15 + $0xda8] ss:$16 sps:$4 sm:$0xff]  }
 0xd53   :  { %v9607_v31 = vld [vmem:[#allocation15 + $0xdc4] ss:$16 sps:$4 sm:$0xff]  }
 0xd59   :  { %v9733_v10 = vpop.eup %9732 }
 0xd5a   :  { %v6124_v21 = vsub.f32 0.0, %v9733_v10  ;;  %v9601_v10 = vld [vmem:[#allocation15 + $0xda4] ss:$16 sps:$4 sm:$0xff]  }
 0xd5c   :  { %v6129_v42 = vmul.f32 %v6124_v21, %v6121_v24  ;;  %v6125_v35 = vmul.f32 1.442695, %v6124_v21  ;;  %v9604_v21 = vld [vmem:[#allocation15 + $0xdac] ss:$16 sps:$4 sm:$0xff]  }
 0xd5e   :  { %v10850_v25 = vadd.f32 %v6129_v42, %v10701_v56  ;;  %9734 = vpow2.f32 %v6125_v35  ;;  %v9599_v42 = vld [vmem:[#allocation15 + $0xda0] ss:$16 sps:$4 sm:$0xff]   ;;  %v9610_v35 = vld [vmem:[#allocation15 + $0xdcc] ss:$16 sps:$4 sm:$0xff]  }
 0xd68   :  { %v9735_v38 = vpop.eup %9734 }
 0xdc1   :  { %v6114_v36 = vpop.permute.xlu1 %6113 }
 0xdc2   :  { %v6116_v33 = vsub.f32 %v10713_v3, %v6114_v36  ;;  %v6373_v3 = vsel %vm436_vm0, %v8389_v52, 0  ;;  %v9605_v36 = vld [vmem:[#allocation15 + $0xdc0] ss:$16 sps:$4 sm:$0xff]   ;;  %v6247_v52 = vpop.f32.mrb[80].mxu0 }
 0xdc3   :  { %v6249_v43 = vpop.f32.mrb[81].mxu0 }
 0xdc4   :  { %v6123_v48 = vmul.f32 %v6121_v24, %v6116_v33  ;;  %v9596_v24 = vld [vmem:[#allocation15 + $0xd88] ss:$16 sps:$4 sm:$0xff]  }
 0xdc5   :  { %v9608_v33 = vld [vmem:[#allocation15 + $0xdc8] ss:$16 sps:$4 sm:$0xff]  }
 0xdc6   :  { %v6127_v56 = vmul.f32 %v9735_v38, %v6123_v48  ;;  %v9613_v48 = vld [vmem:[#allocation15 + $0xde4] ss:$16 sps:$4 sm:$0xff]   ;;  %v9616_v38 = vld [vmem:[#allocation15 + $0xdec] ss:$16 sps:$4 sm:$0xff]  }
 0xdc8   :  { %v10862_v41 = vadd.f32 %v6127_v56, %v10716_v6  ;;  %v9545_v6 = vld [vmem:[#allocation15 + $0xc80] ss:$16 sps:$4 sm:$0xff]   ;;  %v9614_v56 = vld [vmem:[#allocation15 + $0xde8] ss:$16 sps:$4 sm:$0xff]  }
 0xdca   :  { %v10865_v44 = vmul.f32 %v6138_v39, %v10862_v41  ;;  %v9611_v39 = vld [vmem:[#allocation15 + $0xde0] ss:$16 sps:$4 sm:$0xff]  }
 0xdcc   :  { %v6141_v45 = vpack.c.bf16 %v10865_v44, %v10865_v44 }
 0xdce   :  { %8387 = vmatmul.mubr.msk.bf16.vlgmr.msra.gmra.mrb[84].mxu1 %vm229_vm1, %v6141_v45  ;;  %8388 = vmatmul.mubr.msk.bf16.vlgmr.msra.gmra.mrb[84].mxu0 %vm229_vm1, %v6141_v45  ;;  %v6251_v45 = vpop.f32.mrb[82].mxu0 }
 0xdcf   :  { %6385 = vmatpush1.bf16.msra.mxu1 %v6373_v3  ;;  %6426 = vmatpush1.bf16.msra.mxu0 %v6379_v46  ;;  %v6252_v3 = vpop.f32.mrb[83].mxu0  ;;  %v9619_v46 = vld [vmem:[#allocation15 + $0xe04] ss:$16 sps:$4 sm:$0xff]   ;;  %v9641_v45 = vld [vmem:[#allocation15 + $0xe80] ss:$16 sps:$4 sm:$0xff]  }
 0xdd0   :  { %6416 = vmatprep.mubr.bf16.mxu1 %v10012_v1  ;;  %6457 = vmatprep.mubr.bf16.mxu0 %v10012_v1  ;;  %v9644_v3 = vld [vmem:[#allocation15 + $0xe88] ss:$16 sps:$4 sm:$0xff]  }
 0xdd1   :  { %7132 = vmatprep.subr.bf16.mxu1 %v9547_v32  ;;  %7214 = vmatprep.subr.bf16.mxu0 %v9550_v50  ;;  %v9622_v32 = vld [vmem:[#allocation15 + $0xe0c] ss:$16 sps:$4 sm:$0xff]   ;;  %v9617_v50 = vld [vmem:[#allocation15 + $0xe00] ss:$16 sps:$4 sm:$0xff]  }
 0xdd6   :  { %8394 = vmatmul.mubr.msk.bf16.vlgmr.msra.gmra.mrb[88].mxu1 %vm432_vm2, %v10260_v27  ;;  %8396 = vmatmul.mubr.msk.bf16.vlgmr.msra.gmra.mrb[88].mxu0 %vm432_vm2, %v10260_v27  ;;  %v9566_v27 = vld [vmem:[#allocation15 + $0xce8] ss:$16 sps:$4 sm:$0xff]  }
 0xdd7   :  { %7133 = vmatpush1.bf16.msra.mxu1 %v9545_v6  ;;  %7215 = vmatpush1.bf16.msra.mxu0 %v9548_v51  ;;  %v9620_v6 = vld [vmem:[#allocation15 + $0xe08] ss:$16 sps:$4 sm:$0xff]   ;;  %v9623_v51 = vld [vmem:[#allocation15 + $0xe20] ss:$16 sps:$4 sm:$0xff]  }
 0xdd8   :  { %7134 = vmatprep.subr.bf16.mxu1 %v9553_v13  ;;  %7216 = vmatprep.subr.bf16.mxu0 %v9556_v18  ;;  %v9625_v13 = vld [vmem:[#allocation15 + $0xe24] ss:$16 sps:$4 sm:$0xff]   ;;  %v9626_v18 = vld [vmem:[#allocation15 + $0xe28] ss:$16 sps:$4 sm:$0xff]  }
 0xddb   :  { %7135 = vmatpush1.bf16.msra.mxu1 %v9551_v53  ;;  %7217 = vmatpush1.bf16.msra.mxu0 %v9554_v55  ;;  %v9628_v53 = vld [vmem:[#allocation15 + $0xe2c] ss:$16 sps:$4 sm:$0xff]   ;;  %v9631_v55 = vld [vmem:[#allocation15 + $0xe44] ss:$16 sps:$4 sm:$0xff]  }
 0xddc   :  { %7136 = vmatprep.subr.bf16.mxu1 %v9559_v57  ;;  %7218 = vmatprep.subr.bf16.mxu0 %v9562_v59  ;;  %v9634_v57 = vld [vmem:[#allocation15 + $0xe4c] ss:$16 sps:$4 sm:$0xff]   ;;  %v9629_v59 = vld [vmem:[#allocation15 + $0xe40] ss:$16 sps:$4 sm:$0xff]  }
 0xddf   :  { %7137 = vmatpush1.bf16.msra.mxu1 %v9557_v60  ;;  %7219 = vmatpush1.bf16.msra.mxu0 %v9560_v34  ;;  %v9632_v60 = vld [vmem:[#allocation15 + $0xe48] ss:$16 sps:$4 sm:$0xff]   ;;  %v9637_v34 = vld [vmem:[#allocation15 + $0xe64] ss:$16 sps:$4 sm:$0xff]  }
 0xde0   :  { %7138 = vmatprep.subr.bf16.mxu1 %v9565_v58  ;;  %7220 = vmatprep.subr.bf16.mxu0 %v9568_v61  ;;  %v9640_v58 = vld [vmem:[#allocation15 + $0xe6c] ss:$16 sps:$4 sm:$0xff]   ;;  %v9635_v61 = vld [vmem:[#allocation15 + $0xe60] ss:$16 sps:$4 sm:$0xff]  }
 0xde3   :  { %7139 = vmatpush1.bf16.msra.mxu1 %v9563_v62  ;;  %7221 = vmatpush1.bf16.msra.mxu0 %v9566_v27  ;;  %v9638_v62 = vld [vmem:[#allocation15 + $0xe68] ss:$16 sps:$4 sm:$0xff]   ;;  %v9643_v27 = vld [vmem:[#allocation15 + $0xe84] ss:$16 sps:$4 sm:$0xff]  }
 0xde4   :  { %7140 = vmatprep.subr.bf16.mxu1 %v9571_v63  ;;  %7222 = vmatprep.subr.bf16.mxu0 %v9574_v2  ;;  %v9646_v63 = vld [vmem:[#allocation15 + $0xe8c] ss:$16 sps:$4 sm:$0xff]  }
 0xde7   :  { %7141 = vmatpush1.bf16.msra.mxu1 %v9569_v0  ;;  %7223 = vmatpush1.bf16.msra.mxu0 %v9572_v17 }
 0xde8   :  { %7142 = vmatprep.subr.bf16.mxu1 %v9577_v5  ;;  %7224 = vmatprep.subr.bf16.mxu0 %v9580_v47 }
 0xdeb   :  { %7143 = vmatpush1.bf16.msra.mxu1 %v9575_v7  ;;  %7225 = vmatpush1.bf16.msra.mxu0 %v9578_v40 }
 0xdec   :  { %7144 = vmatprep.subr.bf16.mxu1 %v9583_v8  ;;  %7226 = vmatprep.subr.bf16.mxu0 %v9586_v11 }
 0xdef   :  { %7145 = vmatpush1.bf16.msra.mxu1 %v9581_v12  ;;  %7227 = vmatpush1.bf16.msra.mxu0 %v9584_v37 }
 0xdf0   :  { %7146 = vmatprep.subr.bf16.mxu1 %v9589_v14  ;;  %7228 = vmatprep.subr.bf16.mxu0 %v9592_v9  ;;  %v10881_v9 = vld [vmem:[#allocation13 + $0x10] sm:$0xf] }
 0xdf3   :  { %7147 = vmatpush1.bf16.msra.mxu1 %v9587_v19  ;;  %7229 = vmatpush1.bf16.msra.mxu0 %v9590_v15  ;;  %v6476_v19 = vrot.slane %v10881_v9, %v10242_v4 }
 0xdf4   :  { %7148 = vmatprep.subr.bf16.mxu1 %v9595_v16  ;;  %7230 = vmatprep.subr.bf16.mxu0 %v9598_v22  ;;  %v6488_v22 = vrot.slane %v10881_v9, %v10283_v20 }
 0xdf7   :  { %7149 = vmatpush1.bf16.msra.mxu1 %v9593_v23  ;;  %7231 = vmatpush1.bf16.msra.mxu0 %v9596_v24 }
 0xdf8   :  { %7150 = vmatprep.subr.bf16.mxu1 %v9601_v10  ;;  %7232 = vmatprep.subr.bf16.mxu0 %v9604_v21 }
 0xdfb   :  { %7151 = vmatpush1.bf16.msra.mxu1 %v9599_v42  ;;  %7233 = vmatpush1.bf16.msra.mxu0 %v9602_v30 }
 0xdfc   :  { %7152 = vmatprep.subr.bf16.mxu1 %v9607_v31  ;;  %7234 = vmatprep.subr.bf16.mxu0 %v9610_v35 }
 0xdff   :  { %7153 = vmatpush1.bf16.msra.mxu1 %v9605_v36  ;;  %7235 = vmatpush1.bf16.msra.mxu0 %v9608_v33 }
 0xe00   :  { %7154 = vmatprep.subr.bf16.mxu1 %v9613_v48  ;;  %7236 = vmatprep.subr.bf16.mxu0 %v9616_v38 }
 0xe03   :  { %7155 = vmatpush1.bf16.msra.mxu1 %v9611_v39  ;;  %7237 = vmatpush1.bf16.msra.mxu0 %v9614_v56 }
 0xe04   :  { %7156 = vmatprep.subr.bf16.mxu1 %v9619_v46  ;;  %7238 = vmatprep.subr.bf16.mxu0 %v9622_v32  ;;  %v9649_v32 = vld [vmem:[#allocation15 + $0xea4] ss:$16 sps:$4 sm:$0xff]  }
 0xe07   :  { %7157 = vmatpush1.bf16.msra.mxu1 %v9617_v50  ;;  %7239 = vmatpush1.bf16.msra.mxu0 %v9620_v6  ;;  %v9652_v50 = vld [vmem:[#allocation15 + $0xeac] ss:$16 sps:$4 sm:$0xff]  }
 0xe08   :  { %7158 = vmatprep.subr.bf16.mxu1 %v9625_v13  ;;  %7240 = vmatprep.subr.bf16.mxu0 %v9628_v53  ;;  %v9650_v13 = vld [vmem:[#allocation15 + $0xea8] ss:$16 sps:$4 sm:$0xff]   ;;  %v9658_v53 = vld [vmem:[#allocation15 + $0xecc] ss:$16 sps:$4 sm:$0xff]  }
 0xe0b   :  { %7159 = vmatpush1.bf16.msra.mxu1 %v9623_v51  ;;  %7241 = vmatpush1.bf16.msra.mxu0 %v9626_v18  ;;  %v9647_v51 = vld [vmem:[#allocation15 + $0xea0] ss:$16 sps:$4 sm:$0xff]   ;;  %v9655_v18 = vld [vmem:[#allocation15 + $0xec4] ss:$16 sps:$4 sm:$0xff]  }
 0xe0c   :  { %7160 = vmatprep.subr.bf16.mxu1 %v9631_v55  ;;  %7242 = vmatprep.subr.bf16.mxu0 %v9634_v57  ;;  %v9653_v55 = vld [vmem:[#allocation15 + $0xec0] ss:$16 sps:$4 sm:$0xff]   ;;  %v9656_v57 = vld [vmem:[#allocation15 + $0xec8] ss:$16 sps:$4 sm:$0xff]  }
 0xe0f   :  { %7161 = vmatpush1.bf16.msra.mxu1 %v9629_v59  ;;  %7243 = vmatpush1.bf16.msra.mxu0 %v9632_v60  ;;  %v9661_v59 = vld [vmem:[#allocation15 + $0xee4] ss:$16 sps:$4 sm:$0xff]   ;;  %v9664_v60 = vld [vmem:[#allocation15 + $0xeec] ss:$16 sps:$4 sm:$0xff]  }
 0xe10   :  { %7162 = vmatprep.subr.bf16.mxu1 %v9637_v34  ;;  %7244 = vmatprep.subr.bf16.mxu0 %v9640_v58  ;;  %v9659_v34 = vld [vmem:[#allocation15 + $0xee0] ss:$16 sps:$4 sm:$0xff]   ;;  %v9662_v58 = vld [vmem:[#allocation15 + $0xee8] ss:$16 sps:$4 sm:$0xff]  }
 0xe13   :  { %7163 = vmatpush1.bf16.msra.mxu1 %v9635_v61  ;;  %7245 = vmatpush1.bf16.msra.mxu0 %v9638_v62  ;;  %v9667_v61 = vld [vmem:[#allocation15 + $0xf04] ss:$16 sps:$4 sm:$0xff]   ;;  %v9670_v62 = vld [vmem:[#allocation15 + $0xf0c] ss:$16 sps:$4 sm:$0xff]  }
 0xe14   :  { %7173 = vmatprep.subr.bf16.mxu1 %v9643_v27  ;;  %7255 = vmatprep.subr.bf16.mxu0 %v9646_v63  ;;  %v9665_v27 = vld [vmem:[#allocation15 + $0xf00] ss:$16 sps:$4 sm:$0xff]   ;;  %v9668_v63 = vld [vmem:[#allocation15 + $0xf08] ss:$16 sps:$4 sm:$0xff]  }
 0xea1   :  { %v6311_v2 = vpop.f32.mrb[84].mxu1  ;;  %v6352_v0 = vpop.f32.mrb[84].mxu0 }
 0xea2   :  { %v6312_v17 = vadd.f32 %v6311_v2, %v10852_v28  ;;  %v6353_v5 = vadd.f32 %v6352_v0, %v6247_v52  ;;  %v6313_v47 = vpop.f32.mrb[85].mxu1  ;;  %v6354_v7 = vpop.f32.mrb[85].mxu0  ;;  %v6480_v28 = vrot.slane %v10881_v9, %v10276_v49  ;;  %v9673_v2 = vld [vmem:[#allocation15 + $0xf24] ss:$16 sps:$4 sm:$0xff]   ;;  %v9676_v0 = vld [vmem:[#allocation15 + $0xf2c] ss:$16 sps:$4 sm:$0xff]  }
 0xea3   :  { %v6314_v40 = vadd.f32 %v6313_v47, %v10854_v29  ;;  %v6355_v8 = vadd.f32 %v6354_v7, %v6249_v43  ;;  %v6315_v11 = vpop.f32.mrb[86].mxu1  ;;  %v6356_v12 = vpop.f32.mrb[86].mxu0  ;;  %v9679_v47 = vld [vmem:[#allocation15 + $0xf44] ss:$16 sps:$4 sm:$0xff]   ;;  %v9682_v7 = vld [vmem:[#allocation15 + $0xf4c] ss:$16 sps:$4 sm:$0xff]  }
 0xea4   :  { %v6316_v37 = vpop.f32.mrb[87].mxu1  ;;  %v6357_v14 = vpop.f32.mrb[87].mxu0  ;;  %v6484_v11 = vrot.slane %v10881_v9, %v10290_v54  ;;  %v9685_v12 = vld [vmem:[#allocation15 + $0xf64] ss:$16 sps:$4 sm:$0xff]  }
 0xea5   :  { %v9688_v37 = vld [vmem:[#allocation15 + $0xf6c] ss:$16 sps:$4 sm:$0xff]   ;;  %v9683_v14 = vld [vmem:[#allocation15 + $0xf60] ss:$16 sps:$4 sm:$0xff]  }
 0xea6   :  { %v9696_v9 = vld [vmem:[%s11005_s10 + $0x360] sm:$0xff]  }
 0xea9   :  { %v6418_v15 = vpop.f32.mrb[88].mxu1  ;;  %v6459_v16 = vpop.f32.mrb[88].mxu0 }
 0xeaa   :  { %v6466_v23 = vadd.f32 %v6418_v15, %v6312_v17  ;;  %v10889_v29 = vadd.f32 %v6459_v16, %v6353_v5  ;;  %v6420_v24 = vpop.f32.mrb[89].mxu1  ;;  %v6461_v10 = vpop.f32.mrb[89].mxu0  ;;  %v9671_v17 = vld [vmem:[#allocation15 + $0xf20] ss:$16 sps:$4 sm:$0xff]   ;;  %v9674_v5 = vld [vmem:[#allocation15 + $0xf28] ss:$16 sps:$4 sm:$0xff]  }
 0xeab   :  { %v6467_v21 = vadd.f32 %v6420_v24, %v6314_v40  ;;  %v6469_v42 = vadd.f32 %v6461_v10, %v6355_v8  ;;  %v6422_v30 = vpop.f32.mrb[90].mxu1  ;;  %v6463_v31 = vpop.f32.mrb[90].mxu0  ;;  %v9677_v40 = vld [vmem:[#allocation15 + $0xf40] ss:$16 sps:$4 sm:$0xff]   ;;  %v9680_v8 = vld [vmem:[#allocation15 + $0xf48] ss:$16 sps:$4 sm:$0xff]  }
 0xeac   :  { %v6493_v35 = vadd.f32 %v6476_v19, %v6466_v23  ;;  %v6423_v36 = vpop.f32.mrb[91].mxu1  ;;  %v6464_v33 = vpop.f32.mrb[91].mxu0  ;;  %v9686_v19 = vld [vmem:[#allocation15 + $0xf68] ss:$16 sps:$4 sm:$0xff]   ;;  %v6495_v15 = vadd.f32 %v6484_v11, %v10889_v29  ;;  %v9691_v16 = vld [vmem:[#allocation15 + $0xf84] ss:$16 sps:$4 sm:$0xff]  }
 0xead   :  { %v6494_v48 = vadd.f32 %v6480_v28, %v6467_v21  ;;  %v6496_v38 = vadd.f32 %v6488_v22, %v6469_v42  ;;  %v9694_v28 = vld [vmem:[#allocation15 + $0xf8c] ss:$16 sps:$4 sm:$0xff]   ;;  %v9689_v22 = vld [vmem:[#allocation15 + $0xf80] ss:$16 sps:$4 sm:$0xff]   ;;  %v9692_v23 = vld [vmem:[#allocation15 + $0xf88] ss:$16 sps:$4 sm:$0xff]  }
 0xeae   :  { %v6497_v39 = vmax.f32 %v6493_v35, 0.0  ;;  %v6499_v24 = vmax.f32 %v6495_v15, 0.0  ;;  %v9695_v29 = vld [vmem:[%s11005_s10 + $0x3a0] sm:$0xff]   ;;  %v9699_v42 = vld [vmem:[%s11005_s10 + $0x368] sm:$0xff]   ;;  %v9702_v35 = vld [vmem:[%s11005_s10 + $0x370] sm:$0xff]  }
 0xeaf   :  { %v6498_v56 = vmax.f32 %v6494_v48, 0.0  ;;  %v6500_v52 = vmax.f32 %v6496_v38, 0.0  ;;  %v9697_v10 = vld [vmem:[%s11005_s10 + $0x320] sm:$0xff]   ;;  %v9698_v30 = vld [vmem:[%s11005_s10 + $0x3a8] sm:$0xff]   ;;  %v9701_v36 = vld [vmem:[%s11005_s10 + $0x3b0] sm:$0xff]  }
 0xeb0   :  { %v6501_v46 = vpack.c.bf16 %v6497_v39, %v6497_v39  ;;  %v6503_v21 = vpack.c.bf16 %v6499_v24, %v6499_v24  ;;  %v9700_v31 = vld [vmem:[%s11005_s10 + $0x328] sm:$0xff]   ;;  %v9703_v33 = vld [vmem:[%s11005_s10 + $0x330] sm:$0xff]   ;;  %v9705_v48 = vld [vmem:[%s11005_s10 + $0x378] sm:$0xff]  }
 0xeb1   :  { %v6502_v43 = vpack.c.bf16 %v6498_v56, %v6498_v56  ;;  %v6504_v6 = vpack.c.bf16 %v6500_v52, %v6500_v52  ;;  %v9704_v38 = vld [vmem:[%s11005_s10 + $0x3b8] sm:$0xff]   ;;  %v9708_v56 = vld [vmem:[%s11005_s10 + $0x380] sm:$0xff]  }
 0xeb2   :  { %v9706_v39 = vld [vmem:[%s11005_s10 + $0x338] sm:$0xff]   ;;  %v9707_v52 = vld [vmem:[%s11005_s10 + $0x3c0] sm:$0xff]  }
 0xeb3   :  { %7164 = vmatprep.mubr.bf16.mxu1 %v6502_v43  ;;  %7246 = vmatprep.mubr.bf16.mxu0 %v6502_v43  ;;  %v9709_v43 = vld [vmem:[%s11005_s10 + $0x340] sm:$0xff]   ;;  %v8549_v15 = vld [vmem:[#allocation18 + $0x4] ss:$0 sm:$0xff] }
 0xeb4   :  { %7165 = vmatmul.mubr.bf16.vlgmr.msra.gmra.mrb[92].mxu1 %v6501_v46  ;;  %7247 = vmatmul.mubr.bf16.vlgmr.msra.gmra.mrb[92].mxu0 %v6501_v46  ;;  %v9712_v46 = vld [vmem:[%s11005_s10 + $0x348] sm:$0xff]  }
 0xeb5   :  { %7174 = vmatpush1.bf16.msra.mxu1 %v9641_v45  ;;  %7256 = vmatpush1.bf16.msra.mxu0 %v9644_v3  ;;  %v9711_v45 = vld [vmem:[%s11005_s10 + $0x388] sm:$0xff]  }
 0xeb6   :  { %8497 = vmatprep.mubr.msk.bf16.mxu1 %vm229_vm1, %v6504_v6  ;;  %8498 = vmatprep.mubr.msk.bf16.mxu0 %vm229_vm1, %v6504_v6  ;;  %v9710_v3 = vld [vmem:[%s11005_s10 + $0x3c8] sm:$0xff]   ;;  %v9715_v6 = vld [vmem:[%s11005_s10 + $0x350] sm:$0xff]  }
 0xeb7   :  { %7175 = vmatprep.subr.bf16.mxu1 %v9649_v32  ;;  %7257 = vmatprep.subr.bf16.mxu0 %v9652_v50  ;;  %v9713_v32 = vld [vmem:[%s11005_s10 + $0x3d0] sm:$0xff]  }
 0xeb8   :  { %v9714_v50 = vld [vmem:[%s11005_s10 + $0x390] sm:$0xff]  }
 0xeb9   :  { %7176 = vmatpush1.bf16.msra.mxu1 %v9647_v51  ;;  %7258 = vmatpush1.bf16.msra.mxu0 %v9650_v13  ;;  %v9716_v51 = vld [vmem:[%s11005_s10 + $0x3d8] sm:$0xff]  }
 0xeba   :  { %7177 = vmatprep.subr.bf16.mxu1 %v9655_v18  ;;  %7259 = vmatprep.subr.bf16.mxu0 %v9658_v53  ;;  %v9717_v13 = vld [vmem:[%s11005_s10 + $0x398] sm:$0xff]   ;;  %v9719_v53 = vld [vmem:[%s11005_s10 + $0x3e0] sm:$0xff]  }
 0xebb   :  { %v9718_v18 = vld [vmem:[%s11005_s10 + $0x358] sm:$0xff]  }
 0xebd   :  { %7178 = vmatpush1.bf16.msra.mxu1 %v9653_v55  ;;  %7260 = vmatpush1.bf16.msra.mxu0 %v9656_v57  ;;  %v6607_v55 = vld [vmem:[#allocation16 + $0x10] sm:$0xf] }
 0xebe   :  { %7179 = vmatprep.subr.bf16.mxu1 %v9661_v59  ;;  %7261 = vmatprep.subr.bf16.mxu0 %v9664_v60  ;;  %v6612_v57 = vrot.slane %v6607_v55, %v10242_v4  ;;  %v6620_v59 = vrot.slane %v6607_v55, %v10290_v54  ;;  %v6616_v60 = vrot.slane %v6607_v55, %v10276_v49 }
 0xec1   :  { %7180 = vmatpush1.bf16.msra.mxu1 %v9659_v34  ;;  %7262 = vmatpush1.bf16.msra.mxu0 %v9662_v58 }
 0xec2   :  { %7181 = vmatprep.subr.bf16.mxu1 %v9667_v61  ;;  %7263 = vmatprep.subr.bf16.mxu0 %v9670_v62 }
 0xec5   :  { %7182 = vmatpush1.bf16.msra.mxu1 %v9665_v27  ;;  %7264 = vmatpush1.bf16.msra.mxu0 %v9668_v63 }
 0xec6   :  { %7183 = vmatprep.subr.bf16.mxu1 %v9673_v2  ;;  %7265 = vmatprep.subr.bf16.mxu0 %v9676_v0 }
 0xec9   :  { %7184 = vmatpush1.bf16.msra.mxu1 %v9671_v17  ;;  %7266 = vmatpush1.bf16.msra.mxu0 %v9674_v5 }
 0xeca   :  { %7185 = vmatprep.subr.bf16.mxu1 %v9679_v47  ;;  %7267 = vmatprep.subr.bf16.mxu0 %v9682_v7 }
 0xecd   :  { %7186 = vmatpush1.bf16.msra.mxu1 %v9677_v40  ;;  %7268 = vmatpush1.bf16.msra.mxu0 %v9680_v8 }
 0xece   :  { %7187 = vmatprep.subr.bf16.mxu1 %v9685_v12  ;;  %7269 = vmatprep.subr.bf16.mxu0 %v9688_v37 }
 0xed1   :  { %7188 = vmatpush1.bf16.msra.mxu1 %v9683_v14  ;;  %7270 = vmatpush1.bf16.msra.mxu0 %v9686_v19 }
 0xed2   :  { %7189 = vmatprep.subr.bf16.mxu1 %v9691_v16  ;;  %7271 = vmatprep.subr.bf16.mxu0 %v9694_v28 }
 0xed5   :  { %7190 = vmatpush1.bf16.msra.mxu1 %v9689_v22  ;;  %7272 = vmatpush1.bf16.msra.mxu0 %v9692_v23 }
 0xed6   :  { %7556 = vmatprep.subr.bf16.mxu0 %v10012_v1  ;;  %8665 = vmatprep.subr.bf16.mxu1 %v9696_v9 }
 0xed8   :  { %7206 = vmatmul.mubr.bf16.vlgmr.msra.gmra.mrb[92].mxu1 %v6503_v21  ;;  %7288 = vmatmul.mubr.bf16.vlgmr.msra.gmra.mrb[92].mxu0 %v6503_v21 }
 0xed9   :  { %7557 = vmatpush1.bf16.msra.mxu0 %v9695_v29  ;;  %8666 = vmatpush3.bf16.msra.mxu1 %v9697_v10 }
 0xeda   :  { %7558 = vmatprep.subr.bf16.mxu0 %v10012_v1  ;;  %8667 = vmatprep.subr.bf16.mxu1 %v9699_v42  ;;  %v6133_v42 = vsub.f32 1.0, %v10857_v26 }
 0xedd   :  { %7559 = vmatpush1.bf16.msra.mxu0 %v9698_v30  ;;  %8668 = vmatpush3.bf16.msra.mxu1 %v9700_v31  ;;  %v7606_v30 = vrot.slane %v6133_v42, %v10242_v4 }
 0xede   :  { %7560 = vmatprep.subr.bf16.mxu0 %v10012_v1  ;;  %8669 = vmatprep.subr.bf16.mxu1 %v9702_v35 }
 0xee1   :  { %7561 = vmatpush1.bf16.msra.mxu0 %v9701_v36  ;;  %8670 = vmatpush3.bf16.msra.mxu1 %v9703_v33 }
 0xee2   :  { %7562 = vmatprep.subr.bf16.mxu0 %v10012_v1  ;;  %8671 = vmatprep.subr.bf16.mxu1 %v9705_v48 }
 0xee5   :  { %7563 = vmatpush1.bf16.msra.mxu0 %v9704_v38  ;;  %8672 = vmatpush3.bf16.msra.mxu1 %v9706_v39 }
 0xee6   :  { %7564 = vmatprep.subr.bf16.mxu0 %v10012_v1  ;;  %8673 = vmatprep.subr.bf16.mxu1 %v9708_v56 }
 0xee9   :  { %7565 = vmatpush1.bf16.msra.mxu0 %v9707_v52  ;;  %8674 = vmatpush3.bf16.msra.mxu1 %v9709_v43 }
 0xeea   :  { %7566 = vmatprep.subr.bf16.mxu0 %v10012_v1  ;;  %8675 = vmatprep.subr.bf16.mxu1 %v9711_v45 }
 0xeed   :  { %7567 = vmatpush1.bf16.msra.mxu0 %v9710_v3  ;;  %8676 = vmatpush3.bf16.msra.mxu1 %v9712_v46 }
 0xeee   :  { %7568 = vmatprep.subr.bf16.mxu0 %v10012_v1  ;;  %8677 = vmatprep.subr.bf16.mxu1 %v9714_v50 }
 0xef1   :  { %7569 = vmatpush1.bf16.msra.mxu0 %v9713_v32  ;;  %8678 = vmatpush3.bf16.msra.mxu1 %v9715_v6 }
 0xef2   :  { %7570 = vmatprep.subr.bf16.mxu0 %v10012_v1  ;;  %8679 = vmatprep.subr.bf16.mxu1 %v9717_v13 }
 0xef5   :  { %7571 = vmatpush1.bf16.msra.mxu0 %v9716_v51  ;;  %8680 = vmatpush3.bf16.msra.mxu1 %v9718_v18 }
 0xef6   :  { %7572 = vmatprep.subr.bf16.mxu0 %v10012_v1  ;;  %v6624_v1 = vrot.slane %v6607_v55, %v10283_v20 }
 0xef9   :  { %7573 = vmatpush1.bf16.msra.mxu0 %v9719_v53 }
 0xfab   :  { %v7207_v34 = vpop.f32.mrb[92].mxu1  ;;  %v7289_v58 = vpop.f32.mrb[92].mxu0 }
 0xfac   :  { %v8703_v61 = vadd.f32 %v7207_v34, %v6612_v57  ;;  %v8705_v62 = vadd.f32 %v7289_v58, %v6620_v59  ;;  %v7209_v27 = vpop.f32.mrb[93].mxu1  ;;  %v7291_v63 = vpop.f32.mrb[93].mxu0 }
 0xfad   :  { %v8704_v2 = vadd.f32 %v7209_v27, %v6616_v60  ;;  %v8706_v0 = vadd.f32 %v7291_v63, %v6624_v1  ;;  %v7211_v17 = vpop.f32.mrb[94].mxu1  ;;  %v7293_v5 = vpop.f32.mrb[94].mxu0 }
 0xfae   :  { %v7296_v47 = vmax.f32 %v8703_v61, 0.0  ;;  %v7298_v7 = vmax.f32 %v8705_v62, 0.0  ;;  %v7212_v40 = vpop.f32.mrb[95].mxu1  ;;  %v7294_v8 = vpop.f32.mrb[95].mxu0 }
 0xfaf   :  { %v7297_v11 = vmax.f32 %v8704_v2, 0.0  ;;  %v7299_v54 = vmax.f32 %v8706_v0, 0.0 }
 0xfb0   :  { %v7300_v37 = vpack.c.bf16 %v7296_v47, %v7296_v47  ;;  %v7302_v20 = vpack.c.bf16 %v7298_v7, %v7298_v7 }
 0xfb1   :  { %v7301_v12 = vpack.c.bf16 %v7297_v11, %v7297_v11  ;;  %v7303_v49 = vpack.c.bf16 %v7299_v54, %v7299_v54 }
 0xfb3   :  { %7548 = vmatprep.mubr.bf16.mxu1 %v7301_v12  ;;  %8575 = vmatprep.mubr.msk.bf16.mxu0 %vm229_vm1, %v7303_v49 }
 0xfb4   :  { %7549 = vmatmul.mubr.bf16.vlgmr.msra.gmra.mrb[96].mxu1 %v7300_v37  ;;  %7589 = vmatmul.mubr.bf16.vlgmr.msra.gmra.mrb[96].mxu0 %v7302_v20 }
0x1087   :  { %v8681_v14 = vpop.f32.mrb[96].mxu1  ;;  %v7590_v19 = vpop.f32.mrb[96].mxu0 }
0x1088   :  { %v8682_v16 = vpop.f32.mrb[97].mxu1  ;;  %v7592_v28 = vpop.f32.mrb[97].mxu0 }
0x1089   :  { %v8683_v22 = vadd.f32 %v8682_v16, %v8681_v14  ;;  %v8684_v23 = vpop.f32.mrb[98].mxu1  ;;  %v7593_v24 = vpop.f32.mrb[98].mxu0 }
0x108a   :  { %v8685_v9 = vpop.f32.mrb[99].mxu1  ;;  %v7594_v29 = vpop.f32.mrb[99].mxu0 }
0x108b   :  { %v7551_v10 = vadd.f32 %v8683_v22, %v8549_v15 }
0x108d   :  { %v7591_v21 = vadd.f32 %v7590_v19, %v7551_v10 }
0x108f   :  { %7598 = vrot.lane.b32.xlu0 %v7591_v21, %s10013_s18  ;;  %9736 = vtanh.f32 %v7591_v21 }
0x1099   :  { %v9737_v31 = vpop.eup %9736 }
0x109a   :  { %v7609_v35 = vsub.f32 0.0, %v9737_v31 }
0x109c   :  { %v7614_v36 = vmul.f32 %v7609_v35, %v7606_v30  ;;  %v7610_v48 = vmul.f32 1.442695, %v7609_v35 }
0x109e   :  { %v7615_v33 = vadd.f32 %v7614_v36, %v10850_v25  ;;  %9738 = vpow2.f32 %v7610_v48 }
0x10a8   :  { %v9739_v52 = vpop.eup %9738 }
0x1101   :  { %v7599_v38 = vpop.permute.xlu0 %7598 }
0x1102   :  { %v7601_v39 = vsub.f32 %v10862_v41, %v7599_v38 }
0x1104   :  { %v7608_v56 = vmul.f32 %v7606_v30, %v7601_v39 }
0x1106   :  { %v7612_v43 = vmul.f32 %v9739_v52, %v7608_v56 }
0x1108   :  { %v7613_v45 = vadd.f32 %v7612_v43, %v10865_v44 }
0x110a   :  { %v7616_v3 = vmul.f32 -0.5, %v7613_v45 }
0x110c   :  { %v7617_v46 = vmul.f32 %v7616_v3, %v7613_v45 }
0x110e   :  { %v8576_v26 = vadd.f32 -0.9189385, %v7617_v46 }
0x1110   :  { %v7619_v32 = vadd.f32 %v8576_v26, %v7615_v33 }
0x1112   :  { %7620 = vst.msk [vmem:[%s11007_s12] sm:$0xff] %vm229_vm1, %v7619_v32 }
0x1113   :  { %7625 = vsyncpa [#allocation3], 1 }
0x1114   :  { %7626 = vsyncpa [#allocation5], 1 }
0x1115   :  { %7627 = vsyncpa [#allocation8], 1 }
0x1116   :  { %7628 = vsyncpa [#allocation11], 1 }
0x1117   :  { %7629 = vsyncpa [#allocation14], 1 }
0x1118   :  { %7630 = vsyncpa [#allocation17], 1 }

</bundles_post_ra>
